<compile_context>
chip_gen: v6e
topology: v6e:2x2x1
jax: 0.10.0
libtpu: 0.0.40
codegen_flags: <defaults>
</compile_context>

<pallas_src>
import functools
import math

import jax
import jax.numpy as jnp
from jax import lax
from jax.experimental import pallas as pl
from jax.experimental.pallas import tpu as pltpu


def _round_up(x, m):
    return ((x + m - 1) // m) * m


def _graph_attention_kernel(row_s_ref, row_l_ref, col_s_ref, edge_attr_ref,
                            nodes_ref, wqkv_ref, bqkv_ref,
                            we_ref, be_ref, wo_ref, bo_ref,
                            hsum_ref, hsumt_ref,
                            out_ref,
                            q_sc, k_sc, v_sc, acc_sc,
                            *, dim):
    f32 = jnp.float32
    i = pl.program_id(0)
    n_pad = nodes_ref.shape[0]
    te = row_s_ref.shape[0]

    # ---- one-time work (first edge tile): fused QKV projection + accumulator init ----
    # Q is pre-scaled by 1/sqrt(d_k) via the wrapper (folded into wqkv/bqkv columns).
    @pl.when(i == 0)
    def _init():
        proj = (jnp.dot(nodes_ref[...], wqkv_ref[...],
                        preferred_element_type=f32) + bqkv_ref[...])      # (Npad, 3D)
        q_sc[...] = proj[:, 0:dim]            # one-time lane slices (not per tile)
        k_sc[...] = proj[:, dim:2 * dim]
        v_sc[...] = proj[:, 2 * dim:3 * dim]
        acc_sc[...] = jnp.zeros_like(acc_sc)

    # ---- per-edge-tile work ----
    # One-hots built on-chip from raw int32 indices.  Padded edges carry the sentinel
    # index == n_pad, so their rows/columns are all-zero (no contribution).
    gather_iota = lax.broadcasted_iota(jnp.int32, (te, n_pad), 1)
    row_oh = (gather_iota == row_s_ref[...]).astype(f32)                  # (TE, Npad)
    col_oh = (gather_iota == col_s_ref[...]).astype(f32)                  # (TE, Npad)
    # Scatter one-hot built directly transposed from lane-major indices (no XLU transpose).
    row_oh_t = (lax.broadcasted_iota(jnp.int32, (n_pad, te), 0)
                == row_l_ref[...]).astype(f32)                            # (Npad, TE)

    q_r = jnp.dot(row_oh, q_sc[...], preferred_element_type=f32)          # (TE, D) = Q[row]/sqrt(dk)
    k_c = jnp.dot(col_oh, k_sc[...], preferred_element_type=f32)          # (TE, D) = K[col]
    v_c = jnp.dot(col_oh, v_sc[...], preferred_element_type=f32)          # (TE, D) = V[col]

    e_feat = (jnp.dot(edge_attr_ref[...], we_ref[...],
                      preferred_element_type=f32) + be_ref[...])          # (TE, D)

    # Per-edge per-head scores: sum over head lanes of (Q[row]/sqrt(dk)) * (K[col] + E).
    scores = jnp.dot(q_r * (k_c + e_feat), hsum_ref[...],
                     preferred_element_type=f32)                          # (TE, H)
    exp_s = jnp.exp(scores)
    exp_wide = jnp.dot(exp_s, hsumt_ref[...],
                       preferred_element_type=f32)                        # (TE, D)

    # Fused scatter-add: unnormalized messages and softmax denominators in one MXU pass.
    scatter_in = jnp.concatenate([exp_wide * v_c, exp_wide], axis=1)      # (TE, 2D)
    acc_sc[...] += jnp.dot(row_oh_t, scatter_in,
                           preferred_element_type=f32)                    # (Npad, 2D)

    # ---- finalize on the last edge tile: normalize per node + output projection ----
    @pl.when(i == pl.num_programs(0) - 1)
    def _finalize():
        acc = acc_sc[...]
        out_nodes = acc[:, 0:dim] / (acc[:, dim:2 * dim] + 1e-8)
        out_ref[...] = (jnp.dot(out_nodes, wo_ref[...],
                                preferred_element_type=f32) + bo_ref[...])


def graph_attention(nodes, edge_index, edge_attr, params, n_heads, *, edge_tile=None):
    N, D = nodes.shape
    E, edge_dim = edge_attr.shape
    f32 = jnp.float32
    d_k = D // n_heads
    scale = 1.0 / math.sqrt(d_k)

    # ---- node padding (sublane multiple); padded rows receive no edges, sliced at end ----
    n_pad = _round_up(max(N, 8), 8)
    if n_pad != N:
        nodes = jnp.pad(nodes, ((0, n_pad - N), (0, 0)))

    # ---- edge tiling: MXU-friendly multiple of 128 ----
    if edge_tile is None:
        edge_tile = 512
    te = min(_round_up(edge_tile, 128), _round_up(E, 128))
    te = max(te, 128)
    e_pad = _round_up(E, te)
    pad = e_pad - E
    n_tiles = e_pad // te

    row = edge_index[0].astype(jnp.int32)
    col = edge_index[1].astype(jnp.int32)
    if pad:
        sentinel = jnp.full((pad,), n_pad, jnp.int32)   # matches no node -> no contribution
        row = jnp.concatenate([row, sentinel])
        col = jnp.concatenate([col, sentinel])
        edge_attr = jnp.pad(edge_attr, ((0, pad), (0, 0)))
    row_s = row[:, None]     # (E_pad, 1) sublane-major (gather one-hot)
    row_l = row[None, :]     # (1, E_pad) lane-major    (scatter one-hot, already transposed)
    col_s = col[:, None]     # (E_pad, 1)

    # ---- fused QKV weights; 1/sqrt(d_k) folded into the Q columns (head matrices stay 0/1) ----
    wqkv = jnp.concatenate([params["wq"] * scale, params["wk"], params["wv"]], axis=1)   # (D, 3D)
    bqkv = jnp.concatenate([params["bq"] * scale, params["bk"], params["bv"]])[None, :]  # (1, 3D)

    # ---- constant head-sum / head-broadcast matrices (computed once, tiny) ----
    lane_head = jnp.arange(D, dtype=jnp.int32) // d_k
    hsum = (lane_head[:, None] == jnp.arange(n_heads, dtype=jnp.int32)[None, :]).astype(f32)  # (D, H)
    hsum_t = hsum.T                                                                            # (H, D)

    # ---- VMEM budget computed from actual buffer sizes (cap fits v7x's 64 MiB VMEM) ----
    itemsz = 4
    tiled_bytes = 2 * itemsz * (te + te + te + te * edge_dim)              # double-buffered edge tiles
    fixed_bytes = itemsz * (n_pad * D + D * 3 * D + 3 * D + edge_dim * D + D
                            + D * D + D + D * n_heads + n_heads * D)
    out_bytes = 2 * itemsz * n_pad * D
    scratch_bytes = itemsz * (3 * n_pad * D + n_pad * 2 * D)
    tmp_bytes = itemsz * (3 * te * n_pad + te * (6 * D + 2 * n_heads))     # one-hots + per-tile temps
    total = tiled_bytes + fixed_bytes + out_bytes + scratch_bytes + tmp_bytes
    vmem_limit = int(min(56 * 2**20, max(32 * 2**20, 2 * total)))

    kernel = functools.partial(_graph_attention_kernel, dim=D)

    def build(single_buffer):
        def fixed(shape):
            nd = len(shape)
            kwargs = {}
            if single_buffer:
                kwargs["pipeline_mode"] = pl.Buffered(1)   # invariant inputs: single buffer
            return pl.BlockSpec(shape, lambda i, _nd=nd: (0,) * _nd, **kwargs)

        in_specs = [
            pl.BlockSpec((te, 1), lambda i: (i, 0)),            # row indices (sublane-major)
            pl.BlockSpec((1, te), lambda i: (0, i)),            # row indices (lane-major)
            pl.BlockSpec((te, 1), lambda i: (i, 0)),            # col indices
            pl.BlockSpec((te, edge_dim), lambda i: (i, 0)),     # edge_attr tile
            fixed((n_pad, D)),                                  # nodes
            fixed((D, 3 * D)),                                  # wqkv (Q pre-scaled)
            fixed((1, 3 * D)),                                  # bqkv
            fixed((edge_dim, D)),                               # we
            fixed((1, D)),                                      # be
            fixed((D, D)),                                      # wo
            fixed((1, D)),                                      # bo
            fixed((D, n_heads)),                                # head-sum matrix
            fixed((n_heads, D)),                                # head-broadcast matrix
        ]
        return pl.pallas_call(
            kernel,
            out_shape=jax.ShapeDtypeStruct((n_pad, D), f32),
            grid=(n_tiles,),
            in_specs=in_specs,
            out_specs=pl.BlockSpec((n_pad, D), lambda i: (0, 0)),
            scratch_shapes=[
                pltpu.VMEM((n_pad, D), f32),       # Q / sqrt(d_k)
                pltpu.VMEM((n_pad, D), f32),       # K
                pltpu.VMEM((n_pad, D), f32),       # V
                pltpu.VMEM((n_pad, 2 * D), f32),   # [messages | softmax denominators]
            ],
            compiler_params=pltpu.CompilerParams(
                dimension_semantics=("arbitrary",),    # edge axis accumulates into scratch
                vmem_limit_bytes=vmem_limit,
            ),
        )

    operands = (row_s, row_l, col_s, edge_attr,
                nodes, wqkv, bqkv,
                params["we"], params["be"][None, :],
                params["wo"], params["bo"][None, :],
                hsum, hsum_t)

    try:
        out_padded = build(True)(*operands)
    except Exception:
        # pipeline_mode / Buffered(1) not supported by this JAX build -> default buffering.
        out_padded = build(False)(*operands)

    return out_padded[:N]


def graph_attention_reference(nodes, edge_index, edge_attr, params, n_heads):
    """Pure-JAX replica of the PyTorch forward, for verification."""
    N, D = nodes.shape
    d_k = D // n_heads
    Q = (nodes @ params["wq"] + params["bq"]).reshape(N, n_heads, d_k)
    K = (nodes @ params["wk"] + params["bk"]).reshape(N, n_heads, d_k)
    V = (nodes @ params["wv"] + params["bv"]).reshape(N, n_heads, d_k)
    row, col = edge_index[0], edge_index[1]
    qk = (Q[row] * K[col]).sum(-1) / math.sqrt(d_k)
    ef = (edge_attr @ params["we"] + params["be"]).reshape(-1, n_heads, d_k)
    qk = qk + (Q[row] * ef).sum(-1) / math.sqrt(d_k)
    aw = jnp.zeros((N, n_heads), jnp.float32).at[row].add(jnp.exp(qk))
    aw = jnp.exp(qk) / (aw[row] + 1e-8)
    msg = aw[..., None] * V[col]
    out = jnp.zeros((N, n_heads, d_k), jnp.float32).at[row].add(msg).reshape(N, -1)
    return out @ params["wo"] + params["bo"]


def _init_linear(key, in_dim, out_dim):
    # PyTorch nn.Linear default init: U(-1/sqrt(in), 1/sqrt(in)); weight returned
    # pre-transposed as (in_dim, out_dim) so y = x @ W + b == PyTorch x @ W.T + b.
    kw, kb = jax.random.split(key)
    bound = 1.0 / math.sqrt(in_dim)
    w = jax.random.uniform(kw, (in_dim, out_dim), jnp.float32, -bound, bound)
    b = jax.random.uniform(kb, (out_dim,), jnp.float32, -bound, bound)
    return w, b


if __name__ == "__main__":
    node_dim, edge_dim, n_heads = 32, 16, 8
    N, E = 16, 300   # E not a multiple of the tile -> exercises sentinel padding

    key = jax.random.PRNGKey(0)
    keys = jax.random.split(key, 8)
    nodes = jax.random.normal(keys[0], (N, node_dim), jnp.float32)
    edge_index = jax.random.randint(keys[1], (2, E), 0, N, jnp.int32)
    edge_attr = jax.random.normal(keys[2], (E, edge_dim), jnp.float32)

    params = {}
    params["wq"], params["bq"] = _init_linear(keys[3], node_dim, node_dim)
    params["wk"], params["bk"] = _init_linear(keys[4], node_dim, node_dim)
    params["wv"], params["bv"] = _init_linear(keys[5], node_dim, node_dim)
    params["we"], params["be"] = _init_linear(keys[6], edge_dim, node_dim)
    params["wo"], params["bo"] = _init_linear(keys[7], node_dim, node_dim)

    # edge_tile=128 -> grid of 3 edge tiles (300 -> 384 padded), exercising accumulation
    # across tiles, the sentinel padding, and the single init/finalize phases.
    out = graph_attention(nodes, edge_index, edge_attr, params, n_heads, edge_tile=128)
    out = jax.block_until_ready(out)

    ref = graph_attention_reference(nodes, edge_index, edge_attr, params, n_heads)
    assert out.shape == (N, node_dim)
    assert jnp.allclose(out, ref, atol=1e-3, rtol=1e-3), (
        f"max abs diff {jnp.max(jnp.abs(out - ref))}")
    print("KERNEL_OK")
</pallas_src>

<mosaic_0001>
module attributes {stable_mosaic.version = 11 : i64} {
  func.func @_graph_attention_kernel(%arg0: i32, %arg1: memref<128x1xi32, #tpu.memory_space<vmem>>, %arg2: memref<1x128xi32, #tpu.memory_space<vmem>>, %arg3: memref<128x1xi32, #tpu.memory_space<vmem>>, %arg4: memref<128x16xf32, #tpu.memory_space<vmem>>, %arg5: memref<16x32xf32, #tpu.memory_space<vmem>>, %arg6: memref<32x96xf32, #tpu.memory_space<vmem>>, %arg7: memref<1x96xf32, #tpu.memory_space<vmem>>, %arg8: memref<16x32xf32, #tpu.memory_space<vmem>>, %arg9: memref<1x32xf32, #tpu.memory_space<vmem>>, %arg10: memref<32x32xf32, #tpu.memory_space<vmem>>, %arg11: memref<1x32xf32, #tpu.memory_space<vmem>>, %arg12: memref<32x8xf32, #tpu.memory_space<vmem>>, %arg13: memref<8x32xf32, #tpu.memory_space<vmem>>, %arg14: memref<16x32xf32, #tpu.memory_space<vmem>>, %arg15: memref<16x32xf32, #tpu.memory_space<vmem>>, %arg16: memref<16x32xf32, #tpu.memory_space<vmem>>, %arg17: memref<16x32xf32, #tpu.memory_space<vmem>>, %arg18: memref<16x64xf32, #tpu.memory_space<vmem>>) attributes {dimension_semantics = [#tpu.dimension_semantics<arbitrary>], iteration_bounds = array<i64: 3>, scalar_prefetch = 0 : i64, scratch_operands = 4 : i64, tpu.core_type = #tpu.core_type<tc>, window_params = [{transform_indices = @transform_0, window_bounds = array<i64: 128, 1>}, {transform_indices = @transform_1, window_bounds = array<i64: 1, 128>}, {transform_indices = @transform_2, window_bounds = array<i64: 128, 1>}, {transform_indices = @transform_3, window_bounds = array<i64: 128, 16>}, {pipeline_mode = #tpu.pipeline_mode<synchronous>, transform_indices = @transform_4, window_bounds = array<i64: 16, 32>}, {pipeline_mode = #tpu.pipeline_mode<synchronous>, transform_indices = @transform_5, window_bounds = array<i64: 32, 96>}, {pipeline_mode = #tpu.pipeline_mode<synchronous>, transform_indices = @transform_6, window_bounds = array<i64: 1, 96>}, {pipeline_mode = #tpu.pipeline_mode<synchronous>, transform_indices = @transform_7, window_bounds = array<i64: 16, 32>}, {pipeline_mode = #tpu.pipeline_mode<synchronous>, transform_indices = @transform_8, window_bounds = array<i64: 1, 32>}, {pipeline_mode = #tpu.pipeline_mode<synchronous>, transform_indices = @transform_9, window_bounds = array<i64: 32, 32>}, {pipeline_mode = #tpu.pipeline_mode<synchronous>, transform_indices = @transform_10, window_bounds = array<i64: 1, 32>}, {pipeline_mode = #tpu.pipeline_mode<synchronous>, transform_indices = @transform_11, window_bounds = array<i64: 32, 8>}, {pipeline_mode = #tpu.pipeline_mode<synchronous>, transform_indices = @transform_12, window_bounds = array<i64: 8, 32>}, {pipeline_mode = #tpu.pipeline_mode<synchronous>, transform_indices = @transform_13, window_bounds = array<i64: 16, 32>}]} {
    %c0_i32 = arith.constant 0 : i32
    %0 = arith.cmpi eq, %arg0, %c0_i32 : i32
    %1 = arith.extui %0 : i1 to i32
    %c0_i32_0 = arith.constant 0 : i32
    %2 = arith.cmpi ne, %1, %c0_i32_0 : i32
    scf.if %2 {
      %c0_33 = arith.constant 0 : index
      %c0_34 = arith.constant 0 : index
      %48 = vector.load %arg5[%c0_33, %c0_34] : memref<16x32xf32, #tpu.memory_space<vmem>>, vector<16x32xf32>
      %c0_35 = arith.constant 0 : index
      %c0_36 = arith.constant 0 : index
      %49 = vector.load %arg6[%c0_35, %c0_36] : memref<32x96xf32, #tpu.memory_space<vmem>>, vector<32x96xf32>
      %cst_37 = arith.constant dense<0.000000e+00> : vector<16x96xf32>
      %50 = tpu.matmul %48, %49, %cst_37 {dimension_numbers = #tpu.dot_dimension_numbers<[1], [0], [0], [1], [0, 0, 1, 1], [], []>} : vector<16x32xf32>, vector<32x96xf32>, vector<16x96xf32> -> vector<16x96xf32>
      %c0_38 = arith.constant 0 : index
      %c0_39 = arith.constant 0 : index
      %51 = vector.load %arg7[%c0_38, %c0_39] : memref<1x96xf32, #tpu.memory_space<vmem>>, vector<1x96xf32>
      %52 = vector.broadcast %51 : vector<1x96xf32> to vector<16x96xf32>
      %53 = arith.addf %50, %52 : vector<16x96xf32>
      %54 = vector.extract_strided_slice %53 {offsets = [0, 0], sizes = [16, 32], strides = [1, 1]} : vector<16x96xf32> to vector<16x32xf32>
      %c0_40 = arith.constant 0 : index
      %c0_41 = arith.constant 0 : index
      %55 = vector.load %arg15[%c0_40, %c0_41] : memref<16x32xf32, #tpu.memory_space<vmem>>, vector<16x32xf32>
      tpu.vector_store %arg15[%c0_40, %c0_41], %54 {strides = array<i32>} : memref<16x32xf32, #tpu.memory_space<vmem>>, vector<16x32xf32>,
      %56 = vector.extract_strided_slice %53 {offsets = [0, 32], sizes = [16, 32], strides = [1, 1]} : vector<16x96xf32> to vector<16x32xf32>
      %c0_42 = arith.constant 0 : index
      %c0_43 = arith.constant 0 : index
      %57 = vector.load %arg16[%c0_42, %c0_43] : memref<16x32xf32, #tpu.memory_space<vmem>>, vector<16x32xf32>
      tpu.vector_store %arg16[%c0_42, %c0_43], %56 {strides = array<i32>} : memref<16x32xf32, #tpu.memory_space<vmem>>, vector<16x32xf32>,
      %58 = vector.extract_strided_slice %53 {offsets = [0, 64], sizes = [16, 32], strides = [1, 1]} : vector<16x96xf32> to vector<16x32xf32>
      %c0_44 = arith.constant 0 : index
      %c0_45 = arith.constant 0 : index
      %59 = vector.load %arg17[%c0_44, %c0_45] : memref<16x32xf32, #tpu.memory_space<vmem>>, vector<16x32xf32>
      tpu.vector_store %arg17[%c0_44, %c0_45], %58 {strides = array<i32>} : memref<16x32xf32, #tpu.memory_space<vmem>>, vector<16x32xf32>,
      %cst_46 = arith.constant 0.000000e+00 : f32
      %60 = vector.broadcast %cst_46 : f32 to vector<16x64xf32>
      %c0_47 = arith.constant 0 : index
      %c0_48 = arith.constant 0 : index
      %61 = vector.load %arg18[%c0_47, %c0_48] : memref<16x64xf32, #tpu.memory_space<vmem>>, vector<16x64xf32>
      tpu.vector_store %arg18[%c0_47, %c0_48], %60 {strides = array<i32>} : memref<16x64xf32, #tpu.memory_space<vmem>>, vector<16x64xf32>,
    } else {
    }
    %3 = tpu.iota {dimensions = array<i32: 1>} : vector<128x16xi32>
    %c0 = arith.constant 0 : index
    %c0_1 = arith.constant 0 : index
    %4 = vector.load %arg1[%c0, %c0_1] : memref<128x1xi32, #tpu.memory_space<vmem>>, vector<128x1xi32>
    %5 = vector.broadcast %4 : vector<128x1xi32> to vector<128x16xi32>
    %6 = arith.cmpi eq, %3, %5 : vector<128x16xi32>
    %7 = arith.extui %6 : vector<128x16xi1> to vector<128x16xi32>
    %8 = arith.sitofp %7 : vector<128x16xi32> to vector<128x16xf32>
    %c0_2 = arith.constant 0 : index
    %c0_3 = arith.constant 0 : index
    %9 = vector.load %arg3[%c0_2, %c0_3] : memref<128x1xi32, #tpu.memory_space<vmem>>, vector<128x1xi32>
    %10 = vector.broadcast %9 : vector<128x1xi32> to vector<128x16xi32>
    %11 = arith.cmpi eq, %3, %10 : vector<128x16xi32>
    %12 = arith.extui %11 : vector<128x16xi1> to vector<128x16xi32>
    %13 = arith.sitofp %12 : vector<128x16xi32> to vector<128x16xf32>
    %14 = tpu.iota {dimensions = array<i32: 0>} : vector<16x128xi32>
    %c0_4 = arith.constant 0 : index
    %c0_5 = arith.constant 0 : index
    %15 = vector.load %arg2[%c0_4, %c0_5] : memref<1x128xi32, #tpu.memory_space<vmem>>, vector<1x128xi32>
    %16 = vector.broadcast %15 : vector<1x128xi32> to vector<16x128xi32>
    %17 = arith.cmpi eq, %14, %16 : vector<16x128xi32>
    %18 = arith.extui %17 : vector<16x128xi1> to vector<16x128xi32>
    %19 = arith.sitofp %18 : vector<16x128xi32> to vector<16x128xf32>
    %c0_6 = arith.constant 0 : index
    %c0_7 = arith.constant 0 : index
    %20 = vector.load %arg15[%c0_6, %c0_7] : memref<16x32xf32, #tpu.memory_space<vmem>>, vector<16x32xf32>
    %cst = arith.constant dense<0.000000e+00> : vector<128x32xf32>
    %21 = tpu.matmul %8, %20, %cst {dimension_numbers = #tpu.dot_dimension_numbers<[1], [0], [0], [1], [0, 0, 1, 1], [], []>} : vector<128x16xf32>, vector<16x32xf32>, vector<128x32xf32> -> vector<128x32xf32>
    %c0_8 = arith.constant 0 : index
    %c0_9 = arith.constant 0 : index
    %22 = vector.load %arg16[%c0_8, %c0_9] : memref<16x32xf32, #tpu.memory_space<vmem>>, vector<16x32xf32>
    %cst_10 = arith.constant dense<0.000000e+00> : vector<128x32xf32>
    %23 = tpu.matmul %13, %22, %cst_10 {dimension_numbers = #tpu.dot_dimension_numbers<[1], [0], [0], [1], [0, 0, 1, 1], [], []>} : vector<128x16xf32>, vector<16x32xf32>, vector<128x32xf32> -> vector<128x32xf32>
    %c0_11 = arith.constant 0 : index
    %c0_12 = arith.constant 0 : index
    %24 = vector.load %arg17[%c0_11, %c0_12] : memref<16x32xf32, #tpu.memory_space<vmem>>, vector<16x32xf32>
    %cst_13 = arith.constant dense<0.000000e+00> : vector<128x32xf32>
    %25 = tpu.matmul %13, %24, %cst_13 {dimension_numbers = #tpu.dot_dimension_numbers<[1], [0], [0], [1], [0, 0, 1, 1], [], []>} : vector<128x16xf32>, vector<16x32xf32>, vector<128x32xf32> -> vector<128x32xf32>
    %c0_14 = arith.constant 0 : index
    %c0_15 = arith.constant 0 : index
    %26 = vector.load %arg4[%c0_14, %c0_15] : memref<128x16xf32, #tpu.memory_space<vmem>>, vector<128x16xf32>
    %c0_16 = arith.constant 0 : index
    %c0_17 = arith.constant 0 : index
    %27 = vector.load %arg8[%c0_16, %c0_17] : memref<16x32xf32, #tpu.memory_space<vmem>>, vector<16x32xf32>
    %cst_18 = arith.constant dense<0.000000e+00> : vector<128x32xf32>
    %28 = tpu.matmul %26, %27, %cst_18 {dimension_numbers = #tpu.dot_dimension_numbers<[1], [0], [0], [1], [0, 0, 1, 1], [], []>} : vector<128x16xf32>, vector<16x32xf32>, vector<128x32xf32> -> vector<128x32xf32>
    %c0_19 = arith.constant 0 : index
    %c0_20 = arith.constant 0 : index
    %29 = vector.load %arg9[%c0_19, %c0_20] : memref<1x32xf32, #tpu.memory_space<vmem>>, vector<1x32xf32>
    %30 = vector.broadcast %29 : vector<1x32xf32> to vector<128x32xf32>
    %31 = arith.addf %28, %30 : vector<128x32xf32>
    %32 = arith.addf %23, %31 : vector<128x32xf32>
    %33 = arith.mulf %21, %32 : vector<128x32xf32>
    %c0_21 = arith.constant 0 : index
    %c0_22 = arith.constant 0 : index
    %34 = vector.load %arg12[%c0_21, %c0_22] : memref<32x8xf32, #tpu.memory_space<vmem>>, vector<32x8xf32>
    %cst_23 = arith.constant dense<0.000000e+00> : vector<128x8xf32>
    %35 = tpu.matmul %33, %34, %cst_23 {dimension_numbers = #tpu.dot_dimension_numbers<[1], [0], [0], [1], [0, 0, 1, 1], [], []>} : vector<128x32xf32>, vector<32x8xf32>, vector<128x8xf32> -> vector<128x8xf32>
    %36 = math.exp %35 : vector<128x8xf32>
    %c0_24 = arith.constant 0 : index
    %c0_25 = arith.constant 0 : index
    %37 = vector.load %arg13[%c0_24, %c0_25] : memref<8x32xf32, #tpu.memory_space<vmem>>, vector<8x32xf32>
    %cst_26 = arith.constant dense<0.000000e+00> : vector<128x32xf32>
    %38 = tpu.matmul %36, %37, %cst_26 {dimension_numbers = #tpu.dot_dimension_numbers<[1], [0], [0], [1], [0, 0, 1, 1], [], []>} : vector<128x8xf32>, vector<8x32xf32>, vector<128x32xf32> -> vector<128x32xf32>
    %39 = arith.mulf %38, %25 : vector<128x32xf32>
    %40 = tpu.concatenate %39, %38 in 1 : vector<128x32xf32>, vector<128x32xf32> -> vector<128x64xf32>
    %c0_27 = arith.constant 0 : index
    %c0_28 = arith.constant 0 : index
    %41 = vector.load %arg18[%c0_27, %c0_28] : memref<16x64xf32, #tpu.memory_space<vmem>>, vector<16x64xf32>
    %cst_29 = arith.constant dense<0.000000e+00> : vector<16x64xf32>
    %42 = tpu.matmul %19, %40, %cst_29 {dimension_numbers = #tpu.dot_dimension_numbers<[1], [0], [0], [1], [0, 0, 1, 1], [], []>} : vector<16x128xf32>, vector<128x64xf32>, vector<16x64xf32> -> vector<16x64xf32>
    %43 = arith.addf %41, %42 : vector<16x64xf32>
    %c0_30 = arith.constant 0 : index
    %c0_31 = arith.constant 0 : index
    %44 = vector.load %arg18[%c0_30, %c0_31] : memref<16x64xf32, #tpu.memory_space<vmem>>, vector<16x64xf32>
    tpu.vector_store %arg18[%c0_30, %c0_31], %43 {strides = array<i32>} : memref<16x64xf32, #tpu.memory_space<vmem>>, vector<16x64xf32>,
    %c2_i32 = arith.constant 2 : i32
    %45 = arith.cmpi eq, %arg0, %c2_i32 : i32
    %46 = arith.extui %45 : i1 to i32
    %c0_i32_32 = arith.constant 0 : i32
    %47 = arith.cmpi ne, %46, %c0_i32_32 : i32
    scf.if %47 {
      %c0_33 = arith.constant 0 : index
      %c0_34 = arith.constant 0 : index
      %48 = vector.load %arg18[%c0_33, %c0_34] : memref<16x64xf32, #tpu.memory_space<vmem>>, vector<16x64xf32>
      %49 = vector.extract_strided_slice %48 {offsets = [0, 0], sizes = [16, 32], strides = [1, 1]} : vector<16x64xf32> to vector<16x32xf32>
      %50 = vector.extract_strided_slice %48 {offsets = [0, 32], sizes = [16, 32], strides = [1, 1]} : vector<16x64xf32> to vector<16x32xf32>
      %cst_35 = arith.constant 9.99999993E-9 : f32
      %51 = vector.broadcast %cst_35 : f32 to vector<16x32xf32>
      %52 = arith.addf %50, %51 : vector<16x32xf32>
      %53 = arith.divf %49, %52 : vector<16x32xf32>
      %c0_36 = arith.constant 0 : index
      %c0_37 = arith.constant 0 : index
      %54 = vector.load %arg10[%c0_36, %c0_37] : memref<32x32xf32, #tpu.memory_space<vmem>>, vector<32x32xf32>
      %cst_38 = arith.constant dense<0.000000e+00> : vector<16x32xf32>
      %55 = tpu.matmul %53, %54, %cst_38 {dimension_numbers = #tpu.dot_dimension_numbers<[1], [0], [0], [1], [0, 0, 1, 1], [], []>} : vector<16x32xf32>, vector<32x32xf32>, vector<16x32xf32> -> vector<16x32xf32>
      %c0_39 = arith.constant 0 : index
      %c0_40 = arith.constant 0 : index
      %56 = vector.load %arg11[%c0_39, %c0_40] : memref<1x32xf32, #tpu.memory_space<vmem>>, vector<1x32xf32>
      %57 = vector.broadcast %56 : vector<1x32xf32> to vector<16x32xf32>
      %58 = arith.addf %55, %57 : vector<16x32xf32>
      %c0_41 = arith.constant 0 : index
      %c0_42 = arith.constant 0 : index
      %59 = vector.load %arg14[%c0_41, %c0_42] : memref<16x32xf32, #tpu.memory_space<vmem>>, vector<16x32xf32>
      tpu.vector_store %arg14[%c0_41, %c0_42], %58 {strides = array<i32>} : memref<16x32xf32, #tpu.memory_space<vmem>>, vector<16x32xf32>,
    } else {
    }
    return
  }
  func.func @transform_0(%arg0: i32) -> (i32, i32) {
    %c0_i32 = arith.constant 0 : i32
    %c0_i32_0 = arith.constant 0 : i32
    return %arg0, %c0_i32 : i32, i32
  }
  func.func @transform_1(%arg0: i32) -> (i32, i32) {
    %c0_i32 = arith.constant 0 : i32
    %c0_i32_0 = arith.constant 0 : i32
    return %c0_i32, %arg0 : i32, i32
  }
  func.func @transform_2(%arg0: i32) -> (i32, i32) {
    %c0_i32 = arith.constant 0 : i32
    %c0_i32_0 = arith.constant 0 : i32
    return %arg0, %c0_i32 : i32, i32
  }
  func.func @transform_3(%arg0: i32) -> (i32, i32) {
    %c0_i32 = arith.constant 0 : i32
    %c0_i32_0 = arith.constant 0 : i32
    return %arg0, %c0_i32 : i32, i32
  }
  func.func @transform_4(%arg0: i32) -> (i32, i32) {
    %c0_i32 = arith.constant 0 : i32
    %c0_i32_0 = arith.constant 0 : i32
    %c0_i32_1 = arith.constant 0 : i32
    return %c0_i32, %c0_i32_0 : i32, i32
  }
  func.func @transform_5(%arg0: i32) -> (i32, i32) {
    %c0_i32 = arith.constant 0 : i32
    %c0_i32_0 = arith.constant 0 : i32
    %c0_i32_1 = arith.constant 0 : i32
    return %c0_i32, %c0_i32_0 : i32, i32
  }
  func.func @transform_6(%arg0: i32) -> (i32, i32) {
    %c0_i32 = arith.constant 0 : i32
    %c0_i32_0 = arith.constant 0 : i32
    %c0_i32_1 = arith.constant 0 : i32
    return %c0_i32, %c0_i32_0 : i32, i32
  }
  func.func @transform_7(%arg0: i32) -> (i32, i32) {
    %c0_i32 = arith.constant 0 : i32
    %c0_i32_0 = arith.constant 0 : i32
    %c0_i32_1 = arith.constant 0 : i32
    return %c0_i32, %c0_i32_0 : i32, i32
  }
  func.func @transform_8(%arg0: i32) -> (i32, i32) {
    %c0_i32 = arith.constant 0 : i32
    %c0_i32_0 = arith.constant 0 : i32
    %c0_i32_1 = arith.constant 0 : i32
    return %c0_i32, %c0_i32_0 : i32, i32
  }
  func.func @transform_9(%arg0: i32) -> (i32, i32) {
    %c0_i32 = arith.constant 0 : i32
    %c0_i32_0 = arith.constant 0 : i32
    %c0_i32_1 = arith.constant 0 : i32
    return %c0_i32, %c0_i32_0 : i32, i32
  }
  func.func @transform_10(%arg0: i32) -> (i32, i32) {
    %c0_i32 = arith.constant 0 : i32
    %c0_i32_0 = arith.constant 0 : i32
    %c0_i32_1 = arith.constant 0 : i32
    return %c0_i32, %c0_i32_0 : i32, i32
  }
  func.func @transform_11(%arg0: i32) -> (i32, i32) {
    %c0_i32 = arith.constant 0 : i32
    %c0_i32_0 = arith.constant 0 : i32
    %c0_i32_1 = arith.constant 0 : i32
    return %c0_i32, %c0_i32_0 : i32, i32
  }
  func.func @transform_12(%arg0: i32) -> (i32, i32) {
    %c0_i32 = arith.constant 0 : i32
    %c0_i32_0 = arith.constant 0 : i32
    %c0_i32_1 = arith.constant 0 : i32
    return %c0_i32, %c0_i32_0 : i32, i32
  }
  func.func @transform_13(%arg0: i32) -> (i32, i32) {
    %c0_i32 = arith.constant 0 : i32
    %c0_i32_0 = arith.constant 0 : i32
    %c0_i32_1 = arith.constant 0 : i32
    return %c0_i32, %c0_i32_0 : i32, i32
  }
}

module attributes {stable_mosaic.version = 11 : i64} {
  func.func @_graph_attention_kernel(%arg0: i32, %arg1: memref<128x1xi32, #tpu.memory_space<vmem>>, %arg2: memref<1x128xi32, #tpu.memory_space<vmem>>, %arg3: memref<128x1xi32, #tpu.memory_space<vmem>>, %arg4: memref<128x16xf32, #tpu.memory_space<vmem>>, %arg5: memref<16x32xf32, #tpu.memory_space<vmem>>, %arg6: memref<32x96xf32, #tpu.memory_space<vmem>>, %arg7: memref<1x96xf32, #tpu.memory_space<vmem>>, %arg8: memref<16x32xf32, #tpu.memory_space<vmem>>, %arg9: memref<1x32xf32, #tpu.memory_space<vmem>>, %arg10: memref<32x32xf32, #tpu.memory_space<vmem>>, %arg11: memref<1x32xf32, #tpu.memory_space<vmem>>, %arg12: memref<32x8xf32, #tpu.memory_space<vmem>>, %arg13: memref<8x32xf32, #tpu.memory_space<vmem>>, %arg14: memref<16x32xf32, #tpu.memory_space<vmem>>, %arg15: memref<16x32xf32, #tpu.memory_space<vmem>>, %arg16: memref<16x32xf32, #tpu.memory_space<vmem>>, %arg17: memref<16x32xf32, #tpu.memory_space<vmem>>, %arg18: memref<16x64xf32, #tpu.memory_space<vmem>>) attributes {dimension_semantics = [#tpu.dimension_semantics<arbitrary>], iteration_bounds = array<i64: 3>, scalar_prefetch = 0 : i64, scratch_operands = 4 : i64, tpu.core_type = #tpu.core_type<tc>, window_params = [{transform_indices = @transform_0, window_bounds = array<i64: 128, 1>}, {transform_indices = @transform_1, window_bounds = array<i64: 1, 128>}, {transform_indices = @transform_2, window_bounds = array<i64: 128, 1>}, {transform_indices = @transform_3, window_bounds = array<i64: 128, 16>}, {pipeline_mode = #tpu.pipeline_mode<synchronous>, transform_indices = @transform_4, window_bounds = array<i64: 16, 32>}, {pipeline_mode = #tpu.pipeline_mode<synchronous>, transform_indices = @transform_5, window_bounds = array<i64: 32, 96>}, {pipeline_mode = #tpu.pipeline_mode<synchronous>, transform_indices = @transform_6, window_bounds = array<i64: 1, 96>}, {pipeline_mode = #tpu.pipeline_mode<synchronous>, transform_indices = @transform_7, window_bounds = array<i64: 16, 32>}, {pipeline_mode = #tpu.pipeline_mode<synchronous>, transform_indices = @transform_8, window_bounds = array<i64: 1, 32>}, {pipeline_mode = #tpu.pipeline_mode<synchronous>, transform_indices = @transform_9, window_bounds = array<i64: 32, 32>}, {pipeline_mode = #tpu.pipeline_mode<synchronous>, transform_indices = @transform_10, window_bounds = array<i64: 1, 32>}, {pipeline_mode = #tpu.pipeline_mode<synchronous>, transform_indices = @transform_11, window_bounds = array<i64: 32, 8>}, {pipeline_mode = #tpu.pipeline_mode<synchronous>, transform_indices = @transform_12, window_bounds = array<i64: 8, 32>}, {pipeline_mode = #tpu.pipeline_mode<synchronous>, transform_indices = @transform_13, window_bounds = array<i64: 16, 32>}]} {
    %c0_i32 = arith.constant 0 : i32
    %0 = arith.cmpi eq, %arg0, %c0_i32 : i32
    %1 = arith.extui %0 : i1 to i32
    %c0_i32_0 = arith.constant 0 : i32
    %2 = arith.cmpi ne, %1, %c0_i32_0 : i32
    scf.if %2 {
      %c0_33 = arith.constant 0 : index
      %c0_34 = arith.constant 0 : index
      %48 = vector.load %arg5[%c0_33, %c0_34] : memref<16x32xf32, #tpu.memory_space<vmem>>, vector<16x32xf32>
      %c0_35 = arith.constant 0 : index
      %c0_36 = arith.constant 0 : index
      %49 = vector.load %arg6[%c0_35, %c0_36] : memref<32x96xf32, #tpu.memory_space<vmem>>, vector<32x96xf32>
      %cst_37 = arith.constant dense<0.000000e+00> : vector<16x96xf32>
      %50 = tpu.matmul %48, %49, %cst_37 {dimension_numbers = #tpu.dot_dimension_numbers<[1], [0], [0], [1], [0, 0, 1, 1], [], []>} : vector<16x32xf32>, vector<32x96xf32>, vector<16x96xf32> -> vector<16x96xf32>
      %c0_38 = arith.constant 0 : index
      %c0_39 = arith.constant 0 : index
      %51 = vector.load %arg7[%c0_38, %c0_39] : memref<1x96xf32, #tpu.memory_space<vmem>>, vector<1x96xf32>
      %52 = vector.broadcast %51 : vector<1x96xf32> to vector<16x96xf32>
      %53 = arith.addf %50, %52 : vector<16x96xf32>
      %54 = vector.extract_strided_slice %53 {offsets = [0, 0], sizes = [16, 32], strides = [1, 1]} : vector<16x96xf32> to vector<16x32xf32>
      %c0_40 = arith.constant 0 : index
      %c0_41 = arith.constant 0 : index
      %55 = vector.load %arg15[%c0_40, %c0_41] : memref<16x32xf32, #tpu.memory_space<vmem>>, vector<16x32xf32>
      tpu.vector_store %arg15[%c0_40, %c0_41], %54 {strides = array<i32>} : memref<16x32xf32, #tpu.memory_space<vmem>>, vector<16x32xf32>,
      %56 = vector.extract_strided_slice %53 {offsets = [0, 32], sizes = [16, 32], strides = [1, 1]} : vector<16x96xf32> to vector<16x32xf32>
      %c0_42 = arith.constant 0 : index
      %c0_43 = arith.constant 0 : index
      %57 = vector.load %arg16[%c0_42, %c0_43] : memref<16x32xf32, #tpu.memory_space<vmem>>, vector<16x32xf32>
      tpu.vector_store %arg16[%c0_42, %c0_43], %56 {strides = array<i32>} : memref<16x32xf32, #tpu.memory_space<vmem>>, vector<16x32xf32>,
      %58 = vector.extract_strided_slice %53 {offsets = [0, 64], sizes = [16, 32], strides = [1, 1]} : vector<16x96xf32> to vector<16x32xf32>
      %c0_44 = arith.constant 0 : index
      %c0_45 = arith.constant 0 : index
      %59 = vector.load %arg17[%c0_44, %c0_45] : memref<16x32xf32, #tpu.memory_space<vmem>>, vector<16x32xf32>
      tpu.vector_store %arg17[%c0_44, %c0_45], %58 {strides = array<i32>} : memref<16x32xf32, #tpu.memory_space<vmem>>, vector<16x32xf32>,
      %cst_46 = arith.constant 0.000000e+00 : f32
      %60 = vector.broadcast %cst_46 : f32 to vector<16x64xf32>
      %c0_47 = arith.constant 0 : index
      %c0_48 = arith.constant 0 : index
      %61 = vector.load %arg18[%c0_47, %c0_48] : memref<16x64xf32, #tpu.memory_space<vmem>>, vector<16x64xf32>
      tpu.vector_store %arg18[%c0_47, %c0_48], %60 {strides = array<i32>} : memref<16x64xf32, #tpu.memory_space<vmem>>, vector<16x64xf32>,
    } else {
    }
    %3 = tpu.iota {dimensions = array<i32: 1>} : vector<128x16xi32>
    %c0 = arith.constant 0 : index
    %c0_1 = arith.constant 0 : index
    %4 = vector.load %arg1[%c0, %c0_1] : memref<128x1xi32, #tpu.memory_space<vmem>>, vector<128x1xi32>
    %5 = vector.broadcast %4 : vector<128x1xi32> to vector<128x16xi32>
    %6 = arith.cmpi eq, %3, %5 : vector<128x16xi32>
    %7 = arith.extui %6 : vector<128x16xi1> to vector<128x16xi32>
    %8 = arith.sitofp %7 : vector<128x16xi32> to vector<128x16xf32>
    %c0_2 = arith.constant 0 : index
    %c0_3 = arith.constant 0 : index
    %9 = vector.load %arg3[%c0_2, %c0_3] : memref<128x1xi32, #tpu.memory_space<vmem>>, vector<128x1xi32>
    %10 = vector.broadcast %9 : vector<128x1xi32> to vector<128x16xi32>
    %11 = arith.cmpi eq, %3, %10 : vector<128x16xi32>
    %12 = arith.extui %11 : vector<128x16xi1> to vector<128x16xi32>
    %13 = arith.sitofp %12 : vector<128x16xi32> to vector<128x16xf32>
    %14 = tpu.iota {dimensions = array<i32: 0>} : vector<16x128xi32>
    %c0_4 = arith.constant 0 : index
    %c0_5 = arith.constant 0 : index
    %15 = vector.load %arg2[%c0_4, %c0_5] : memref<1x128xi32, #tpu.memory_space<vmem>>, vector<1x128xi32>
    %16 = vector.broadcast %15 : vector<1x128xi32> to vector<16x128xi32>
    %17 = arith.cmpi eq, %14, %16 : vector<16x128xi32>
    %18 = arith.extui %17 : vector<16x128xi1> to vector<16x128xi32>
    %19 = arith.sitofp %18 : vector<16x128xi32> to vector<16x128xf32>
    %c0_6 = arith.constant 0 : index
    %c0_7 = arith.constant 0 : index
    %20 = vector.load %arg15[%c0_6, %c0_7] : memref<16x32xf32, #tpu.memory_space<vmem>>, vector<16x32xf32>
    %cst = arith.constant dense<0.000000e+00> : vector<128x32xf32>
    %21 = tpu.matmul %8, %20, %cst {dimension_numbers = #tpu.dot_dimension_numbers<[1], [0], [0], [1], [0, 0, 1, 1], [], []>} : vector<128x16xf32>, vector<16x32xf32>, vector<128x32xf32> -> vector<128x32xf32>
    %c0_8 = arith.constant 0 : index
    %c0_9 = arith.constant 0 : index
    %22 = vector.load %arg16[%c0_8, %c0_9] : memref<16x32xf32, #tpu.memory_space<vmem>>, vector<16x32xf32>
    %cst_10 = arith.constant dense<0.000000e+00> : vector<128x32xf32>
    %23 = tpu.matmul %13, %22, %cst_10 {dimension_numbers = #tpu.dot_dimension_numbers<[1], [0], [0], [1], [0, 0, 1, 1], [], []>} : vector<128x16xf32>, vector<16x32xf32>, vector<128x32xf32> -> vector<128x32xf32>
    %c0_11 = arith.constant 0 : index
    %c0_12 = arith.constant 0 : index
    %24 = vector.load %arg17[%c0_11, %c0_12] : memref<16x32xf32, #tpu.memory_space<vmem>>, vector<16x32xf32>
    %cst_13 = arith.constant dense<0.000000e+00> : vector<128x32xf32>
    %25 = tpu.matmul %13, %24, %cst_13 {dimension_numbers = #tpu.dot_dimension_numbers<[1], [0], [0], [1], [0, 0, 1, 1], [], []>} : vector<128x16xf32>, vector<16x32xf32>, vector<128x32xf32> -> vector<128x32xf32>
    %c0_14 = arith.constant 0 : index
    %c0_15 = arith.constant 0 : index
    %26 = vector.load %arg4[%c0_14, %c0_15] : memref<128x16xf32, #tpu.memory_space<vmem>>, vector<128x16xf32>
    %c0_16 = arith.constant 0 : index
    %c0_17 = arith.constant 0 : index
    %27 = vector.load %arg8[%c0_16, %c0_17] : memref<16x32xf32, #tpu.memory_space<vmem>>, vector<16x32xf32>
    %cst_18 = arith.constant dense<0.000000e+00> : vector<128x32xf32>
    %28 = tpu.matmul %26, %27, %cst_18 {dimension_numbers = #tpu.dot_dimension_numbers<[1], [0], [0], [1], [0, 0, 1, 1], [], []>} : vector<128x16xf32>, vector<16x32xf32>, vector<128x32xf32> -> vector<128x32xf32>
    %c0_19 = arith.constant 0 : index
    %c0_20 = arith.constant 0 : index
    %29 = vector.load %arg9[%c0_19, %c0_20] : memref<1x32xf32, #tpu.memory_space<vmem>>, vector<1x32xf32>
    %30 = vector.broadcast %29 : vector<1x32xf32> to vector<128x32xf32>
    %31 = arith.addf %28, %30 : vector<128x32xf32>
    %32 = arith.addf %23, %31 : vector<128x32xf32>
    %33 = arith.mulf %21, %32 : vector<128x32xf32>
    %c0_21 = arith.constant 0 : index
    %c0_22 = arith.constant 0 : index
    %34 = vector.load %arg12[%c0_21, %c0_22] : memref<32x8xf32, #tpu.memory_space<vmem>>, vector<32x8xf32>
    %cst_23 = arith.constant dense<0.000000e+00> : vector<128x8xf32>
    %35 = tpu.matmul %33, %34, %cst_23 {dimension_numbers = #tpu.dot_dimension_numbers<[1], [0], [0], [1], [0, 0, 1, 1], [], []>} : vector<128x32xf32>, vector<32x8xf32>, vector<128x8xf32> -> vector<128x8xf32>
    %36 = math.exp %35 : vector<128x8xf32>
    %c0_24 = arith.constant 0 : index
    %c0_25 = arith.constant 0 : index
    %37 = vector.load %arg13[%c0_24, %c0_25] : memref<8x32xf32, #tpu.memory_space<vmem>>, vector<8x32xf32>
    %cst_26 = arith.constant dense<0.000000e+00> : vector<128x32xf32>
    %38 = tpu.matmul %36, %37, %cst_26 {dimension_numbers = #tpu.dot_dimension_numbers<[1], [0], [0], [1], [0, 0, 1, 1], [], []>} : vector<128x8xf32>, vector<8x32xf32>, vector<128x32xf32> -> vector<128x32xf32>
    %39 = arith.mulf %38, %25 : vector<128x32xf32>
    %40 = tpu.concatenate %39, %38 in 1 : vector<128x32xf32>, vector<128x32xf32> -> vector<128x64xf32>
    %c0_27 = arith.constant 0 : index
    %c0_28 = arith.constant 0 : index
    %41 = vector.load %arg18[%c0_27, %c0_28] : memref<16x64xf32, #tpu.memory_space<vmem>>, vector<16x64xf32>
    %cst_29 = arith.constant dense<0.000000e+00> : vector<16x64xf32>
    %42 = tpu.matmul %19, %40, %cst_29 {dimension_numbers = #tpu.dot_dimension_numbers<[1], [0], [0], [1], [0, 0, 1, 1], [], []>} : vector<16x128xf32>, vector<128x64xf32>, vector<16x64xf32> -> vector<16x64xf32>
    %43 = arith.addf %41, %42 : vector<16x64xf32>
    %c0_30 = arith.constant 0 : index
    %c0_31 = arith.constant 0 : index
    %44 = vector.load %arg18[%c0_30, %c0_31] : memref<16x64xf32, #tpu.memory_space<vmem>>, vector<16x64xf32>
    tpu.vector_store %arg18[%c0_30, %c0_31], %43 {strides = array<i32>} : memref<16x64xf32, #tpu.memory_space<vmem>>, vector<16x64xf32>,
    %c2_i32 = arith.constant 2 : i32
    %45 = arith.cmpi eq, %arg0, %c2_i32 : i32
    %46 = arith.extui %45 : i1 to i32
    %c0_i32_32 = arith.constant 0 : i32
    %47 = arith.cmpi ne, %46, %c0_i32_32 : i32
    scf.if %47 {
      %c0_33 = arith.constant 0 : index
      %c0_34 = arith.constant 0 : index
      %48 = vector.load %arg18[%c0_33, %c0_34] : memref<16x64xf32, #tpu.memory_space<vmem>>, vector<16x64xf32>
      %49 = vector.extract_strided_slice %48 {offsets = [0, 0], sizes = [16, 32], strides = [1, 1]} : vector<16x64xf32> to vector<16x32xf32>
      %50 = vector.extract_strided_slice %48 {offsets = [0, 32], sizes = [16, 32], strides = [1, 1]} : vector<16x64xf32> to vector<16x32xf32>
      %cst_35 = arith.constant 9.99999993E-9 : f32
      %51 = vector.broadcast %cst_35 : f32 to vector<16x32xf32>
      %52 = arith.addf %50, %51 : vector<16x32xf32>
      %53 = arith.divf %49, %52 : vector<16x32xf32>
      %c0_36 = arith.constant 0 : index
      %c0_37 = arith.constant 0 : index
      %54 = vector.load %arg10[%c0_36, %c0_37] : memref<32x32xf32, #tpu.memory_space<vmem>>, vector<32x32xf32>
      %cst_38 = arith.constant dense<0.000000e+00> : vector<16x32xf32>
      %55 = tpu.matmul %53, %54, %cst_38 {dimension_numbers = #tpu.dot_dimension_numbers<[1], [0], [0], [1], [0, 0, 1, 1], [], []>} : vector<16x32xf32>, vector<32x32xf32>, vector<16x32xf32> -> vector<16x32xf32>
      %c0_39 = arith.constant 0 : index
      %c0_40 = arith.constant 0 : index
      %56 = vector.load %arg11[%c0_39, %c0_40] : memref<1x32xf32, #tpu.memory_space<vmem>>, vector<1x32xf32>
      %57 = vector.broadcast %56 : vector<1x32xf32> to vector<16x32xf32>
      %58 = arith.addf %55, %57 : vector<16x32xf32>
      %c0_41 = arith.constant 0 : index
      %c0_42 = arith.constant 0 : index
      %59 = vector.load %arg14[%c0_41, %c0_42] : memref<16x32xf32, #tpu.memory_space<vmem>>, vector<16x32xf32>
      tpu.vector_store %arg14[%c0_41, %c0_42], %58 {strides = array<i32>} : memref<16x32xf32, #tpu.memory_space<vmem>>, vector<16x32xf32>,
    } else {
    }
    return
  }
  func.func @transform_0(%arg0: i32) -> (i32, i32) {
    %c0_i32 = arith.constant 0 : i32
    %c0_i32_0 = arith.constant 0 : i32
    return %arg0, %c0_i32 : i32, i32
  }
  func.func @transform_1(%arg0: i32) -> (i32, i32) {
    %c0_i32 = arith.constant 0 : i32
    %c0_i32_0 = arith.constant 0 : i32
    return %c0_i32, %arg0 : i32, i32
  }
  func.func @transform_2(%arg0: i32) -> (i32, i32) {
    %c0_i32 = arith.constant 0 : i32
    %c0_i32_0 = arith.constant 0 : i32
    return %arg0, %c0_i32 : i32, i32
  }
  func.func @transform_3(%arg0: i32) -> (i32, i32) {
    %c0_i32 = arith.constant 0 : i32
    %c0_i32_0 = arith.constant 0 : i32
    return %arg0, %c0_i32 : i32, i32
  }
  func.func @transform_4(%arg0: i32) -> (i32, i32) {
    %c0_i32 = arith.constant 0 : i32
    %c0_i32_0 = arith.constant 0 : i32
    %c0_i32_1 = arith.constant 0 : i32
    return %c0_i32, %c0_i32_0 : i32, i32
  }
  func.func @transform_5(%arg0: i32) -> (i32, i32) {
    %c0_i32 = arith.constant 0 : i32
    %c0_i32_0 = arith.constant 0 : i32
    %c0_i32_1 = arith.constant 0 : i32
    return %c0_i32, %c0_i32_0 : i32, i32
  }
  func.func @transform_6(%arg0: i32) -> (i32, i32) {
    %c0_i32 = arith.constant 0 : i32
    %c0_i32_0 = arith.constant 0 : i32
    %c0_i32_1 = arith.constant 0 : i32
    return %c0_i32, %c0_i32_0 : i32, i32
  }
  func.func @transform_7(%arg0: i32) -> (i32, i32) {
    %c0_i32 = arith.constant 0 : i32
    %c0_i32_0 = arith.constant 0 : i32
    %c0_i32_1 = arith.constant 0 : i32
    return %c0_i32, %c0_i32_0 : i32, i32
  }
  func.func @transform_8(%arg0: i32) -> (i32, i32) {
    %c0_i32 = arith.constant 0 : i32
    %c0_i32_0 = arith.constant 0 : i32
    %c0_i32_1 = arith.constant 0 : i32
    return %c0_i32, %c0_i32_0 : i32, i32
  }
  func.func @transform_9(%arg0: i32) -> (i32, i32) {
    %c0_i32 = arith.constant 0 : i32
    %c0_i32_0 = arith.constant 0 : i32
    %c0_i32_1 = arith.constant 0 : i32
    return %c0_i32, %c0_i32_0 : i32, i32
  }
  func.func @transform_10(%arg0: i32) -> (i32, i32) {
    %c0_i32 = arith.constant 0 : i32
    %c0_i32_0 = arith.constant 0 : i32
    %c0_i32_1 = arith.constant 0 : i32
    return %c0_i32, %c0_i32_0 : i32, i32
  }
  func.func @transform_11(%arg0: i32) -> (i32, i32) {
    %c0_i32 = arith.constant 0 : i32
    %c0_i32_0 = arith.constant 0 : i32
    %c0_i32_1 = arith.constant 0 : i32
    return %c0_i32, %c0_i32_0 : i32, i32
  }
  func.func @transform_12(%arg0: i32) -> (i32, i32) {
    %c0_i32 = arith.constant 0 : i32
    %c0_i32_0 = arith.constant 0 : i32
    %c0_i32_1 = arith.constant 0 : i32
    return %c0_i32, %c0_i32_0 : i32, i32
  }
  func.func @transform_13(%arg0: i32) -> (i32, i32) {
    %c0_i32 = arith.constant 0 : i32
    %c0_i32_0 = arith.constant 0 : i32
    %c0_i32_1 = arith.constant 0 : i32
    return %c0_i32, %c0_i32_0 : i32, i32
  }
}

</mosaic_0001>

<bundles_post_ra>
// kernel: tpu_custom_call.1
= control target key start
LH: loop header
LB: loop body
LE: loop exit
PB: predicated region body
PF: predicated region fallthrough
CT: control target
= control target key end

     0   :  { %18 = vsyncpa [#allocation7], 0  ;;  %s3121_s25 = smov 0   ;;  %s3675_s0 = inlined_call_operand.vmem [shape: s32[384,1], index: 0, kind: input, shape index: {}]   ;;  %s3676_s1 = inlined_call_operand.vmem [shape: s32[1,384], index: 1, kind: input, shape index: {}]   ;;  %s3677_s2 = inlined_call_operand.vmem [shape: s32[384,1], index: 2, kind: input, shape index: {}]   ;;  %s3678_s3 = inlined_call_operand.vmem [shape: f32[384,16], index: 3, kind: input, shape index: {}]   ;;  %s3679_s4 = inlined_call_operand.vmem [shape: f32[16,32], index: 4, kind: input, shape index: {}]   ;;  %s3680_s5 = inlined_call_operand.vmem [shape: f32[32,96], index: 5, kind: input, shape index: {}]   ;;  %s3681_s6 = inlined_call_operand.vmem [shape: f32[1,96], index: 6, kind: input, shape index: {}]   ;;  %s3682_s7 = inlined_call_operand.vmem [shape: f32[16,32], index: 7, kind: input, shape index: {}]   ;;  %s3683_s8 = inlined_call_operand.vmem [shape: f32[1,32], index: 8, kind: input, shape index: {}]   ;;  %s3684_s9 = inlined_call_operand.vmem [shape: f32[32,32], index: 9, kind: input, shape index: {}]   ;;  %s3685_s10 = inlined_call_operand.vmem [shape: f32[1,32], index: 10, kind: input, shape index: {}]   ;;  %s3686_s11 = inlined_call_operand.vmem [shape: f32[32,8], index: 11, kind: input, shape index: {}]   ;;  %s3687_s12 = inlined_call_operand.vmem [shape: f32[8,32], index: 12, kind: input, shape index: {}]   ;;  %s3688_s13 = inlined_call_operand.hbm [shape: f32[16,32], index: 13, kind: output, shape index: {}]  }
   0x1 LB: > { %s3127_s26 = sadd.s32 4294967295, %s3038_s25   ;;  %p2422_p0 = scmp.ge.s32.totalorder %s3038_s25, 1  ;;  %s3038_s25 = sphi %s3121_s25, %s24_s25  }
   0x2   : > { %p414_p1 = scmp.lt.s32.totalorder %s3038_s25, 4 }
   0x4   : > { %p415_p2 = pnand %p2422_p0, %p414_p1 }
   0x5   : > { %s2423_s27 = sshll.u32 (!%p415_p2), %s3127_s26, 4  ;;  %p472_p3 = scmp.lt.s32.totalorder (!%p415_p2), %s3127_s26, 2 }
   0x6   : > { %418 = sbr.rel (%p415_p2) target bundleno = 1873 (0x751), region = 72  ;;  %p467_p4 = scmp.lt.s32.totalorder (!%p415_p2), %s2423_s27, 47 }
   0x7   : > { %p2429_p5 = scmp.ne.s32.totalorder (!%p415_p2), %s3127_s26, 0 }
   0xb   : > { %s3134_s28 = scalar_select %p472_p3, %s3127_s26, 2 }
   0xc   : > { %s3690_s27 = smov (!%p467_p4, %s2423_s27), 47  ;;  %490 = sbr.rel (%p2429_p5) target bundleno = 343 (0x157), region = 76 }
   0xd   : > { %s474_s14 = scalar_lea.vmem %s3676_s1, %s3134_s28  ;;  %s2424_s15 = sshll.u32 %s3690_s27, 3 }
   0xe   : > { %s3143_s18 = scalar_lea.vmem %s3675_s0, %s2424_s15  ;;  %s3148_s21 = scalar_lea.vmem %s3677_s2, %s2424_s15 }
   0xf   : > { %s3153_s24 = scalar_lea.vmem %s3678_s3, %s2424_s15  ;;  %s3041_s17 = smov (!%p2429_p5), 64  }
  0x10   : > { %s3042_s19 = smov (!%p2429_p5), 96  }
  0x11   : > { %v496_v0 = vld [vmem:[%s3680_s5 + $0x18] sm:$0xff]  ;;  %v495_v1 = vld [vmem:[%s3680_s5 + $0x10] sm:$0xff]  ;;  %vm504_vm0 = vcmask 261120   ;;  %v491_v2 = vld [vmem:[%s3679_s4] sm:$0xff]  ;;  %vm606_vm1 = vcmask 523264   ;;  %v3040_v6 = vmov 0.0  }
  0x12   : > { %2714 = vmatprep.subr.mxu0 %v496_v0  ;;  %v494_v3 = vld [vmem:[%s3680_s5 + $0x8] sm:$0xff]  ;;  %2722 = vmatprep.mubr.msk.f32.mxu0 %vm504_vm0, %v491_v2  ;;  %v493_v4 = vld [vmem:[%s3680_s5] sm:$0xff]  ;;  %607 = vst.msk [vmem:[#allocation5] sm:$0xff] %vm606_vm1, %v3040_v6  ;;  %608 = vst.msk [vmem:[#allocation5 + $0x8] sm:$0xff] %vm606_vm1, %v3040_v6 }
  0x13   : > { %2715 = vmatpush3.msra.mxu0 %v496_v0  ;;  %v492_v5 = vld [vmem:[%s3679_s4 + $0x8] sm:$0xff]  ;;  %v2430_v7 = vld [vmem:[%s3681_s6] ss:$0 sm:$0xff] }
  0x14   : > { %2716 = vmatprep.subr.mxu0 %v495_v1 }
  0x15   : > { %2717 = vmatpush3.msra.mxu0 %v495_v1 }
  0x16   : > { %2718 = vmatprep.subr.mxu0 %v494_v3 }
  0x17   : > { %2719 = vmatpush3.msra.mxu0 %v494_v3 }
  0x18   : > { %2720 = vmatprep.subr.mxu0 %v493_v4 }
  0x19   : > { %2721 = vmatpush3.msra.mxu0 %v493_v4 }
  0x1a   : > { %2723 = vmatmul.mubr.msk.f32.vlgmr.msra.gmra.mxu0 %vm504_vm0, %v492_v5 }
  0xda   : > { %v2724_v8 = vpop.f32.mrf.mxu0 }
  0xdb   : > { %v583_v9 = vadd.f32 %v2724_v8, %v2430_v7 }
  0xdc   : > { %v577_v10 = vpop.f32.mrf.mxu0 }
  0xdd   : > { %587 = vst.msk [vmem:[#allocation2 + $0x8] sm:$0xff] %vm504_vm0, %v583_v9  ;;  %v578_v11 = vadd.f32 %v2430_v7, %v577_v10 }
  0xdf   : > { %586 = vst.msk [vmem:[#allocation2] sm:$0xff] %vm504_vm0, %v578_v11  ;;  %598 = vrot.lane.b32.xlu1 %v578_v11, %s3041_s17  ;;  %590 = vrot.lane.b32.xlu0 %v578_v11, %s3042_s19 }
  0xe3   : > { %600 = vrot.lane.b32.xlu1 %v583_v9, %s3041_s17  ;;  %592 = vrot.lane.b32.xlu0 %v583_v9, %s3042_s19 }
 0x151   : > { %v599_v12 = vpop.permute.xlu1 %598  ;;  %v591_v13 = vpop.permute.xlu0 %590 }
 0x152   : > { %604 = vst.msk [vmem:[#allocation4] sm:$0xff] %vm504_vm0, %v599_v12  ;;  %596 = vst.msk [vmem:[#allocation3] sm:$0xff] %vm504_vm0, %v591_v13 }
 0x155   : > { %v601_v14 = vpop.permute.xlu1 %600  ;;  %v593_v15 = vpop.permute.xlu0 %592 }
 0x156   : > { %605 = vst.msk [vmem:[#allocation4 + $0x8] sm:$0xff] %vm504_vm0, %v601_v14  ;;  %597 = vst.msk [vmem:[#allocation3 + $0x8] sm:$0xff] %vm504_vm0, %v593_v15 }
 0x157 PF: > { %v723_v16 = vld [vmem:[%s3148_s21] sm:$0xff]  ;;  %v3043_v18 = vmov 0   ;;  %v724_v19 = vld [vmem:[%s3148_s21 + $0x8] sm:$0xff]  ;;  %v614_v21 = vld [vmem:[%s3143_s18 + $0x18] sm:$0xff]  ;;  %v609_v55 = vlaneseq  ;;  %vm851_vm2 = vcmask 130048   ;;  %v3044_v59 = vmov 0.0  }
 0x158   : > { %v611_v17 = vld [vmem:[%s3143_s18] sm:$0xff]  ;;  %2967 = vset.pattern.permute.xlu1 %v3043_v18  ;;  %2966 = vset.pattern.permute.xlu0 %v3043_v18  ;;  %v612_v20 = vld [vmem:[%s3143_s18 + $0x8] sm:$0xff]  ;;  %v613_v22 = vld [vmem:[%s3143_s18 + $0x10] sm:$0xff]  ;;  %p2567_p6 = scmp.ne.s32.totalorder %s3127_s26, 2 }
 0x159   : > { %740 = vperm.xlu1 %2967, %v723_v16   ;;  %628 = vperm.xlu0 %2966, %v611_v17   ;;  %v726_v23 = vld [vmem:[%s3148_s21 + $0x18] sm:$0xff]  ;;  %v850_v24 = vld [vmem:[#allocation2 + $0x8] sm:$0xff]  ;;  %v725_v25 = vld [vmem:[%s3148_s21 + $0x10] sm:$0xff]  ;;  %v3221_v56 = vand.u32 127, %v609_v55  ;;  %s3047_s16 = smov (!%p2567_p6), 96  }
 0x15a   : > { %2725 = vmatprep.subr.mxu0 %v850_v24  ;;  %v849_v27 = vld [vmem:[#allocation2] sm:$0xff]  ;;  %v616_v29 = vld [vmem:[%s3143_s18 + $0x28] sm:$0xff]  ;;  %v618_v33 = vld [vmem:[%s3143_s18 + $0x38] sm:$0xff] }
 0x15b   : > { %2726 = vmatpush3.msra.mxu0 %v850_v24  ;;  %v1047_v28 = vld [vmem:[#allocation4] sm:$0xff]  ;;  %v728_v31 = vld [vmem:[%s3148_s21 + $0x28] sm:$0xff]  ;;  %v617_v34 = vld [vmem:[%s3143_s18 + $0x30] sm:$0xff] }
 0x15c   : > { %2727 = vmatprep.subr.mxu0 %v849_v27  ;;  %v615_v30 = vld [vmem:[%s3143_s18 + $0x20] sm:$0xff]  ;;  %v730_v35 = vld [vmem:[%s3148_s21 + $0x38] sm:$0xff]  ;;  %v729_v36 = vld [vmem:[%s3148_s21 + $0x30] sm:$0xff] }
 0x15d   : > { %743 = vperm.xlu1 %2967, %v724_v19   ;;  %631 = vperm.xlu0 %2966, %v612_v20   ;;  %v1048_v26 = vld [vmem:[#allocation4 + $0x8] sm:$0xff]  ;;  %v727_v32 = vld [vmem:[%s3148_s21 + $0x20] sm:$0xff]  ;;  %v1046_v40 = vld [vmem:[#allocation3 + $0x8] sm:$0xff] }
 0x15e   : > { %2753 = vmatprep.subr.mxu1 %v1048_v26  ;;  %2728 = vmatpush3.msra.mxu0 %v849_v27  ;;  %v620_v37 = vld [vmem:[%s3143_s18 + $0x48] sm:$0xff]  ;;  %v619_v38 = vld [vmem:[%s3143_s18 + $0x40] sm:$0xff]  ;;  %v622_v43 = vld [vmem:[%s3143_s18 + $0x58] sm:$0xff] }
 0x15f   : > { %2754 = vmatpush3.msra.mxu1 %v1048_v26  ;;  %v1259_v39 = vld [vmem:[%s3682_s7 + $0x8] sm:$0xff]  ;;  %v731_v42 = vld [vmem:[%s3148_s21 + $0x40] sm:$0xff]  ;;  %v621_v44 = vld [vmem:[%s3143_s18 + $0x50] sm:$0xff] }
 0x160   : > { %2755 = vmatprep.subr.mxu1 %v1047_v28  ;;  %2781 = vmatprep.subr.mxu0 %v1259_v39  ;;  %v732_v41 = vld [vmem:[%s3148_s21 + $0x48] sm:$0xff]  ;;  %v734_v45 = vld [vmem:[%s3148_s21 + $0x58] sm:$0xff]  ;;  %v733_v46 = vld [vmem:[%s3148_s21 + $0x50] sm:$0xff] }
 0x161   : > { %637 = vperm.xlu1 %2967, %v614_v21   ;;  %634 = vperm.xlu0 %2966, %v613_v22   ;;  %v624_v47 = vld [vmem:[%s3143_s18 + $0x68] sm:$0xff]  ;;  %v623_v48 = vld [vmem:[%s3143_s18 + $0x60] sm:$0xff]  ;;  %v626_v51 = vld [vmem:[%s3143_s18 + $0x78] sm:$0xff] }
 0x162   : > { %2756 = vmatpush3.msra.mxu1 %v1047_v28  ;;  %v736_v49 = vld [vmem:[%s3148_s21 + $0x68] sm:$0xff]  ;;  %v735_v50 = vld [vmem:[%s3148_s21 + $0x60] sm:$0xff]  ;;  %v625_v52 = vld [vmem:[%s3143_s18 + $0x70] sm:$0xff] }
 0x163   : > { %2809 = vmatprep.subr.mxu1 %v1046_v40  ;;  %v738_v53 = vld [vmem:[%s3148_s21 + $0x78] sm:$0xff]  ;;  %v737_v54 = vld [vmem:[%s3148_s21 + $0x70] sm:$0xff]  ;;  %v1258_v2 = vld [vmem:[%s3682_s7] sm:$0xff]  ;;  %s3045_s21 = smov 32  }
 0x164   : > { %v1045_v3 = vld [vmem:[#allocation3] sm:$0xff] }
 0x165   : > { %749 = vperm.xlu1 %2967, %v726_v23   ;;  %746 = vperm.xlu0 %2966, %v725_v25  }
 0x169   : > { %643 = vperm.xlu1 %2967, %v616_v29   ;;  %640 = vperm.xlu0 %2966, %v615_v30  }
 0x16d   : > { %755 = vperm.xlu1 %2967, %v728_v31   ;;  %752 = vperm.xlu0 %2966, %v727_v32  }
 0x171   : > { %649 = vperm.xlu1 %2967, %v618_v33   ;;  %646 = vperm.xlu0 %2966, %v617_v34  }
 0x175   : > { %761 = vperm.xlu1 %2967, %v730_v35   ;;  %758 = vperm.xlu0 %2966, %v729_v36  }
 0x179   : > { %655 = vperm.xlu1 %2967, %v620_v37   ;;  %652 = vperm.xlu0 %2966, %v619_v38  }
 0x17d   : > { %767 = vperm.xlu1 %2967, %v732_v41   ;;  %764 = vperm.xlu0 %2966, %v731_v42  }
 0x181   : > { %661 = vperm.xlu1 %2967, %v622_v43   ;;  %658 = vperm.xlu0 %2966, %v621_v44  }
 0x185   : > { %773 = vperm.xlu1 %2967, %v734_v45   ;;  %770 = vperm.xlu0 %2966, %v733_v46  }
 0x189   : > { %667 = vperm.xlu1 %2967, %v624_v47   ;;  %664 = vperm.xlu0 %2966, %v623_v48  }
 0x18d   : > { %779 = vperm.xlu1 %2967, %v736_v49   ;;  %776 = vperm.xlu0 %2966, %v735_v50  }
 0x191   : > { %673 = vperm.xlu1 %2967, %v626_v51   ;;  %670 = vperm.xlu0 %2966, %v625_v52  }
 0x195   : > { %785 = vperm.xlu1 %2967, %v738_v53   ;;  %782 = vperm.xlu0 %2966, %v737_v54  }
 0x1d4   : > { %v741_v57 = vpop.permute.xlu1 %740  ;;  %v629_v58 = vpop.permute.xlu0 %628 }
 0x1d5   : > { %vm787_vm3 = vcmp.eq.s32.totalorder %v3221_v56, %v741_v57  ;;  %vm675_vm4 = vcmp.eq.s32.totalorder %v3221_v56, %v629_v58  ;;  %v1242_v58 = vld [vmem:[%s3153_s24] sm:$0xff] }
 0x1d6   : > { %v2433_v60 = vsel %vm675_vm4, 1.0, %v3044_v59  ;;  %v3227_v61 = vsel %vm787_vm3, 1.0, %v3044_v59 }
 0x1d7   : > { %2729 = vmatprep.mubr.msk.f32.mxu0 %vm851_vm2, %v2433_v60  ;;  %2757 = vmatprep.mubr.msk.f32.mxu1 %vm851_vm2, %v3227_v61 }
 0x1d8   : > { %v744_v62 = vpop.permute.xlu1 %743  ;;  %v632_v63 = vpop.permute.xlu0 %631 }
 0x1d9   : > { %vm788_vm5 = vcmp.eq.s32.totalorder %v3221_v56, %v744_v62  ;;  %vm676_vm6 = vcmp.eq.s32.totalorder %v3221_v56, %v632_v63  ;;  %v1243_v63 = vld [vmem:[%s3153_s24 + $0x8] sm:$0xff] }
 0x1da   : > { %v3235_v0 = vsel %vm788_vm5, 1.0, %v3044_v59  ;;  %v2434_v1 = vsel %vm676_vm6, 1.0, %v3044_v59 }
 0x1db   : > { %2730 = vmatmul.mubr.msk.f32.vlgmr.msra.gmra.mxu0 %vm851_vm2, %v2434_v1  ;;  %2758 = vmatmul.mubr.msk.f32.vlgmr.msra.gmra.mxu1 %vm851_vm2, %v3235_v0 }
 0x1dc   : > { %v638_v4 = vpop.permute.xlu1 %637  ;;  %v635_v5 = vpop.permute.xlu0 %634  ;;  %2782 = vmatpush3.msra.mxu0 %v1259_v39  ;;  %2810 = vmatpush3.msra.mxu1 %v1046_v40 }
 0x1dd   : > { %vm678_vm7 = vcmp.eq.s32.totalorder %v3221_v56, %v638_v4  ;;  %vm677_vm8 = vcmp.eq.s32.totalorder %v3221_v56, %v635_v5  ;;  %2783 = vmatprep.subr.mxu0 %v1258_v2  ;;  %2811 = vmatprep.subr.mxu1 %v1045_v3  ;;  %v1246_v4 = vld [vmem:[%s3153_s24 + $0x20] sm:$0xff]  ;;  %v1248_v5 = vld [vmem:[%s3153_s24 + $0x30] sm:$0xff] }
 0x1de   : > { %v2436_v6 = vsel %vm678_vm7, 1.0, %v3044_v59  ;;  %v2435_v7 = vsel %vm677_vm8, 1.0, %v3044_v59  ;;  %2784 = vmatpush3.msra.mxu0 %v1258_v2  ;;  %2812 = vmatpush3.msra.mxu1 %v1045_v3  ;;  %v1244_v3 = vld [vmem:[%s3153_s24 + $0x10] sm:$0xff] }
 0x1df   : > { %2732 = vmatprep.mubr.msk.f32.mxu0 %vm851_vm2, %v2435_v7  ;;  %v1252_v7 = vld [vmem:[%s3153_s24 + $0x50] sm:$0xff] }
 0x1e0   : > { %v750_v8 = vpop.permute.xlu1 %749  ;;  %v747_v9 = vpop.permute.xlu0 %746  ;;  %2733 = vmatmul.mubr.msk.f32.gmra.mxu0 %vm851_vm2, %v2436_v6  ;;  %v1251_v6 = vld [vmem:[%s3153_s24 + $0x48] sm:$0xff] }
 0x1e1   : > { %vm790_vm9 = vcmp.eq.s32.totalorder %v3221_v56, %v750_v8  ;;  %vm789_vm10 = vcmp.eq.s32.totalorder %v3221_v56, %v747_v9  ;;  %v1253_v8 = vld [vmem:[%s3153_s24 + $0x58] sm:$0xff]  ;;  %v1254_v9 = vld [vmem:[%s3153_s24 + $0x60] sm:$0xff] }
 0x1e2   : > { %v3253_v10 = vsel %vm790_vm9, 1.0, %v3044_v59  ;;  %v3256_v11 = vsel %vm789_vm10, 1.0, %v3044_v59 }
 0x1e3   : > { %2760 = vmatprep.mubr.msk.f32.mxu1 %vm851_vm2, %v3256_v11 }
 0x1e4   : > { %v644_v12 = vpop.permute.xlu1 %643  ;;  %v641_v13 = vpop.permute.xlu0 %640  ;;  %2761 = vmatmul.mubr.msk.f32.gmra.mxu1 %vm851_vm2, %v3253_v10 }
 0x1e5   : > { %vm680_vm11 = vcmp.eq.s32.totalorder %v3221_v56, %v644_v12  ;;  %vm679_vm12 = vcmp.eq.s32.totalorder %v3221_v56, %v641_v13  ;;  %v1257_v12 = vld [vmem:[%s3153_s24 + $0x78] sm:$0xff] }
 0x1e6   : > { %v2438_v14 = vsel %vm680_vm11, 1.0, %v3044_v59  ;;  %v2437_v15 = vsel %vm679_vm12, 1.0, %v3044_v59  ;;  %v1624_v13 = vld [vmem:[%s3686_s11 + $0x18] sm:$0xff] }
 0x1e7   : > { %2735 = vmatprep.mubr.msk.f32.mxu0 %vm851_vm2, %v2437_v15  ;;  %2837 = vmatprep.subr.mxu0 %v1624_v13  ;;  %v1622_v15 = vld [vmem:[%s3686_s11 + $0x8] sm:$0xff] }
 0x1e8   : > { %v756_v16 = vpop.permute.xlu1 %755  ;;  %v753_v17 = vpop.permute.xlu0 %752  ;;  %2736 = vmatmul.mubr.msk.f32.gmra.mxu0 %vm851_vm2, %v2438_v14  ;;  %v1623_v14 = vld [vmem:[%s3686_s11 + $0x10] sm:$0xff] }
 0x1e9   : > { %vm792_vm13 = vcmp.eq.s32.totalorder %v3221_v56, %v756_v16  ;;  %vm791_vm14 = vcmp.eq.s32.totalorder %v3221_v56, %v753_v17  ;;  %v1621_v16 = vld [vmem:[%s3686_s11] sm:$0xff] }
 0x1ea   : > { %v3271_v18 = vsel %vm792_vm13, 1.0, %v3044_v59  ;;  %v3274_v19 = vsel %vm791_vm14, 1.0, %v3044_v59  ;;  %v1851_v17 = vld [vmem:[%s3687_s12] sm:$0xff] }
 0x1eb   : > { %2763 = vmatprep.mubr.msk.f32.mxu1 %vm851_vm2, %v3274_v19  ;;  %2869 = vmatprep.subr.mxu1 %v1851_v17 }
 0x1ec   : > { %v650_v20 = vpop.permute.xlu1 %649  ;;  %v647_v21 = vpop.permute.xlu0 %646  ;;  %2764 = vmatmul.mubr.msk.f32.gmra.mxu1 %vm851_vm2, %v3271_v18 }
 0x1ed   : > { %vm682_vm15 = vcmp.eq.s32.totalorder %v3221_v56, %v650_v20  ;;  %vm681_vm0 = vcmp.eq.s32.totalorder %v3221_v56, %v647_v21 }
 0x1ee   : > { %v2440_v22 = vsel %vm682_vm15, 1.0, %v3044_v59  ;;  %v2439_v23 = vsel %vm681_vm0, 1.0, %v3044_v59 }
 0x1ef   : > { %2738 = vmatprep.mubr.msk.f32.mxu0 %vm851_vm2, %v2439_v23 }
 0x1f0   : > { %v762_v24 = vpop.permute.xlu1 %761  ;;  %v759_v25 = vpop.permute.xlu0 %758  ;;  %2739 = vmatmul.mubr.msk.f32.gmra.mxu0 %vm851_vm2, %v2440_v22 }
 0x1f1   : > { %vm794_vm1 = vcmp.eq.s32.totalorder %v3221_v56, %v762_v24  ;;  %vm793_vm3 = vcmp.eq.s32.totalorder %v3221_v56, %v759_v25 }
 0x1f2   : > { %v3289_v26 = vsel %vm794_vm1, 1.0, %v3044_v59  ;;  %v3292_v27 = vsel %vm793_vm3, 1.0, %v3044_v59 }
 0x1f3   : > { %2766 = vmatprep.mubr.msk.f32.mxu1 %vm851_vm2, %v3292_v27 }
 0x1f4   : > { %v656_v28 = vpop.permute.xlu1 %655  ;;  %v653_v29 = vpop.permute.xlu0 %652  ;;  %2767 = vmatmul.mubr.msk.f32.gmra.mxu1 %vm851_vm2, %v3289_v26 }
 0x1f5   : > { %vm684_vm4 = vcmp.eq.s32.totalorder %v3221_v56, %v656_v28  ;;  %vm683_vm5 = vcmp.eq.s32.totalorder %v3221_v56, %v653_v29 }
 0x1f6   : > { %v2442_v30 = vsel %vm684_vm4, 1.0, %v3044_v59  ;;  %v2441_v31 = vsel %vm683_vm5, 1.0, %v3044_v59  ;;  %vm1852_vm5 = vcmask 64512  }
 0x1f7   : > { %2741 = vmatprep.mubr.msk.f32.mxu0 %vm851_vm2, %v2441_v31 }
 0x1f8   : > { %v768_v32 = vpop.permute.xlu1 %767  ;;  %v765_v33 = vpop.permute.xlu0 %764  ;;  %2742 = vmatmul.mubr.msk.f32.gmra.mxu0 %vm851_vm2, %v2442_v30 }
 0x1f9   : > { %vm796_vm6 = vcmp.eq.s32.totalorder %v3221_v56, %v768_v32  ;;  %vm795_vm7 = vcmp.eq.s32.totalorder %v3221_v56, %v765_v33 }
 0x1fa   : > { %v3307_v34 = vsel %vm796_vm6, 1.0, %v3044_v59  ;;  %v3310_v35 = vsel %vm795_vm7, 1.0, %v3044_v59 }
 0x1fb   : > { %2769 = vmatprep.mubr.msk.f32.mxu1 %vm851_vm2, %v3310_v35 }
 0x1fc   : > { %v662_v36 = vpop.permute.xlu1 %661  ;;  %v659_v37 = vpop.permute.xlu0 %658  ;;  %2770 = vmatmul.mubr.msk.f32.gmra.mxu1 %vm851_vm2, %v3307_v34 }
 0x1fd   : > { %vm686_vm8 = vcmp.eq.s32.totalorder %v3221_v56, %v662_v36  ;;  %vm685_vm9 = vcmp.eq.s32.totalorder %v3221_v56, %v659_v37 }
 0x1fe   : > { %v2444_v38 = vsel %vm686_vm8, 1.0, %v3044_v59  ;;  %v2443_v39 = vsel %vm685_vm9, 1.0, %v3044_v59  ;;  %vm2221_vm8 = vcmask 523264  }
 0x1ff   : > { %2744 = vmatprep.mubr.msk.f32.mxu0 %vm851_vm2, %v2443_v39 }
 0x200   : > { %v774_v40 = vpop.permute.xlu1 %773  ;;  %v771_v41 = vpop.permute.xlu0 %770  ;;  %2745 = vmatmul.mubr.msk.f32.gmra.mxu0 %vm851_vm2, %v2444_v38 }
 0x201   : > { %vm798_vm10 = vcmp.eq.s32.totalorder %v3221_v56, %v774_v40  ;;  %vm797_vm11 = vcmp.eq.s32.totalorder %v3221_v56, %v771_v41 }
 0x202   : > { %v3325_v42 = vsel %vm798_vm10, 1.0, %v3044_v59  ;;  %v3328_v43 = vsel %vm797_vm11, 1.0, %v3044_v59 }
 0x203   : > { %2772 = vmatprep.mubr.msk.f32.mxu1 %vm851_vm2, %v3328_v43 }
 0x204   : > { %v668_v44 = vpop.permute.xlu1 %667  ;;  %v665_v45 = vpop.permute.xlu0 %664  ;;  %2773 = vmatmul.mubr.msk.f32.gmra.mxu1 %vm851_vm2, %v3325_v42 }
 0x205   : > { %vm688_vm12 = vcmp.eq.s32.totalorder %v3221_v56, %v668_v44  ;;  %vm687_vm13 = vcmp.eq.s32.totalorder %v3221_v56, %v665_v45 }
 0x206   : > { %v2446_v46 = vsel %vm688_vm12, 1.0, %v3044_v59  ;;  %v2445_v47 = vsel %vm687_vm13, 1.0, %v3044_v59 }
 0x207   : > { %2747 = vmatprep.mubr.msk.f32.mxu0 %vm851_vm2, %v2445_v47 }
 0x208   : > { %v780_v48 = vpop.permute.xlu1 %779  ;;  %v777_v49 = vpop.permute.xlu0 %776  ;;  %2748 = vmatmul.mubr.msk.f32.gmra.mxu0 %vm851_vm2, %v2446_v46 }
 0x209   : > { %vm800_vm14 = vcmp.eq.s32.totalorder %v3221_v56, %v780_v48  ;;  %vm799_vm15 = vcmp.eq.s32.totalorder %v3221_v56, %v777_v49  ;;  %v3492_v48 = vld [vmem:[%s3683_s8] ss:$0 sm:$0xff] }
 0x20a   : > { %v3343_v50 = vsel %vm800_vm14, 1.0, %v3044_v59  ;;  %v2461_v51 = vsel %vm799_vm15, 1.0, %v3044_v59 }
 0x20b   : > { %2775 = vmatprep.mubr.msk.f32.mxu1 %vm851_vm2, %v2461_v51 }
 0x20c   : > { %v674_v52 = vpop.permute.xlu1 %673  ;;  %v671_v53 = vpop.permute.xlu0 %670  ;;  %2776 = vmatmul.mubr.msk.f32.gmra.mxu1 %vm851_vm2, %v3343_v50 }
 0x20d   : > { %vm690_vm0 = vcmp.eq.s32.totalorder %v3221_v56, %v674_v52  ;;  %vm689_vm1 = vcmp.eq.s32.totalorder %v3221_v56, %v671_v53 }
 0x20e   : > { %v2448_v54 = vsel %vm690_vm0, 1.0, %v3044_v59  ;;  %v2447_v57 = vsel %vm689_vm1, 1.0, %v3044_v59 }
 0x20f   : > { %2750 = vmatprep.mubr.msk.f32.mxu0 %vm851_vm2, %v2447_v57 }
 0x210   : > { %v786_v60 = vpop.permute.xlu1 %785  ;;  %v783_v62 = vpop.permute.xlu0 %782  ;;  %2751 = vmatmul.mubr.msk.f32.gmra.mxu0 %vm851_vm2, %v2448_v54 }
 0x211   : > { %vm802_vm3 = vcmp.eq.s32.totalorder %v3221_v56, %v786_v60  ;;  %vm801_vm4 = vcmp.eq.s32.totalorder %v3221_v56, %v783_v62  ;;  %2785 = vmatprep.mubr.msk.f32.mxu0 %vm851_vm2, %v1242_v58  ;;  %v1245_v56 = vld [vmem:[%s3153_s24 + $0x18] sm:$0xff] }
 0x212   : > { %v2464_v1 = vsel %vm802_vm3, 1.0, %v3044_v59  ;;  %v2463_v2 = vsel %vm801_vm4, 1.0, %v3044_v59  ;;  %v1247_v59 = vld [vmem:[%s3153_s24 + $0x28] sm:$0xff] }
 0x213   : > { %2778 = vmatprep.mubr.msk.f32.mxu1 %vm851_vm2, %v2463_v2 }
 0x214   : > { %2779 = vmatmul.mubr.msk.f32.gmra.mxu1 %vm851_vm2, %v2464_v1  ;;  %2786 = vmatmul.mubr.msk.f32.vlgmr.msra.gmra.mxu0 %vm851_vm2, %v1243_v63 }
 0x215   : > { %2813 = vmatprep.mubr.msk.f32.mxu1 %vm851_vm2, %v3227_v61  ;;  %2788 = vmatprep.mubr.msk.f32.mxu0 %vm851_vm2, %v1244_v3  ;;  %v1249_v61 = vld [vmem:[%s3153_s24 + $0x38] sm:$0xff] }
 0x216   : > { %2838 = vmatpush3.msra.mxu0 %v1624_v13 }
 0x217   : > { %2839 = vmatprep.subr.mxu0 %v1623_v14 }
 0x218   : > { %2789 = vmatmul.mubr.msk.f32.gmra.mxu0 %vm851_vm2, %v1245_v56  ;;  %2814 = vmatmul.mubr.msk.f32.vlgmr.msra.gmra.mxu1 %vm851_vm2, %v3235_v0  ;;  %v1250_v0 = vld [vmem:[%s3153_s24 + $0x40] sm:$0xff] }
 0x219   : > { %2816 = vmatprep.mubr.msk.f32.mxu1 %vm851_vm2, %v3256_v11  ;;  %2791 = vmatprep.mubr.msk.f32.mxu0 %vm851_vm2, %v1246_v4  ;;  %v1256_v11 = vld [vmem:[%s3153_s24 + $0x70] sm:$0xff] }
 0x21a   : > { %2840 = vmatpush3.msra.mxu0 %v1623_v14  ;;  %2870 = vmatpush3.msra.mxu1 %v1851_v17 }
 0x21b   : > { %2841 = vmatprep.subr.mxu0 %v1622_v15 }
 0x21c   : > { %2792 = vmatmul.mubr.msk.f32.gmra.mxu0 %vm851_vm2, %v1247_v59  ;;  %2817 = vmatmul.mubr.msk.f32.gmra.mxu1 %vm851_vm2, %v3253_v10  ;;  %v1255_v10 = vld [vmem:[%s3153_s24 + $0x68] sm:$0xff] }
 0x21d   : > { %2819 = vmatprep.mubr.msk.f32.mxu1 %vm851_vm2, %v3274_v19  ;;  %2794 = vmatprep.mubr.msk.f32.mxu0 %vm851_vm2, %v1248_v5 }
 0x21e   : > { %2842 = vmatpush3.msra.mxu0 %v1622_v15 }
 0x21f   : > { %2843 = vmatprep.subr.mxu0 %v1621_v16 }
 0x220   : > { %2795 = vmatmul.mubr.msk.f32.gmra.mxu0 %vm851_vm2, %v1249_v61  ;;  %2820 = vmatmul.mubr.msk.f32.gmra.mxu1 %vm851_vm2, %v3271_v18 }
 0x221   : > { %2822 = vmatprep.mubr.msk.f32.mxu1 %vm851_vm2, %v3292_v27  ;;  %2797 = vmatprep.mubr.msk.f32.mxu0 %vm851_vm2, %v1250_v0 }
 0x222   : > { %2844 = vmatpush3.msra.mxu0 %v1621_v16 }
 0x224   : > { %2798 = vmatmul.mubr.msk.f32.gmra.mxu0 %vm851_vm2, %v1251_v6  ;;  %2823 = vmatmul.mubr.msk.f32.gmra.mxu1 %vm851_vm2, %v3289_v26 }
 0x225   : > { %2825 = vmatprep.mubr.msk.f32.mxu1 %vm851_vm2, %v3310_v35  ;;  %2800 = vmatprep.mubr.msk.f32.mxu0 %vm851_vm2, %v1252_v7 }
 0x228   : > { %2801 = vmatmul.mubr.msk.f32.gmra.mxu0 %vm851_vm2, %v1253_v8  ;;  %2826 = vmatmul.mubr.msk.f32.gmra.mxu1 %vm851_vm2, %v3307_v34 }
 0x229   : > { %2828 = vmatprep.mubr.msk.f32.mxu1 %vm851_vm2, %v3328_v43  ;;  %2803 = vmatprep.mubr.msk.f32.mxu0 %vm851_vm2, %v1254_v9 }
 0x22c   : > { %2804 = vmatmul.mubr.msk.f32.gmra.mxu0 %vm851_vm2, %v1255_v10  ;;  %2829 = vmatmul.mubr.msk.f32.gmra.mxu1 %vm851_vm2, %v3325_v42 }
 0x22d   : > { %2831 = vmatprep.mubr.msk.f32.mxu1 %vm851_vm2, %v2461_v51  ;;  %2806 = vmatprep.mubr.msk.f32.mxu0 %vm851_vm2, %v1256_v11 }
 0x230   : > { %2807 = vmatmul.mubr.msk.f32.gmra.mxu0 %vm851_vm2, %v1257_v12  ;;  %2832 = vmatmul.mubr.msk.f32.gmra.mxu1 %vm851_vm2, %v3343_v50 }
 0x231   : > { %2834 = vmatprep.mubr.msk.f32.mxu1 %vm851_vm2, %v2463_v2 }
 0x234   : > { %2835 = vmatmul.mubr.msk.f32.gmra.mxu1 %vm851_vm2, %v2464_v1  ;;  %vm1625_vm2 = vcmask 261120  }
 0x29b   : > { %v2731_v18 = vpop.f32.mrf.mxu0  ;;  %v3437_v20 = vpop.f32.mrf.mxu1 }
 0x29d   : > { %v966_v19 = vpop.f32.mrf.mxu0  ;;  %v3439_v22 = vpop.f32.mrf.mxu1 }
 0x2a0   : > { %v2734_v21 = vpop.f32.mrf.mxu0 }
 0x2a2   : > { %v976_v23 = vpop.f32.mrf.mxu0 }
 0x2a4   : > { %v3441_v24 = vpop.f32.mrf.mxu1 }
 0x2a6   : > { %v3445_v26 = vpop.f32.mrf.mxu1 }
 0x2a8   : > { %v3443_v25 = vpop.f32.mrf.mxu0 }
 0x2aa   : > { %v3447_v27 = vpop.f32.mrf.mxu0 }
 0x2ac   : > { %v3449_v28 = vpop.f32.mrf.mxu1 }
 0x2ae   : > { %v3453_v30 = vpop.f32.mrf.mxu1 }
 0x2b0   : > { %v3451_v29 = vpop.f32.mrf.mxu0 }
 0x2b2   : > { %v3455_v31 = vpop.f32.mrf.mxu0 }
 0x2b4   : > { %v3457_v32 = vpop.f32.mrf.mxu1 }
 0x2b6   : > { %v3461_v34 = vpop.f32.mrf.mxu1 }
 0x2b8   : > { %v3459_v33 = vpop.f32.mrf.mxu0 }
 0x2ba   : > { %v3463_v35 = vpop.f32.mrf.mxu0 }
 0x2bc   : > { %v3465_v36 = vpop.f32.mrf.mxu1 }
 0x2be   : > { %v3469_v38 = vpop.f32.mrf.mxu1 }
 0x2c0   : > { %v3467_v37 = vpop.f32.mrf.mxu0 }
 0x2c2   : > { %v3471_v39 = vpop.f32.mrf.mxu0 }
 0x2c4   : > { %v3473_v40 = vpop.f32.mrf.mxu1 }
 0x2c6   : > { %v3477_v42 = vpop.f32.mrf.mxu1 }
 0x2c8   : > { %v3475_v41 = vpop.f32.mrf.mxu0 }
 0x2ca   : > { %v3479_v43 = vpop.f32.mrf.mxu0 }
 0x2cc   : > { %v3481_v44 = vpop.f32.mrf.mxu1 }
 0x2ce   : > { %v3485_v46 = vpop.f32.mrf.mxu1 }
 0x2d0   : > { %v3483_v45 = vpop.f32.mrf.mxu0 }
 0x2d2   : > { %v3487_v47 = vpop.f32.mrf.mxu0 }
 0x2d4   : > { %v3494_v49 = vpop.f32.mrf.mxu1  ;;  %v2787_v50 = vpop.f32.mrf.mxu0 }
 0x2d5   : > { %v1387_v51 = vadd.f32 %v2787_v50, %v3492_v48 }
 0x2d6   : > { %v3497_v52 = vpop.f32.mrf.mxu1  ;;  %v1381_v53 = vpop.f32.mrf.mxu0 }
 0x2d7   : > { %v1382_v58 = vadd.f32 %v3492_v48, %v1381_v53 }
 0x2d8   : > { %v2790_v54 = vpop.f32.mrf.mxu0  ;;  %v2815_v57 = vpop.f32.mrf.mxu1 }
 0x2d9   : > { %v1397_v60 = vadd.f32 %v2790_v54, %v3492_v48  ;;  %v1532_v62 = vadd.f32 %v2815_v57, %v1387_v51 }
 0x2da   : > { %v1391_v63 = vpop.f32.mrf.mxu0  ;;  %v1526_v1 = vpop.f32.mrf.mxu1 }
 0x2db   : > { %v1527_v2 = vadd.f32 %v1526_v1, %v1382_v58  ;;  %v1392_v4 = vadd.f32 %v3492_v48, %v1391_v63  ;;  %v1606_v5 = vmul.f32 %v2731_v18, %v1532_v62 }
 0x2dc   : > { %v2793_v3 = vpop.f32.mrf.mxu0  ;;  %v2818_v56 = vpop.f32.mrf.mxu1 }
 0x2dd   : > { %v1605_v59 = vmul.f32 %v1527_v2, %v966_v19  ;;  %v1407_v61 = vadd.f32 %v2793_v3, %v3492_v48  ;;  %v1542_v0 = vadd.f32 %v2818_v56, %v1397_v60 }
 0x2de   : > { %v1401_v6 = vpop.f32.mrf.mxu0  ;;  %v1536_v7 = vpop.f32.mrf.mxu1 }
 0x2df   : > { %v1537_v8 = vadd.f32 %v1536_v7, %v1392_v4  ;;  %2845 = vmatprep.mubr.msk.f32.mxu0 %vm1625_vm2, %v1605_v59  ;;  %v1402_v11 = vadd.f32 %v3492_v48, %v1401_v6  ;;  %v1608_v13 = vmul.f32 %v2734_v21, %v1542_v0 }
 0x2e0   : > { %v2796_v9 = vpop.f32.mrf.mxu0  ;;  %v2821_v10 = vpop.f32.mrf.mxu1  ;;  %2846 = vmatmul.mubr.msk.f32.vlgmr.msra.gmra.mxu0 %vm1625_vm2, %v1606_v5 }
 0x2e1   : > { %v1607_v12 = vmul.f32 %v1537_v8, %v976_v23  ;;  %v1417_v14 = vadd.f32 %v2796_v9, %v3492_v48  ;;  %v1552_v15 = vadd.f32 %v2821_v10, %v1407_v61 }
 0x2e2   : > { %v1411_v16 = vpop.f32.mrf.mxu0  ;;  %v1546_v17 = vpop.f32.mrf.mxu1 }
 0x2e3   : > { %v1547_v18 = vadd.f32 %v1546_v17, %v1402_v11  ;;  %2848 = vmatprep.mubr.msk.f32.mxu0 %vm1625_vm2, %v1607_v12  ;;  %v1412_v51 = vadd.f32 %v3492_v48, %v1411_v16  ;;  %v1610_v54 = vmul.f32 %v3443_v25, %v1552_v15 }
 0x2e4   : > { %v2799_v19 = vpop.f32.mrf.mxu0  ;;  %v2824_v50 = vpop.f32.mrf.mxu1  ;;  %2849 = vmatmul.mubr.msk.f32.gmra.mxu0 %vm1625_vm2, %v1608_v13 }
 0x2e5   : > { %v1609_v53 = vmul.f32 %v1547_v18, %v3447_v27  ;;  %v1427_v21 = vadd.f32 %v2799_v19, %v3492_v48  ;;  %v1562_v23 = vadd.f32 %v2824_v50, %v1417_v14 }
 0x2e6   : > { %v1421_v57 = vpop.f32.mrf.mxu0  ;;  %v1556_v58 = vpop.f32.mrf.mxu1 }
 0x2e7   : > { %v1557_v60 = vadd.f32 %v1556_v58, %v1412_v51  ;;  %2851 = vmatprep.mubr.msk.f32.mxu0 %vm1625_vm2, %v1609_v53  ;;  %v1422_v1 = vadd.f32 %v3492_v48, %v1421_v57  ;;  %v1612_v27 = vmul.f32 %v3451_v29, %v1562_v23 }
 0x2e8   : > { %v2802_v62 = vpop.f32.mrf.mxu0  ;;  %v2827_v63 = vpop.f32.mrf.mxu1  ;;  %2852 = vmatmul.mubr.msk.f32.gmra.mxu0 %vm1625_vm2, %v1610_v54 }
 0x2e9   : > { %v1611_v2 = vmul.f32 %v1557_v60, %v3455_v31  ;;  %v1437_v25 = vadd.f32 %v2802_v62, %v3492_v48  ;;  %v1572_v3 = vadd.f32 %v2827_v63, %v1427_v21 }
 0x2ea   : > { %v1431_v56 = vpop.f32.mrf.mxu0  ;;  %v1566_v4 = vpop.f32.mrf.mxu1 }
 0x2eb   : > { %v1567_v59 = vadd.f32 %v1566_v4, %v1422_v1  ;;  %2854 = vmatprep.mubr.msk.f32.mxu0 %vm1625_vm2, %v1611_v2  ;;  %v1432_v0 = vadd.f32 %v3492_v48, %v1431_v56  ;;  %v1614_v31 = vmul.f32 %v3459_v33, %v1572_v3 }
 0x2ec   : > { %v2805_v5 = vpop.f32.mrf.mxu0  ;;  %v2830_v61 = vpop.f32.mrf.mxu1  ;;  %2855 = vmatmul.mubr.msk.f32.gmra.mxu0 %vm1625_vm2, %v1612_v27 }
 0x2ed   : > { %v1613_v6 = vmul.f32 %v1567_v59, %v3463_v35  ;;  %v1447_v29 = vadd.f32 %v2805_v5, %v3492_v48  ;;  %v1582_v7 = vadd.f32 %v2830_v61, %v1437_v25 }
 0x2ee   : > { %v1441_v8 = vpop.f32.mrf.mxu0  ;;  %v1576_v9 = vpop.f32.mrf.mxu1 }
 0x2ef   : > { %v1577_v10 = vadd.f32 %v1576_v9, %v1432_v0  ;;  %2857 = vmatprep.mubr.msk.f32.mxu0 %vm1625_vm2, %v1613_v6  ;;  %v1442_v13 = vadd.f32 %v3492_v48, %v1441_v8  ;;  %v1616_v35 = vmul.f32 %v3467_v37, %v1582_v7 }
 0x2f0   : > { %v2808_v11 = vpop.f32.mrf.mxu0  ;;  %v2833_v12 = vpop.f32.mrf.mxu1  ;;  %2858 = vmatmul.mubr.msk.f32.gmra.mxu0 %vm1625_vm2, %v1614_v31 }
 0x2f1   : > { %v1615_v14 = vmul.f32 %v1577_v10, %v3471_v39  ;;  %v1457_v33 = vadd.f32 %v2808_v11, %v3492_v48  ;;  %v1592_v15 = vadd.f32 %v2833_v12, %v1447_v29 }
 0x2f2   : > { %v1451_v16 = vpop.f32.mrf.mxu0  ;;  %v1586_v17 = vpop.f32.mrf.mxu1 }
 0x2f3   : > { %v1587_v18 = vadd.f32 %v1586_v17, %v1442_v13  ;;  %2860 = vmatprep.mubr.msk.f32.mxu0 %vm1625_vm2, %v1615_v14  ;;  %v1452_v50 = vadd.f32 %v3492_v48, %v1451_v16  ;;  %v1618_v53 = vmul.f32 %v3475_v41, %v1592_v15 }
 0x2f4   : > { %v2836_v19 = vpop.f32.mrf.mxu1  ;;  %2861 = vmatmul.mubr.msk.f32.gmra.mxu0 %vm1625_vm2, %v1616_v35 }
 0x2f5   : > { %v1617_v51 = vmul.f32 %v1587_v18, %v3479_v43  ;;  %v1602_v39 = vadd.f32 %v2836_v19, %v1457_v33 }
 0x2f6   : > { %v1596_v54 = vpop.f32.mrf.mxu1 }
 0x2f7   : > { %v1597_v37 = vadd.f32 %v1596_v54, %v1452_v50  ;;  %2863 = vmatprep.mubr.msk.f32.mxu0 %vm1625_vm2, %v1617_v51  ;;  %v1620_v23 = vmul.f32 %v3483_v45, %v1602_v39 }
 0x2f8   : > { %2864 = vmatmul.mubr.msk.f32.gmra.mxu0 %vm1625_vm2, %v1618_v53 }
 0x2f9   : > { %v1619_v21 = vmul.f32 %v1597_v37, %v3487_v47 }
 0x2fb   : > { %2866 = vmatprep.mubr.msk.f32.mxu0 %vm1625_vm2, %v1619_v21 }
 0x2fc   : > { %2867 = vmatmul.mubr.msk.f32.gmra.mxu0 %vm1625_vm2, %v1620_v23 }
 0x3a0   : > { %v2847_v48 = vpop.f32.mrf.mxu0 }
 0x3a1   : > { %v1821_v57 = vmul.f32 1.442695, %v2847_v48 }
 0x3a2   : > { %v1740_v43 = vpop.f32.mrf.mxu0 }
 0x3a3   : > { %v1819_v58 = vmul.f32 1.442695, %v1740_v43 }
 0x3a4   : > { %v2850_v41 = vpop.f32.mrf.mxu0 }
 0x3a5   : > { %2968 = vpow2.f32 %v1819_v58  ;;  %v1825_v60 = vmul.f32 1.442695, %v2850_v41 }
 0x3a6   : > { %2970 = vpow2.f32 %v1821_v57  ;;  %v1750_v62 = vpop.f32.mrf.mxu0 }
 0x3a7   : > { %v1823_v63 = vmul.f32 1.442695, %v1750_v62 }
 0x3a8   : > { %v2853_v1 = vpop.f32.mrf.mxu0 }
 0x3a9   : > { %2972 = vpow2.f32 %v1823_v63  ;;  %v1829_v47 = vmul.f32 1.442695, %v2853_v1 }
 0x3aa   : > { %2974 = vpow2.f32 %v1825_v60  ;;  %v1760_v2 = vpop.f32.mrf.mxu0 }
 0x3ab   : > { %v1827_v45 = vmul.f32 1.442695, %v1760_v2 }
 0x3ac   : > { %v2856_v27 = vpop.f32.mrf.mxu0 }
 0x3ad   : > { %2976 = vpow2.f32 %v1827_v45  ;;  %v1833_v25 = vmul.f32 1.442695, %v2856_v27 }
 0x3ae   : > { %2978 = vpow2.f32 %v1829_v47  ;;  %v1770_v3 = vpop.f32.mrf.mxu0 }
 0x3af   : > { %v1831_v56 = vmul.f32 1.442695, %v1770_v3 }
 0x3b0   : > { %v2859_v4 = vpop.f32.mrf.mxu0 }
 0x3b1   : > { %2980 = vpow2.f32 %v1831_v56  ;;  %v1837_v5 = vmul.f32 1.442695, %v2859_v4 }
 0x3b2   : > { %v2969_v59 = vpop.eup %2968  ;;  %2982 = vpow2.f32 %v1833_v25  ;;  %v1780_v61 = vpop.f32.mrf.mxu0 }
 0x3b3   : > { %v2971_v0 = vpop.eup %2970  ;;  %v1835_v6 = vmul.f32 1.442695, %v1780_v61  ;;  %2871 = vmatprep.mubr.msk.f32.mxu1 %vm1852_vm5, %v2969_v59  ;;  %v836_v59 = vshrl.u32 %v609_v55, 7  ;;  %v3583_v61 = vld [vmem:[%s474_s14] ss:$0 sm:$0xff] }
 0x3b4   : > { %v2862_v31 = vpop.f32.mrf.mxu0  ;;  %2872 = vmatmul.mubr.msk.f32.vlgmr.msra.gmra.mxu1 %vm1852_vm5, %v2971_v0  ;;  %v3046_v0 = vmov 1.0  }
 0x3b5   : > { %2984 = vpow2.f32 %v1835_v6  ;;  %v1841_v7 = vmul.f32 1.442695, %v2862_v31  ;;  %vm843_vm6 = vcmp.eq.s32.totalorder %v836_v59, %v3583_v61 }
 0x3b6   : > { %v2973_v29 = vpop.eup %2972  ;;  %2986 = vpow2.f32 %v1837_v5  ;;  %v1790_v8 = vpop.f32.mrf.mxu0  ;;  %v3576_v5 = vadd.s32 8, %v836_v59  ;;  %2927 = vmatprep.mubr.msk.f32.mxu0 %vm843_vm6, %v3046_v0 }
 0x3b7   : > { %v2975_v9 = vpop.eup %2974  ;;  %v1839_v10 = vmul.f32 1.442695, %v1790_v8  ;;  %2874 = vmatprep.mubr.msk.f32.mxu1 %vm1852_vm5, %v2973_v29 }
 0x3b8   : > { %v2865_v11 = vpop.f32.mrf.mxu0  ;;  %2875 = vmatmul.mubr.msk.f32.gmra.mxu1 %vm1852_vm5, %v2975_v9  ;;  %vm844_vm7 = vcmp.eq.s32.totalorder %v3576_v5, %v3583_v61 }
 0x3b9   : > { %2988 = vpow2.f32 %v1839_v10  ;;  %v1845_v13 = vmul.f32 1.442695, %v2865_v11 }
 0x3ba   : > { %v2977_v12 = vpop.eup %2976  ;;  %2990 = vpow2.f32 %v1841_v7  ;;  %v1800_v14 = vpop.f32.mrf.mxu0 }
 0x3bb   : > { %v2979_v35 = vpop.eup %2978  ;;  %v1843_v33 = vmul.f32 1.442695, %v1800_v14  ;;  %2877 = vmatprep.mubr.msk.f32.mxu1 %vm1852_vm5, %v2977_v12 }
 0x3bc   : > { %v2868_v15 = vpop.f32.mrf.mxu0  ;;  %2878 = vmatmul.mubr.msk.f32.gmra.mxu1 %vm1852_vm5, %v2979_v35 }
 0x3bd   : > { %2992 = vpow2.f32 %v1843_v33  ;;  %v1849_v17 = vmul.f32 1.442695, %v2868_v15 }
 0x3be   : > { %v2981_v16 = vpop.eup %2980  ;;  %2994 = vpow2.f32 %v1845_v13  ;;  %v1810_v18 = vpop.f32.mrf.mxu0 }
 0x3bf   : > { %v2983_v19 = vpop.eup %2982  ;;  %v1847_v50 = vmul.f32 1.442695, %v1810_v18  ;;  %2880 = vmatprep.mubr.msk.f32.mxu1 %vm1852_vm5, %v2981_v16 }
 0x3c0   : > { %2881 = vmatmul.mubr.msk.f32.gmra.mxu1 %vm1852_vm5, %v2983_v19 }
 0x3c1   : > { %2996 = vpow2.f32 %v1847_v50 }
 0x3c2   : > { %v2985_v51 = vpop.eup %2984  ;;  %2998 = vpow2.f32 %v1849_v17 }
 0x3c3   : > { %v2987_v53 = vpop.eup %2986  ;;  %2883 = vmatprep.mubr.msk.f32.mxu1 %vm1852_vm5, %v2985_v51 }
 0x3c4   : > { %2884 = vmatmul.mubr.msk.f32.gmra.mxu1 %vm1852_vm5, %v2987_v53 }
 0x3c6   : > { %v2989_v39 = vpop.eup %2988 }
 0x3c7   : > { %v2991_v54 = vpop.eup %2990  ;;  %2886 = vmatprep.mubr.msk.f32.mxu1 %vm1852_vm5, %v2989_v39 }
 0x3c8   : > { %2887 = vmatmul.mubr.msk.f32.gmra.mxu1 %vm1852_vm5, %v2991_v54 }
 0x3ca   : > { %v2993_v37 = vpop.eup %2992 }
 0x3cb   : > { %v2995_v21 = vpop.eup %2994  ;;  %2889 = vmatprep.mubr.msk.f32.mxu1 %vm1852_vm5, %v2993_v37 }
 0x3cc   : > { %2890 = vmatmul.mubr.msk.f32.gmra.mxu1 %vm1852_vm5, %v2995_v21 }
 0x3ce   : > { %v2997_v23 = vpop.eup %2996 }
 0x3cf   : > { %v2999_v48 = vpop.eup %2998  ;;  %2892 = vmatprep.mubr.msk.f32.mxu1 %vm1852_vm5, %v2997_v23 }
 0x3d0   : > { %2893 = vmatmul.mubr.msk.f32.gmra.mxu1 %vm1852_vm5, %v2999_v48 }
 0x474   : > { %v3558_v57 = vpop.f32.mrf.mxu1 }
 0x476   : > { %v3560_v43 = vpop.f32.mrf.mxu1 }
 0x478   : > { %v3562_v58 = vpop.f32.mrf.mxu1 }
 0x479   : > { %v2049_v21 = vmul.f32 %v3562_v58, %v3441_v24 }
 0x47a   : > { %v3564_v41 = vpop.f32.mrf.mxu1 }
 0x47b   : > { %v2048_v48 = vmul.f32 %v3564_v41, %v3445_v26 }
 0x47c   : > { %v3566_v60 = vpop.f32.mrf.mxu1 }
 0x47d   : > { %v2051_v53 = vmul.f32 %v3566_v60, %v3449_v28 }
 0x47e   : > { %v3568_v62 = vpop.f32.mrf.mxu1 }
 0x47f   : > { %v2050_v54 = vmul.f32 %v3568_v62, %v3453_v30 }
 0x480   : > { %v3570_v63 = vpop.f32.mrf.mxu1 }
 0x482   : > { %v3572_v1 = vpop.f32.mrf.mxu1 }
 0x484   : > { %v2885_v47 = vpop.f32.mrf.mxu1 }
 0x486   : > { %v2007_v2 = vpop.f32.mrf.mxu1 }
 0x488   : > { %v2888_v45 = vpop.f32.mrf.mxu1 }
 0x48a   : > { %v2017_v27 = vpop.f32.mrf.mxu1 }
 0x48c   : > { %v2891_v25 = vpop.f32.mrf.mxu1 }
 0x48d   : > { %v2059_v8 = vmul.f32 %v2891_v25, %v3481_v44  ;;  %v2056_v44 = vmul.f32 %v2017_v27, %v3477_v42  ;;  %v2053_v42 = vmul.f32 %v3570_v63, %v3457_v32 }
 0x48e   : > { %v2027_v3 = vpop.f32.mrf.mxu1 }
 0x48f   : > { %v2058_v11 = vmul.f32 %v2027_v3, %v3485_v46  ;;  %v2055_v46 = vmul.f32 %v2885_v47, %v3465_v36  ;;  %v2052_v36 = vmul.f32 %v3572_v1, %v3461_v34 }
 0x490   : > { %v2894_v56 = vpop.f32.mrf.mxu1 }
 0x491   : > { %2108 = vrot.lane.b32.xlu0 %v2894_v56, %s3045_s21  ;;  %v2061_v55 = vmul.f32 %v2894_v56, %v3494_v49 }
 0x492   : > { %v2037_v4 = vpop.f32.mrf.mxu1 }
 0x493   : > { %2106 = vrot.lane.b32.xlu1 %v2037_v4, %s3045_s21  ;;  %v2060_v31 = vmul.f32 %v2037_v4, %v3497_v52  ;;  %v2057_v52 = vmul.f32 %v2888_v45, %v3473_v40  ;;  %v2054_v40 = vmul.f32 %v2007_v2, %v3469_v38 }
 0x495   : > { %2104 = vrot.lane.b32.xlu0 %v2891_v25, %s3045_s21 }
 0x497   : > { %2102 = vrot.lane.b32.xlu1 %v2027_v3, %s3045_s21 }
 0x499   : > { %2100 = vrot.lane.b32.xlu0 %v2888_v45, %s3045_s21 }
 0x49b   : > { %2098 = vrot.lane.b32.xlu1 %v2017_v27, %s3045_s21 }
 0x49d   : > { %2096 = vrot.lane.b32.xlu0 %v2885_v47, %s3045_s21  ;;  %v2142_v47 = vld [vmem:[#allocation5] sm:$0xff] }
 0x49f   : > { %2094 = vrot.lane.b32.xlu1 %v2007_v2, %s3045_s21 }
 0x4a1   : > { %2092 = vrot.lane.b32.xlu0 %v3570_v63, %s3045_s21 }
 0x4a3   : > { %2090 = vrot.lane.b32.xlu1 %v3572_v1, %s3045_s21 }
 0x4a5   : > { %2088 = vrot.lane.b32.xlu0 %v3566_v60, %s3045_s21 }
 0x4a7   : > { %2086 = vrot.lane.b32.xlu1 %v3568_v62, %s3045_s21  ;;  %v2047_v62 = vmul.f32 %v3558_v57, %v3437_v20  ;;  %v2143_v20 = vld [vmem:[#allocation5 + $0x8] sm:$0xff] }
 0x4a9   : > { %2084 = vrot.lane.b32.xlu0 %v3562_v58, %s3045_s21  ;;  %v2046_v58 = vmul.f32 %v3560_v43, %v3439_v22 }
 0x4ab   : > { %2082 = vrot.lane.b32.xlu1 %v3564_v41, %s3045_s21 }
 0x4ad   : > { %2080 = vrot.lane.b32.xlu0 %v3558_v57, %s3045_s21 }
 0x4af   : > { %2078 = vrot.lane.b32.xlu1 %v3560_v43, %s3045_s21 }
 0x503   : > { %v2109_v6 = vpop.permute.xlu0 %2108 }
 0x504   : > { %v2141_v29 = vsel %vm1625_vm2, %v2061_v55, %v2109_v6 }
 0x505   : > { %2895 = vmatprep.subr.mxu0 %v2141_v29  ;;  %v2107_v7 = vpop.permute.xlu1 %2106 }
 0x506   : > { %2896 = vmatpush3.msra.mxu0 %v2141_v29  ;;  %v2140_v9 = vsel %vm1625_vm2, %v2060_v31, %v2107_v7 }
 0x507   : > { %v2105_v10 = vpop.permute.xlu0 %2104  ;;  %2897 = vmatprep.subr.mxu0 %v2140_v9 }
 0x508   : > { %2898 = vmatpush3.msra.mxu0 %v2140_v9  ;;  %v2139_v12 = vsel %vm1625_vm2, %v2059_v8, %v2105_v10 }
 0x509   : > { %v2103_v49 = vpop.permute.xlu1 %2102  ;;  %2899 = vmatprep.subr.mxu0 %v2139_v12 }
 0x50a   : > { %2900 = vmatpush3.msra.mxu0 %v2139_v12  ;;  %v2138_v13 = vsel %vm1625_vm2, %v2058_v11, %v2103_v49 }
 0x50b   : > { %v2101_v14 = vpop.permute.xlu0 %2100  ;;  %2901 = vmatprep.subr.mxu0 %v2138_v13 }
 0x50c   : > { %2902 = vmatpush3.msra.mxu0 %v2138_v13  ;;  %v2137_v35 = vsel %vm1625_vm2, %v2057_v52, %v2101_v14 }
 0x50d   : > { %v2099_v33 = vpop.permute.xlu1 %2098  ;;  %2903 = vmatprep.subr.mxu0 %v2137_v35 }
 0x50e   : > { %2904 = vmatpush3.msra.mxu0 %v2137_v35  ;;  %v2136_v15 = vsel %vm1625_vm2, %v2056_v44, %v2099_v33 }
 0x50f   : > { %v2097_v16 = vpop.permute.xlu0 %2096  ;;  %2905 = vmatprep.subr.mxu0 %v2136_v15 }
 0x510   : > { %2906 = vmatpush3.msra.mxu0 %v2136_v15  ;;  %v2135_v17 = vsel %vm1625_vm2, %v2055_v46, %v2097_v16 }
 0x511   : > { %v2095_v18 = vpop.permute.xlu1 %2094  ;;  %2907 = vmatprep.subr.mxu0 %v2135_v17 }
 0x512   : > { %2908 = vmatpush3.msra.mxu0 %v2135_v17  ;;  %v2134_v19 = vsel %vm1625_vm2, %v2054_v40, %v2095_v18 }
 0x513   : > { %v2093_v50 = vpop.permute.xlu0 %2092  ;;  %2909 = vmatprep.subr.mxu0 %v2134_v19 }
 0x514   : > { %2910 = vmatpush3.msra.mxu0 %v2134_v19  ;;  %v2133_v51 = vsel %vm1625_vm2, %v2053_v42, %v2093_v50 }
 0x515   : > { %v2091_v38 = vpop.permute.xlu1 %2090  ;;  %2911 = vmatprep.subr.mxu0 %v2133_v51 }
 0x516   : > { %2912 = vmatpush3.msra.mxu0 %v2133_v51  ;;  %v2132_v39 = vsel %vm1625_vm2, %v2052_v36, %v2091_v38 }
 0x517   : > { %v2089_v32 = vpop.permute.xlu0 %2088  ;;  %2913 = vmatprep.subr.mxu0 %v2132_v39 }
 0x518   : > { %2914 = vmatpush3.msra.mxu0 %v2132_v39  ;;  %v2131_v37 = vsel %vm1625_vm2, %v2051_v53, %v2089_v32 }
 0x519   : > { %v2087_v34 = vpop.permute.xlu1 %2086  ;;  %2915 = vmatprep.subr.mxu0 %v2131_v37 }
 0x51a   : > { %2916 = vmatpush3.msra.mxu0 %v2131_v37  ;;  %v2130_v23 = vsel %vm1625_vm2, %v2050_v54, %v2087_v34 }
 0x51b   : > { %v2085_v28 = vpop.permute.xlu0 %2084  ;;  %2917 = vmatprep.subr.mxu0 %v2130_v23 }
 0x51c   : > { %2918 = vmatpush3.msra.mxu0 %v2130_v23  ;;  %v2129_v60 = vsel %vm1625_vm2, %v2049_v21, %v2085_v28 }
 0x51d   : > { %v2083_v30 = vpop.permute.xlu1 %2082  ;;  %2919 = vmatprep.subr.mxu0 %v2129_v60 }
 0x51e   : > { %2920 = vmatpush3.msra.mxu0 %v2129_v60  ;;  %v2128_v63 = vsel %vm1625_vm2, %v2048_v48, %v2083_v30 }
 0x51f   : > { %v2081_v24 = vpop.permute.xlu0 %2080  ;;  %2921 = vmatprep.subr.mxu0 %v2128_v63 }
 0x520   : > { %2922 = vmatpush3.msra.mxu0 %v2128_v63  ;;  %v2127_v1 = vsel %vm1625_vm2, %v2047_v62, %v2081_v24 }
 0x521   : > { %v2079_v26 = vpop.permute.xlu1 %2078  ;;  %2923 = vmatprep.subr.mxu0 %v2127_v1 }
 0x522   : > { %2924 = vmatpush3.msra.mxu0 %v2127_v1  ;;  %v2126_v41 = vsel %vm1625_vm2, %v2046_v58, %v2079_v26 }
 0x523   : > { %2925 = vmatprep.subr.mxu0 %v2126_v41 }
 0x524   : > { %2926 = vmatpush3.msra.mxu0 %v2126_v41 }
 0x525   : > { %2928 = vmatmul.mubr.msk.f32.vlgmr.msra.gmra.mxu0 %vm844_vm7, %v3046_v0 }
 0x5e5   : > { %v2929_v57 = vpop.f32.mrf.mxu0 }
 0x5e6   : > { %v2220_v22 = vadd.f32 %v2929_v57, %v2143_v20  ;;  %2227 = sbr.rel (%p2567_p6) target bundleno = 1857 (0x741), region = 80 }
 0x5e7   : > { %v2210_v43 = vpop.f32.mrf.mxu0 }
 0x5e8   : > { %2223 = vst.msk [vmem:[#allocation5 + $0x8] sm:$0xff] %vm2221_vm8, %v2220_v22  ;;  %v2219_v2 = vadd.f32 %v2210_v43, %v2142_v47 }
 0x5ea   : > { %2222 = vst.msk [vmem:[#allocation5] sm:$0xff] %vm2221_vm8, %v2219_v2 }
 0x5eb   : > { %v2247_v25 = vld [vmem:[%s3684_s9 + $0x18] sm:$0xff]  ;;  %v2246_v56 = vld [vmem:[%s3684_s9 + $0x10] sm:$0xff]  ;;  %v2245_v4 = vld [vmem:[%s3684_s9 + $0x8] sm:$0xff] }
 0x5ec   : > { %2930 = vmatprep.subr.mxu0 %v2247_v25  ;;  %v2244_v5 = vld [vmem:[%s3684_s9] sm:$0xff] }
 0x5ed   : > { %2931 = vmatpush3.msra.mxu0 %v2247_v25  ;;  %v2568_v7 = vld [vmem:[%s3685_s10] ss:$0 sm:$0xff] }
 0x5ee   : > { %2932 = vmatprep.subr.mxu0 %v2246_v56 }
 0x5ef   : > { %v2229_v27 = vld [vmem:[#allocation5 + $0x8] sm:$0xff]  ;;  %2933 = vmatpush3.msra.mxu0 %v2246_v56 }
 0x5f0   : > { %v2231_v59 = vadd.f32 1e-08, %v2229_v27  ;;  %2934 = vmatprep.subr.mxu0 %v2245_v4 }
 0x5f1   : > { %v2228_v45 = vld [vmem:[#allocation5] sm:$0xff]  ;;  %2935 = vmatpush3.msra.mxu0 %v2245_v4 }
 0x5f2   : > { %v2230_v3 = vadd.f32 1e-08, %v2228_v45  ;;  %2936 = vmatprep.subr.mxu0 %v2244_v5 }
 0x5f3   : > { %2937 = vmatpush3.msra.mxu0 %v2244_v5 }
 0x5f4   : > { %2234 = vrot.lane.b32.xlu0 %v2230_v3, %s3047_s16 }
 0x5f8   : > { %2236 = vrot.lane.b32.xlu0 %v2231_v59, %s3047_s16 }
 0x666   : > { %v2235_v61 = vpop.permute.xlu0 %2234 }
 0x667   : > { %3000 = vrcp.f32 %v2235_v61 }
 0x66a   : > { %v2237_v0 = vpop.permute.xlu0 %2236 }
 0x66b   : > { %3002 = vrcp.f32 %v2237_v0 }
 0x674   : > { %v3001_v55 = vpop.eup %3000 }
 0x675   : > { %v2241_v6 = vmul.f32 %v3001_v55, %v2228_v45 }
 0x677   : > { %2938 = vmatprep.mubr.msk.f32.mxu0 %vm1625_vm2, %v2241_v6 }
 0x678   : > { %v3003_v31 = vpop.eup %3002 }
 0x679   : > { %v2243_v29 = vmul.f32 %v3003_v31, %v2229_v27 }
 0x67b   : > { %2939 = vmatmul.mubr.msk.f32.vlgmr.msra.gmra.mxu0 %vm1625_vm2, %v2243_v29 }
 0x73b   : > { %v2940_v8 = vpop.f32.mrf.mxu0 }
 0x73c   : > { %v2333_v9 = vadd.f32 %v2940_v8, %v2568_v7 }
 0x73d   : > { %v2327_v10 = vpop.f32.mrf.mxu0 }
 0x73e   : > { %2337 = vst.msk [vmem:[#allocation6 + $0x8] sm:$0xff] %vm1625_vm2, %v2333_v9  ;;  %v2328_v11 = vadd.f32 %v2568_v7, %v2327_v10 }
 0x740   : > { %2336 = vst.msk [vmem:[#allocation6] sm:$0xff] %vm1625_vm2, %v2328_v11 }
 0x741 PF: > { %p2945_p7 = scmp.eq.s32.totalorder %s3127_s26, 2  ;;  %s3048_s18 = smov [#allocation6]  }
 0x742   : > { %s2344_s21 = sshll.u32 %s3048_s18, 4  ;;  %s2345_s21 = int_to_ptr.vmem [resolvable:$true] %s2344_s21 }
 0x743   : > { %s3004_s22 = scalar_lea.vmem %s2345_s21, 256  ;;  %p3011_p11 = scmp.lt.s32.totalorder %s2345_s21, %s2345_s21 }
 0x744   : > { %p3005_p8 = scmp.ne.s32.totalorder %s2345_s21, %s3004_s22  ;;  %p3012_p12 = scmp.lt.s32.totalorder %s3004_s22, %s3004_s22 }
 0x746   : > { %p3006_p9 = pnand %p3005_p8, %p2945_p7  ;;  %p3013_p13 = por %p3012_p12, %p3011_p11 }
 0x748   : > { %p3007_p10 = pneg %p3006_p9 }
 0x74a   : > { %p3014_p0 = pnand %p3013_p13, %p3007_p10 }
 0x74c   : > { %3017 = shalt.err (!%p3014_p0)
}
 0x74d   : > { %s3049_s23 = smov 128   ;;  %s3050_s28 = smov 8  }
 0x74e   : > { %2942 = dma.vmem_to_hbm [thread:$0]  (%p2945_p7), %s2345_s21, 256, %s3688_s13, [#allocation7], %s3049_s23, %s3049_s23, %s3050_s28  }
 0x74f   : > { %3033 = dma.done.wait (%p2945_p7), [#allocation7], 256  }
 0x750   : > { %3035 = vsyncadd (%p2945_p7), [#allocation7], 4294967040 }
 0x751 PF: > { %s24_s25 = sadd.s32 1, %s3038_s25  }
 0x752   : > { %p21_p1 = scmp.ge.s32.totalorder %s24_s25, 5  }
 0x754   :  { %23 = sbr.rel (!%p21_p1) target bundleno = 1 (0x1), region = 116 }
 0x759   :  { %2360 = vsyncpa [#allocation7], 1 }
 0x75a   :  { %2362 = vsyncpa [#allocation7 + $0x1], 1 }

// kernel: tpu_custom_call.1
= control target key start
LH: loop header
LB: loop body
LE: loop exit
PB: predicated region body
PF: predicated region fallthrough
CT: control target
= control target key end

     0   :  { %18 = vsyncpa [#allocation7], 0  ;;  %s3121_s25 = smov 0   ;;  %s3675_s0 = inlined_call_operand.vmem [shape: s32[384,1], index: 0, kind: input, shape index: {}]   ;;  %s3676_s1 = inlined_call_operand.vmem [shape: s32[1,384], index: 1, kind: input, shape index: {}]   ;;  %s3677_s2 = inlined_call_operand.vmem [shape: s32[384,1], index: 2, kind: input, shape index: {}]   ;;  %s3678_s3 = inlined_call_operand.vmem [shape: f32[384,16], index: 3, kind: input, shape index: {}]   ;;  %s3679_s4 = inlined_call_operand.vmem [shape: f32[16,32], index: 4, kind: input, shape index: {}]   ;;  %s3680_s5 = inlined_call_operand.vmem [shape: f32[32,96], index: 5, kind: input, shape index: {}]   ;;  %s3681_s6 = inlined_call_operand.vmem [shape: f32[1,96], index: 6, kind: input, shape index: {}]   ;;  %s3682_s7 = inlined_call_operand.vmem [shape: f32[16,32], index: 7, kind: input, shape index: {}]   ;;  %s3683_s8 = inlined_call_operand.vmem [shape: f32[1,32], index: 8, kind: input, shape index: {}]   ;;  %s3684_s9 = inlined_call_operand.vmem [shape: f32[32,32], index: 9, kind: input, shape index: {}]   ;;  %s3685_s10 = inlined_call_operand.vmem [shape: f32[1,32], index: 10, kind: input, shape index: {}]   ;;  %s3686_s11 = inlined_call_operand.vmem [shape: f32[32,8], index: 11, kind: input, shape index: {}]   ;;  %s3687_s12 = inlined_call_operand.vmem [shape: f32[8,32], index: 12, kind: input, shape index: {}]   ;;  %s3688_s13 = inlined_call_operand.hbm [shape: f32[16,32], index: 13, kind: output, shape index: {}]  }
   0x1 LB: > { %s3127_s26 = sadd.s32 4294967295, %s3038_s25   ;;  %p2422_p0 = scmp.ge.s32.totalorder %s3038_s25, 1  ;;  %s3038_s25 = sphi %s3121_s25, %s24_s25  }
   0x2   : > { %p414_p1 = scmp.lt.s32.totalorder %s3038_s25, 4 }
   0x4   : > { %p415_p2 = pnand %p2422_p0, %p414_p1 }
   0x5   : > { %s2423_s27 = sshll.u32 (!%p415_p2), %s3127_s26, 4  ;;  %p472_p3 = scmp.lt.s32.totalorder (!%p415_p2), %s3127_s26, 2 }
   0x6   : > { %418 = sbr.rel (%p415_p2) target bundleno = 1873 (0x751), region = 72  ;;  %p467_p4 = scmp.lt.s32.totalorder (!%p415_p2), %s2423_s27, 47 }
   0x7   : > { %p2429_p5 = scmp.ne.s32.totalorder (!%p415_p2), %s3127_s26, 0 }
   0xb   : > { %s3134_s28 = scalar_select %p472_p3, %s3127_s26, 2 }
   0xc   : > { %s3690_s27 = smov (!%p467_p4, %s2423_s27), 47  ;;  %490 = sbr.rel (%p2429_p5) target bundleno = 343 (0x157), region = 76 }
   0xd   : > { %s474_s14 = scalar_lea.vmem %s3676_s1, %s3134_s28  ;;  %s2424_s15 = sshll.u32 %s3690_s27, 3 }
   0xe   : > { %s3143_s18 = scalar_lea.vmem %s3675_s0, %s2424_s15  ;;  %s3148_s21 = scalar_lea.vmem %s3677_s2, %s2424_s15 }
   0xf   : > { %s3153_s24 = scalar_lea.vmem %s3678_s3, %s2424_s15  ;;  %s3041_s17 = smov (!%p2429_p5), 64  }
  0x10   : > { %s3042_s19 = smov (!%p2429_p5), 96  }
  0x11   : > { %v496_v0 = vld [vmem:[%s3680_s5 + $0x18] sm:$0xff]  ;;  %v495_v1 = vld [vmem:[%s3680_s5 + $0x10] sm:$0xff]  ;;  %vm504_vm0 = vcmask 261120   ;;  %v491_v2 = vld [vmem:[%s3679_s4] sm:$0xff]  ;;  %vm606_vm1 = vcmask 523264   ;;  %v3040_v6 = vmov 0.0  }
  0x12   : > { %2714 = vmatprep.subr.mxu0 %v496_v0  ;;  %v494_v3 = vld [vmem:[%s3680_s5 + $0x8] sm:$0xff]  ;;  %2722 = vmatprep.mubr.msk.f32.mxu0 %vm504_vm0, %v491_v2  ;;  %v493_v4 = vld [vmem:[%s3680_s5] sm:$0xff]  ;;  %607 = vst.msk [vmem:[#allocation5] sm:$0xff] %vm606_vm1, %v3040_v6  ;;  %608 = vst.msk [vmem:[#allocation5 + $0x8] sm:$0xff] %vm606_vm1, %v3040_v6 }
  0x13   : > { %2715 = vmatpush3.msra.mxu0 %v496_v0  ;;  %v492_v5 = vld [vmem:[%s3679_s4 + $0x8] sm:$0xff]  ;;  %v2430_v7 = vld [vmem:[%s3681_s6] ss:$0 sm:$0xff] }
  0x14   : > { %2716 = vmatprep.subr.mxu0 %v495_v1 }
  0x15   : > { %2717 = vmatpush3.msra.mxu0 %v495_v1 }
  0x16   : > { %2718 = vmatprep.subr.mxu0 %v494_v3 }
  0x17   : > { %2719 = vmatpush3.msra.mxu0 %v494_v3 }
  0x18   : > { %2720 = vmatprep.subr.mxu0 %v493_v4 }
  0x19   : > { %2721 = vmatpush3.msra.mxu0 %v493_v4 }
  0x1a   : > { %2723 = vmatmul.mubr.msk.f32.vlgmr.msra.gmra.mxu0 %vm504_vm0, %v492_v5 }
  0xda   : > { %v2724_v8 = vpop.f32.mrf.mxu0 }
  0xdb   : > { %v583_v9 = vadd.f32 %v2724_v8, %v2430_v7 }
  0xdc   : > { %v577_v10 = vpop.f32.mrf.mxu0 }
  0xdd   : > { %587 = vst.msk [vmem:[#allocation2 + $0x8] sm:$0xff] %vm504_vm0, %v583_v9  ;;  %v578_v11 = vadd.f32 %v2430_v7, %v577_v10 }
  0xdf   : > { %586 = vst.msk [vmem:[#allocation2] sm:$0xff] %vm504_vm0, %v578_v11  ;;  %598 = vrot.lane.b32.xlu1 %v578_v11, %s3041_s17  ;;  %590 = vrot.lane.b32.xlu0 %v578_v11, %s3042_s19 }
  0xe3   : > { %600 = vrot.lane.b32.xlu1 %v583_v9, %s3041_s17  ;;  %592 = vrot.lane.b32.xlu0 %v583_v9, %s3042_s19 }
 0x151   : > { %v599_v12 = vpop.permute.xlu1 %598  ;;  %v591_v13 = vpop.permute.xlu0 %590 }
 0x152   : > { %604 = vst.msk [vmem:[#allocation4] sm:$0xff] %vm504_vm0, %v599_v12  ;;  %596 = vst.msk [vmem:[#allocation3] sm:$0xff] %vm504_vm0, %v591_v13 }
 0x155   : > { %v601_v14 = vpop.permute.xlu1 %600  ;;  %v593_v15 = vpop.permute.xlu0 %592 }
 0x156   : > { %605 = vst.msk [vmem:[#allocation4 + $0x8] sm:$0xff] %vm504_vm0, %v601_v14  ;;  %597 = vst.msk [vmem:[#allocation3 + $0x8] sm:$0xff] %vm504_vm0, %v593_v15 }
 0x157 PF: > { %v723_v16 = vld [vmem:[%s3148_s21] sm:$0xff]  ;;  %v3043_v18 = vmov 0   ;;  %v724_v19 = vld [vmem:[%s3148_s21 + $0x8] sm:$0xff]  ;;  %v614_v21 = vld [vmem:[%s3143_s18 + $0x18] sm:$0xff]  ;;  %v609_v55 = vlaneseq  ;;  %vm851_vm2 = vcmask 130048   ;;  %v3044_v59 = vmov 0.0  }
 0x158   : > { %v611_v17 = vld [vmem:[%s3143_s18] sm:$0xff]  ;;  %2967 = vset.pattern.permute.xlu1 %v3043_v18  ;;  %2966 = vset.pattern.permute.xlu0 %v3043_v18  ;;  %v612_v20 = vld [vmem:[%s3143_s18 + $0x8] sm:$0xff]  ;;  %v613_v22 = vld [vmem:[%s3143_s18 + $0x10] sm:$0xff]  ;;  %p2567_p6 = scmp.ne.s32.totalorder %s3127_s26, 2 }
 0x159   : > { %740 = vperm.xlu1 %2967, %v723_v16   ;;  %628 = vperm.xlu0 %2966, %v611_v17   ;;  %v726_v23 = vld [vmem:[%s3148_s21 + $0x18] sm:$0xff]  ;;  %v850_v24 = vld [vmem:[#allocation2 + $0x8] sm:$0xff]  ;;  %v725_v25 = vld [vmem:[%s3148_s21 + $0x10] sm:$0xff]  ;;  %v3221_v56 = vand.u32 127, %v609_v55  ;;  %s3047_s16 = smov (!%p2567_p6), 96  }
 0x15a   : > { %2725 = vmatprep.subr.mxu0 %v850_v24  ;;  %v849_v27 = vld [vmem:[#allocation2] sm:$0xff]  ;;  %v616_v29 = vld [vmem:[%s3143_s18 + $0x28] sm:$0xff]  ;;  %v618_v33 = vld [vmem:[%s3143_s18 + $0x38] sm:$0xff] }
 0x15b   : > { %2726 = vmatpush3.msra.mxu0 %v850_v24  ;;  %v1047_v28 = vld [vmem:[#allocation4] sm:$0xff]  ;;  %v728_v31 = vld [vmem:[%s3148_s21 + $0x28] sm:$0xff]  ;;  %v617_v34 = vld [vmem:[%s3143_s18 + $0x30] sm:$0xff] }
 0x15c   : > { %2727 = vmatprep.subr.mxu0 %v849_v27  ;;  %v615_v30 = vld [vmem:[%s3143_s18 + $0x20] sm:$0xff]  ;;  %v730_v35 = vld [vmem:[%s3148_s21 + $0x38] sm:$0xff]  ;;  %v729_v36 = vld [vmem:[%s3148_s21 + $0x30] sm:$0xff] }
 0x15d   : > { %743 = vperm.xlu1 %2967, %v724_v19   ;;  %631 = vperm.xlu0 %2966, %v612_v20   ;;  %v1048_v26 = vld [vmem:[#allocation4 + $0x8] sm:$0xff]  ;;  %v727_v32 = vld [vmem:[%s3148_s21 + $0x20] sm:$0xff]  ;;  %v1046_v40 = vld [vmem:[#allocation3 + $0x8] sm:$0xff] }
 0x15e   : > { %2753 = vmatprep.subr.mxu1 %v1048_v26  ;;  %2728 = vmatpush3.msra.mxu0 %v849_v27  ;;  %v620_v37 = vld [vmem:[%s3143_s18 + $0x48] sm:$0xff]  ;;  %v619_v38 = vld [vmem:[%s3143_s18 + $0x40] sm:$0xff]  ;;  %v622_v43 = vld [vmem:[%s3143_s18 + $0x58] sm:$0xff] }
 0x15f   : > { %2754 = vmatpush3.msra.mxu1 %v1048_v26  ;;  %v1259_v39 = vld [vmem:[%s3682_s7 + $0x8] sm:$0xff]  ;;  %v731_v42 = vld [vmem:[%s3148_s21 + $0x40] sm:$0xff]  ;;  %v621_v44 = vld [vmem:[%s3143_s18 + $0x50] sm:$0xff] }
 0x160   : > { %2755 = vmatprep.subr.mxu1 %v1047_v28  ;;  %2781 = vmatprep.subr.mxu0 %v1259_v39  ;;  %v732_v41 = vld [vmem:[%s3148_s21 + $0x48] sm:$0xff]  ;;  %v734_v45 = vld [vmem:[%s3148_s21 + $0x58] sm:$0xff]  ;;  %v733_v46 = vld [vmem:[%s3148_s21 + $0x50] sm:$0xff] }
 0x161   : > { %637 = vperm.xlu1 %2967, %v614_v21   ;;  %634 = vperm.xlu0 %2966, %v613_v22   ;;  %v624_v47 = vld [vmem:[%s3143_s18 + $0x68] sm:$0xff]  ;;  %v623_v48 = vld [vmem:[%s3143_s18 + $0x60] sm:$0xff]  ;;  %v626_v51 = vld [vmem:[%s3143_s18 + $0x78] sm:$0xff] }
 0x162   : > { %2756 = vmatpush3.msra.mxu1 %v1047_v28  ;;  %v736_v49 = vld [vmem:[%s3148_s21 + $0x68] sm:$0xff]  ;;  %v735_v50 = vld [vmem:[%s3148_s21 + $0x60] sm:$0xff]  ;;  %v625_v52 = vld [vmem:[%s3143_s18 + $0x70] sm:$0xff] }
 0x163   : > { %2809 = vmatprep.subr.mxu1 %v1046_v40  ;;  %v738_v53 = vld [vmem:[%s3148_s21 + $0x78] sm:$0xff]  ;;  %v737_v54 = vld [vmem:[%s3148_s21 + $0x70] sm:$0xff]  ;;  %v1258_v2 = vld [vmem:[%s3682_s7] sm:$0xff]  ;;  %s3045_s21 = smov 32  }
 0x164   : > { %v1045_v3 = vld [vmem:[#allocation3] sm:$0xff] }
 0x165   : > { %749 = vperm.xlu1 %2967, %v726_v23   ;;  %746 = vperm.xlu0 %2966, %v725_v25  }
 0x169   : > { %643 = vperm.xlu1 %2967, %v616_v29   ;;  %640 = vperm.xlu0 %2966, %v615_v30  }
 0x16d   : > { %755 = vperm.xlu1 %2967, %v728_v31   ;;  %752 = vperm.xlu0 %2966, %v727_v32  }
 0x171   : > { %649 = vperm.xlu1 %2967, %v618_v33   ;;  %646 = vperm.xlu0 %2966, %v617_v34  }
 0x175   : > { %761 = vperm.xlu1 %2967, %v730_v35   ;;  %758 = vperm.xlu0 %2966, %v729_v36  }
 0x179   : > { %655 = vperm.xlu1 %2967, %v620_v37   ;;  %652 = vperm.xlu0 %2966, %v619_v38  }
 0x17d   : > { %767 = vperm.xlu1 %2967, %v732_v41   ;;  %764 = vperm.xlu0 %2966, %v731_v42  }
 0x181   : > { %661 = vperm.xlu1 %2967, %v622_v43   ;;  %658 = vperm.xlu0 %2966, %v621_v44  }
 0x185   : > { %773 = vperm.xlu1 %2967, %v734_v45   ;;  %770 = vperm.xlu0 %2966, %v733_v46  }
 0x189   : > { %667 = vperm.xlu1 %2967, %v624_v47   ;;  %664 = vperm.xlu0 %2966, %v623_v48  }
 0x18d   : > { %779 = vperm.xlu1 %2967, %v736_v49   ;;  %776 = vperm.xlu0 %2966, %v735_v50  }
 0x191   : > { %673 = vperm.xlu1 %2967, %v626_v51   ;;  %670 = vperm.xlu0 %2966, %v625_v52  }
 0x195   : > { %785 = vperm.xlu1 %2967, %v738_v53   ;;  %782 = vperm.xlu0 %2966, %v737_v54  }
 0x1d4   : > { %v741_v57 = vpop.permute.xlu1 %740  ;;  %v629_v58 = vpop.permute.xlu0 %628 }
 0x1d5   : > { %vm787_vm3 = vcmp.eq.s32.totalorder %v3221_v56, %v741_v57  ;;  %vm675_vm4 = vcmp.eq.s32.totalorder %v3221_v56, %v629_v58  ;;  %v1242_v58 = vld [vmem:[%s3153_s24] sm:$0xff] }
 0x1d6   : > { %v2433_v60 = vsel %vm675_vm4, 1.0, %v3044_v59  ;;  %v3227_v61 = vsel %vm787_vm3, 1.0, %v3044_v59 }
 0x1d7   : > { %2729 = vmatprep.mubr.msk.f32.mxu0 %vm851_vm2, %v2433_v60  ;;  %2757 = vmatprep.mubr.msk.f32.mxu1 %vm851_vm2, %v3227_v61 }
 0x1d8   : > { %v744_v62 = vpop.permute.xlu1 %743  ;;  %v632_v63 = vpop.permute.xlu0 %631 }
 0x1d9   : > { %vm788_vm5 = vcmp.eq.s32.totalorder %v3221_v56, %v744_v62  ;;  %vm676_vm6 = vcmp.eq.s32.totalorder %v3221_v56, %v632_v63  ;;  %v1243_v63 = vld [vmem:[%s3153_s24 + $0x8] sm:$0xff] }
 0x1da   : > { %v3235_v0 = vsel %vm788_vm5, 1.0, %v3044_v59  ;;  %v2434_v1 = vsel %vm676_vm6, 1.0, %v3044_v59 }
 0x1db   : > { %2730 = vmatmul.mubr.msk.f32.vlgmr.msra.gmra.mxu0 %vm851_vm2, %v2434_v1  ;;  %2758 = vmatmul.mubr.msk.f32.vlgmr.msra.gmra.mxu1 %vm851_vm2, %v3235_v0 }
 0x1dc   : > { %v638_v4 = vpop.permute.xlu1 %637  ;;  %v635_v5 = vpop.permute.xlu0 %634  ;;  %2782 = vmatpush3.msra.mxu0 %v1259_v39  ;;  %2810 = vmatpush3.msra.mxu1 %v1046_v40 }
 0x1dd   : > { %vm678_vm7 = vcmp.eq.s32.totalorder %v3221_v56, %v638_v4  ;;  %vm677_vm8 = vcmp.eq.s32.totalorder %v3221_v56, %v635_v5  ;;  %2783 = vmatprep.subr.mxu0 %v1258_v2  ;;  %2811 = vmatprep.subr.mxu1 %v1045_v3  ;;  %v1246_v4 = vld [vmem:[%s3153_s24 + $0x20] sm:$0xff]  ;;  %v1248_v5 = vld [vmem:[%s3153_s24 + $0x30] sm:$0xff] }
 0x1de   : > { %v2436_v6 = vsel %vm678_vm7, 1.0, %v3044_v59  ;;  %v2435_v7 = vsel %vm677_vm8, 1.0, %v3044_v59  ;;  %2784 = vmatpush3.msra.mxu0 %v1258_v2  ;;  %2812 = vmatpush3.msra.mxu1 %v1045_v3  ;;  %v1244_v3 = vld [vmem:[%s3153_s24 + $0x10] sm:$0xff] }
 0x1df   : > { %2732 = vmatprep.mubr.msk.f32.mxu0 %vm851_vm2, %v2435_v7  ;;  %v1252_v7 = vld [vmem:[%s3153_s24 + $0x50] sm:$0xff] }
 0x1e0   : > { %v750_v8 = vpop.permute.xlu1 %749  ;;  %v747_v9 = vpop.permute.xlu0 %746  ;;  %2733 = vmatmul.mubr.msk.f32.gmra.mxu0 %vm851_vm2, %v2436_v6  ;;  %v1251_v6 = vld [vmem:[%s3153_s24 + $0x48] sm:$0xff] }
 0x1e1   : > { %vm790_vm9 = vcmp.eq.s32.totalorder %v3221_v56, %v750_v8  ;;  %vm789_vm10 = vcmp.eq.s32.totalorder %v3221_v56, %v747_v9  ;;  %v1253_v8 = vld [vmem:[%s3153_s24 + $0x58] sm:$0xff]  ;;  %v1254_v9 = vld [vmem:[%s3153_s24 + $0x60] sm:$0xff] }
 0x1e2   : > { %v3253_v10 = vsel %vm790_vm9, 1.0, %v3044_v59  ;;  %v3256_v11 = vsel %vm789_vm10, 1.0, %v3044_v59 }
 0x1e3   : > { %2760 = vmatprep.mubr.msk.f32.mxu1 %vm851_vm2, %v3256_v11 }
 0x1e4   : > { %v644_v12 = vpop.permute.xlu1 %643  ;;  %v641_v13 = vpop.permute.xlu0 %640  ;;  %2761 = vmatmul.mubr.msk.f32.gmra.mxu1 %vm851_vm2, %v3253_v10 }
 0x1e5   : > { %vm680_vm11 = vcmp.eq.s32.totalorder %v3221_v56, %v644_v12  ;;  %vm679_vm12 = vcmp.eq.s32.totalorder %v3221_v56, %v641_v13  ;;  %v1257_v12 = vld [vmem:[%s3153_s24 + $0x78] sm:$0xff] }
 0x1e6   : > { %v2438_v14 = vsel %vm680_vm11, 1.0, %v3044_v59  ;;  %v2437_v15 = vsel %vm679_vm12, 1.0, %v3044_v59  ;;  %v1624_v13 = vld [vmem:[%s3686_s11 + $0x18] sm:$0xff] }
 0x1e7   : > { %2735 = vmatprep.mubr.msk.f32.mxu0 %vm851_vm2, %v2437_v15  ;;  %2837 = vmatprep.subr.mxu0 %v1624_v13  ;;  %v1622_v15 = vld [vmem:[%s3686_s11 + $0x8] sm:$0xff] }
 0x1e8   : > { %v756_v16 = vpop.permute.xlu1 %755  ;;  %v753_v17 = vpop.permute.xlu0 %752  ;;  %2736 = vmatmul.mubr.msk.f32.gmra.mxu0 %vm851_vm2, %v2438_v14  ;;  %v1623_v14 = vld [vmem:[%s3686_s11 + $0x10] sm:$0xff] }
 0x1e9   : > { %vm792_vm13 = vcmp.eq.s32.totalorder %v3221_v56, %v756_v16  ;;  %vm791_vm14 = vcmp.eq.s32.totalorder %v3221_v56, %v753_v17  ;;  %v1621_v16 = vld [vmem:[%s3686_s11] sm:$0xff] }
 0x1ea   : > { %v3271_v18 = vsel %vm792_vm13, 1.0, %v3044_v59  ;;  %v3274_v19 = vsel %vm791_vm14, 1.0, %v3044_v59  ;;  %v1851_v17 = vld [vmem:[%s3687_s12] sm:$0xff] }
 0x1eb   : > { %2763 = vmatprep.mubr.msk.f32.mxu1 %vm851_vm2, %v3274_v19  ;;  %2869 = vmatprep.subr.mxu1 %v1851_v17 }
 0x1ec   : > { %v650_v20 = vpop.permute.xlu1 %649  ;;  %v647_v21 = vpop.permute.xlu0 %646  ;;  %2764 = vmatmul.mubr.msk.f32.gmra.mxu1 %vm851_vm2, %v3271_v18 }
 0x1ed   : > { %vm682_vm15 = vcmp.eq.s32.totalorder %v3221_v56, %v650_v20  ;;  %vm681_vm0 = vcmp.eq.s32.totalorder %v3221_v56, %v647_v21 }
 0x1ee   : > { %v2440_v22 = vsel %vm682_vm15, 1.0, %v3044_v59  ;;  %v2439_v23 = vsel %vm681_vm0, 1.0, %v3044_v59 }
 0x1ef   : > { %2738 = vmatprep.mubr.msk.f32.mxu0 %vm851_vm2, %v2439_v23 }
 0x1f0   : > { %v762_v24 = vpop.permute.xlu1 %761  ;;  %v759_v25 = vpop.permute.xlu0 %758  ;;  %2739 = vmatmul.mubr.msk.f32.gmra.mxu0 %vm851_vm2, %v2440_v22 }
 0x1f1   : > { %vm794_vm1 = vcmp.eq.s32.totalorder %v3221_v56, %v762_v24  ;;  %vm793_vm3 = vcmp.eq.s32.totalorder %v3221_v56, %v759_v25 }
 0x1f2   : > { %v3289_v26 = vsel %vm794_vm1, 1.0, %v3044_v59  ;;  %v3292_v27 = vsel %vm793_vm3, 1.0, %v3044_v59 }
 0x1f3   : > { %2766 = vmatprep.mubr.msk.f32.mxu1 %vm851_vm2, %v3292_v27 }
 0x1f4   : > { %v656_v28 = vpop.permute.xlu1 %655  ;;  %v653_v29 = vpop.permute.xlu0 %652  ;;  %2767 = vmatmul.mubr.msk.f32.gmra.mxu1 %vm851_vm2, %v3289_v26 }
 0x1f5   : > { %vm684_vm4 = vcmp.eq.s32.totalorder %v3221_v56, %v656_v28  ;;  %vm683_vm5 = vcmp.eq.s32.totalorder %v3221_v56, %v653_v29 }
 0x1f6   : > { %v2442_v30 = vsel %vm684_vm4, 1.0, %v3044_v59  ;;  %v2441_v31 = vsel %vm683_vm5, 1.0, %v3044_v59  ;;  %vm1852_vm5 = vcmask 64512  }
 0x1f7   : > { %2741 = vmatprep.mubr.msk.f32.mxu0 %vm851_vm2, %v2441_v31 }
 0x1f8   : > { %v768_v32 = vpop.permute.xlu1 %767  ;;  %v765_v33 = vpop.permute.xlu0 %764  ;;  %2742 = vmatmul.mubr.msk.f32.gmra.mxu0 %vm851_vm2, %v2442_v30 }
 0x1f9   : > { %vm796_vm6 = vcmp.eq.s32.totalorder %v3221_v56, %v768_v32  ;;  %vm795_vm7 = vcmp.eq.s32.totalorder %v3221_v56, %v765_v33 }
 0x1fa   : > { %v3307_v34 = vsel %vm796_vm6, 1.0, %v3044_v59  ;;  %v3310_v35 = vsel %vm795_vm7, 1.0, %v3044_v59 }
 0x1fb   : > { %2769 = vmatprep.mubr.msk.f32.mxu1 %vm851_vm2, %v3310_v35 }
 0x1fc   : > { %v662_v36 = vpop.permute.xlu1 %661  ;;  %v659_v37 = vpop.permute.xlu0 %658  ;;  %2770 = vmatmul.mubr.msk.f32.gmra.mxu1 %vm851_vm2, %v3307_v34 }
 0x1fd   : > { %vm686_vm8 = vcmp.eq.s32.totalorder %v3221_v56, %v662_v36  ;;  %vm685_vm9 = vcmp.eq.s32.totalorder %v3221_v56, %v659_v37 }
 0x1fe   : > { %v2444_v38 = vsel %vm686_vm8, 1.0, %v3044_v59  ;;  %v2443_v39 = vsel %vm685_vm9, 1.0, %v3044_v59  ;;  %vm2221_vm8 = vcmask 523264  }
 0x1ff   : > { %2744 = vmatprep.mubr.msk.f32.mxu0 %vm851_vm2, %v2443_v39 }
 0x200   : > { %v774_v40 = vpop.permute.xlu1 %773  ;;  %v771_v41 = vpop.permute.xlu0 %770  ;;  %2745 = vmatmul.mubr.msk.f32.gmra.mxu0 %vm851_vm2, %v2444_v38 }
 0x201   : > { %vm798_vm10 = vcmp.eq.s32.totalorder %v3221_v56, %v774_v40  ;;  %vm797_vm11 = vcmp.eq.s32.totalorder %v3221_v56, %v771_v41 }
 0x202   : > { %v3325_v42 = vsel %vm798_vm10, 1.0, %v3044_v59  ;;  %v3328_v43 = vsel %vm797_vm11, 1.0, %v3044_v59 }
 0x203   : > { %2772 = vmatprep.mubr.msk.f32.mxu1 %vm851_vm2, %v3328_v43 }
 0x204   : > { %v668_v44 = vpop.permute.xlu1 %667  ;;  %v665_v45 = vpop.permute.xlu0 %664  ;;  %2773 = vmatmul.mubr.msk.f32.gmra.mxu1 %vm851_vm2, %v3325_v42 }
 0x205   : > { %vm688_vm12 = vcmp.eq.s32.totalorder %v3221_v56, %v668_v44  ;;  %vm687_vm13 = vcmp.eq.s32.totalorder %v3221_v56, %v665_v45 }
 0x206   : > { %v2446_v46 = vsel %vm688_vm12, 1.0, %v3044_v59  ;;  %v2445_v47 = vsel %vm687_vm13, 1.0, %v3044_v59 }
 0x207   : > { %2747 = vmatprep.mubr.msk.f32.mxu0 %vm851_vm2, %v2445_v47 }
 0x208   : > { %v780_v48 = vpop.permute.xlu1 %779  ;;  %v777_v49 = vpop.permute.xlu0 %776  ;;  %2748 = vmatmul.mubr.msk.f32.gmra.mxu0 %vm851_vm2, %v2446_v46 }
 0x209   : > { %vm800_vm14 = vcmp.eq.s32.totalorder %v3221_v56, %v780_v48  ;;  %vm799_vm15 = vcmp.eq.s32.totalorder %v3221_v56, %v777_v49  ;;  %v3492_v48 = vld [vmem:[%s3683_s8] ss:$0 sm:$0xff] }
 0x20a   : > { %v3343_v50 = vsel %vm800_vm14, 1.0, %v3044_v59  ;;  %v2461_v51 = vsel %vm799_vm15, 1.0, %v3044_v59 }
 0x20b   : > { %2775 = vmatprep.mubr.msk.f32.mxu1 %vm851_vm2, %v2461_v51 }
 0x20c   : > { %v674_v52 = vpop.permute.xlu1 %673  ;;  %v671_v53 = vpop.permute.xlu0 %670  ;;  %2776 = vmatmul.mubr.msk.f32.gmra.mxu1 %vm851_vm2, %v3343_v50 }
 0x20d   : > { %vm690_vm0 = vcmp.eq.s32.totalorder %v3221_v56, %v674_v52  ;;  %vm689_vm1 = vcmp.eq.s32.totalorder %v3221_v56, %v671_v53 }
 0x20e   : > { %v2448_v54 = vsel %vm690_vm0, 1.0, %v3044_v59  ;;  %v2447_v57 = vsel %vm689_vm1, 1.0, %v3044_v59 }
 0x20f   : > { %2750 = vmatprep.mubr.msk.f32.mxu0 %vm851_vm2, %v2447_v57 }
 0x210   : > { %v786_v60 = vpop.permute.xlu1 %785  ;;  %v783_v62 = vpop.permute.xlu0 %782  ;;  %2751 = vmatmul.mubr.msk.f32.gmra.mxu0 %vm851_vm2, %v2448_v54 }
 0x211   : > { %vm802_vm3 = vcmp.eq.s32.totalorder %v3221_v56, %v786_v60  ;;  %vm801_vm4 = vcmp.eq.s32.totalorder %v3221_v56, %v783_v62  ;;  %2785 = vmatprep.mubr.msk.f32.mxu0 %vm851_vm2, %v1242_v58  ;;  %v1245_v56 = vld [vmem:[%s3153_s24 + $0x18] sm:$0xff] }
 0x212   : > { %v2464_v1 = vsel %vm802_vm3, 1.0, %v3044_v59  ;;  %v2463_v2 = vsel %vm801_vm4, 1.0, %v3044_v59  ;;  %v1247_v59 = vld [vmem:[%s3153_s24 + $0x28] sm:$0xff] }
 0x213   : > { %2778 = vmatprep.mubr.msk.f32.mxu1 %vm851_vm2, %v2463_v2 }
 0x214   : > { %2779 = vmatmul.mubr.msk.f32.gmra.mxu1 %vm851_vm2, %v2464_v1  ;;  %2786 = vmatmul.mubr.msk.f32.vlgmr.msra.gmra.mxu0 %vm851_vm2, %v1243_v63 }
 0x215   : > { %2813 = vmatprep.mubr.msk.f32.mxu1 %vm851_vm2, %v3227_v61  ;;  %2788 = vmatprep.mubr.msk.f32.mxu0 %vm851_vm2, %v1244_v3  ;;  %v1249_v61 = vld [vmem:[%s3153_s24 + $0x38] sm:$0xff] }
 0x216   : > { %2838 = vmatpush3.msra.mxu0 %v1624_v13 }
 0x217   : > { %2839 = vmatprep.subr.mxu0 %v1623_v14 }
 0x218   : > { %2789 = vmatmul.mubr.msk.f32.gmra.mxu0 %vm851_vm2, %v1245_v56  ;;  %2814 = vmatmul.mubr.msk.f32.vlgmr.msra.gmra.mxu1 %vm851_vm2, %v3235_v0  ;;  %v1250_v0 = vld [vmem:[%s3153_s24 + $0x40] sm:$0xff] }
 0x219   : > { %2816 = vmatprep.mubr.msk.f32.mxu1 %vm851_vm2, %v3256_v11  ;;  %2791 = vmatprep.mubr.msk.f32.mxu0 %vm851_vm2, %v1246_v4  ;;  %v1256_v11 = vld [vmem:[%s3153_s24 + $0x70] sm:$0xff] }
 0x21a   : > { %2840 = vmatpush3.msra.mxu0 %v1623_v14  ;;  %2870 = vmatpush3.msra.mxu1 %v1851_v17 }
 0x21b   : > { %2841 = vmatprep.subr.mxu0 %v1622_v15 }
 0x21c   : > { %2792 = vmatmul.mubr.msk.f32.gmra.mxu0 %vm851_vm2, %v1247_v59  ;;  %2817 = vmatmul.mubr.msk.f32.gmra.mxu1 %vm851_vm2, %v3253_v10  ;;  %v1255_v10 = vld [vmem:[%s3153_s24 + $0x68] sm:$0xff] }
 0x21d   : > { %2819 = vmatprep.mubr.msk.f32.mxu1 %vm851_vm2, %v3274_v19  ;;  %2794 = vmatprep.mubr.msk.f32.mxu0 %vm851_vm2, %v1248_v5 }
 0x21e   : > { %2842 = vmatpush3.msra.mxu0 %v1622_v15 }
 0x21f   : > { %2843 = vmatprep.subr.mxu0 %v1621_v16 }
 0x220   : > { %2795 = vmatmul.mubr.msk.f32.gmra.mxu0 %vm851_vm2, %v1249_v61  ;;  %2820 = vmatmul.mubr.msk.f32.gmra.mxu1 %vm851_vm2, %v3271_v18 }
 0x221   : > { %2822 = vmatprep.mubr.msk.f32.mxu1 %vm851_vm2, %v3292_v27  ;;  %2797 = vmatprep.mubr.msk.f32.mxu0 %vm851_vm2, %v1250_v0 }
 0x222   : > { %2844 = vmatpush3.msra.mxu0 %v1621_v16 }
 0x224   : > { %2798 = vmatmul.mubr.msk.f32.gmra.mxu0 %vm851_vm2, %v1251_v6  ;;  %2823 = vmatmul.mubr.msk.f32.gmra.mxu1 %vm851_vm2, %v3289_v26 }
 0x225   : > { %2825 = vmatprep.mubr.msk.f32.mxu1 %vm851_vm2, %v3310_v35  ;;  %2800 = vmatprep.mubr.msk.f32.mxu0 %vm851_vm2, %v1252_v7 }
 0x228   : > { %2801 = vmatmul.mubr.msk.f32.gmra.mxu0 %vm851_vm2, %v1253_v8  ;;  %2826 = vmatmul.mubr.msk.f32.gmra.mxu1 %vm851_vm2, %v3307_v34 }
 0x229   : > { %2828 = vmatprep.mubr.msk.f32.mxu1 %vm851_vm2, %v3328_v43  ;;  %2803 = vmatprep.mubr.msk.f32.mxu0 %vm851_vm2, %v1254_v9 }
 0x22c   : > { %2804 = vmatmul.mubr.msk.f32.gmra.mxu0 %vm851_vm2, %v1255_v10  ;;  %2829 = vmatmul.mubr.msk.f32.gmra.mxu1 %vm851_vm2, %v3325_v42 }
 0x22d   : > { %2831 = vmatprep.mubr.msk.f32.mxu1 %vm851_vm2, %v2461_v51  ;;  %2806 = vmatprep.mubr.msk.f32.mxu0 %vm851_vm2, %v1256_v11 }
 0x230   : > { %2807 = vmatmul.mubr.msk.f32.gmra.mxu0 %vm851_vm2, %v1257_v12  ;;  %2832 = vmatmul.mubr.msk.f32.gmra.mxu1 %vm851_vm2, %v3343_v50 }
 0x231   : > { %2834 = vmatprep.mubr.msk.f32.mxu1 %vm851_vm2, %v2463_v2 }
 0x234   : > { %2835 = vmatmul.mubr.msk.f32.gmra.mxu1 %vm851_vm2, %v2464_v1  ;;  %vm1625_vm2 = vcmask 261120  }
 0x29b   : > { %v2731_v18 = vpop.f32.mrf.mxu0  ;;  %v3437_v20 = vpop.f32.mrf.mxu1 }
 0x29d   : > { %v966_v19 = vpop.f32.mrf.mxu0  ;;  %v3439_v22 = vpop.f32.mrf.mxu1 }
 0x2a0   : > { %v2734_v21 = vpop.f32.mrf.mxu0 }
 0x2a2   : > { %v976_v23 = vpop.f32.mrf.mxu0 }
 0x2a4   : > { %v3441_v24 = vpop.f32.mrf.mxu1 }
 0x2a6   : > { %v3445_v26 = vpop.f32.mrf.mxu1 }
 0x2a8   : > { %v3443_v25 = vpop.f32.mrf.mxu0 }
 0x2aa   : > { %v3447_v27 = vpop.f32.mrf.mxu0 }
 0x2ac   : > { %v3449_v28 = vpop.f32.mrf.mxu1 }
 0x2ae   : > { %v3453_v30 = vpop.f32.mrf.mxu1 }
 0x2b0   : > { %v3451_v29 = vpop.f32.mrf.mxu0 }
 0x2b2   : > { %v3455_v31 = vpop.f32.mrf.mxu0 }
 0x2b4   : > { %v3457_v32 = vpop.f32.mrf.mxu1 }
 0x2b6   : > { %v3461_v34 = vpop.f32.mrf.mxu1 }
 0x2b8   : > { %v3459_v33 = vpop.f32.mrf.mxu0 }
 0x2ba   : > { %v3463_v35 = vpop.f32.mrf.mxu0 }
 0x2bc   : > { %v3465_v36 = vpop.f32.mrf.mxu1 }
 0x2be   : > { %v3469_v38 = vpop.f32.mrf.mxu1 }
 0x2c0   : > { %v3467_v37 = vpop.f32.mrf.mxu0 }
 0x2c2   : > { %v3471_v39 = vpop.f32.mrf.mxu0 }
 0x2c4   : > { %v3473_v40 = vpop.f32.mrf.mxu1 }
 0x2c6   : > { %v3477_v42 = vpop.f32.mrf.mxu1 }
 0x2c8   : > { %v3475_v41 = vpop.f32.mrf.mxu0 }
 0x2ca   : > { %v3479_v43 = vpop.f32.mrf.mxu0 }
 0x2cc   : > { %v3481_v44 = vpop.f32.mrf.mxu1 }
 0x2ce   : > { %v3485_v46 = vpop.f32.mrf.mxu1 }
 0x2d0   : > { %v3483_v45 = vpop.f32.mrf.mxu0 }
 0x2d2   : > { %v3487_v47 = vpop.f32.mrf.mxu0 }
 0x2d4   : > { %v3494_v49 = vpop.f32.mrf.mxu1  ;;  %v2787_v50 = vpop.f32.mrf.mxu0 }
 0x2d5   : > { %v1387_v51 = vadd.f32 %v2787_v50, %v3492_v48 }
 0x2d6   : > { %v3497_v52 = vpop.f32.mrf.mxu1  ;;  %v1381_v53 = vpop.f32.mrf.mxu0 }
 0x2d7   : > { %v1382_v58 = vadd.f32 %v3492_v48, %v1381_v53 }
 0x2d8   : > { %v2790_v54 = vpop.f32.mrf.mxu0  ;;  %v2815_v57 = vpop.f32.mrf.mxu1 }
 0x2d9   : > { %v1397_v60 = vadd.f32 %v2790_v54, %v3492_v48  ;;  %v1532_v62 = vadd.f32 %v2815_v57, %v1387_v51 }
 0x2da   : > { %v1391_v63 = vpop.f32.mrf.mxu0  ;;  %v1526_v1 = vpop.f32.mrf.mxu1 }
 0x2db   : > { %v1527_v2 = vadd.f32 %v1526_v1, %v1382_v58  ;;  %v1392_v4 = vadd.f32 %v3492_v48, %v1391_v63  ;;  %v1606_v5 = vmul.f32 %v2731_v18, %v1532_v62 }
 0x2dc   : > { %v2793_v3 = vpop.f32.mrf.mxu0  ;;  %v2818_v56 = vpop.f32.mrf.mxu1 }
 0x2dd   : > { %v1605_v59 = vmul.f32 %v1527_v2, %v966_v19  ;;  %v1407_v61 = vadd.f32 %v2793_v3, %v3492_v48  ;;  %v1542_v0 = vadd.f32 %v2818_v56, %v1397_v60 }
 0x2de   : > { %v1401_v6 = vpop.f32.mrf.mxu0  ;;  %v1536_v7 = vpop.f32.mrf.mxu1 }
 0x2df   : > { %v1537_v8 = vadd.f32 %v1536_v7, %v1392_v4  ;;  %2845 = vmatprep.mubr.msk.f32.mxu0 %vm1625_vm2, %v1605_v59  ;;  %v1402_v11 = vadd.f32 %v3492_v48, %v1401_v6  ;;  %v1608_v13 = vmul.f32 %v2734_v21, %v1542_v0 }
 0x2e0   : > { %v2796_v9 = vpop.f32.mrf.mxu0  ;;  %v2821_v10 = vpop.f32.mrf.mxu1  ;;  %2846 = vmatmul.mubr.msk.f32.vlgmr.msra.gmra.mxu0 %vm1625_vm2, %v1606_v5 }
 0x2e1   : > { %v1607_v12 = vmul.f32 %v1537_v8, %v976_v23  ;;  %v1417_v14 = vadd.f32 %v2796_v9, %v3492_v48  ;;  %v1552_v15 = vadd.f32 %v2821_v10, %v1407_v61 }
 0x2e2   : > { %v1411_v16 = vpop.f32.mrf.mxu0  ;;  %v1546_v17 = vpop.f32.mrf.mxu1 }
 0x2e3   : > { %v1547_v18 = vadd.f32 %v1546_v17, %v1402_v11  ;;  %2848 = vmatprep.mubr.msk.f32.mxu0 %vm1625_vm2, %v1607_v12  ;;  %v1412_v51 = vadd.f32 %v3492_v48, %v1411_v16  ;;  %v1610_v54 = vmul.f32 %v3443_v25, %v1552_v15 }
 0x2e4   : > { %v2799_v19 = vpop.f32.mrf.mxu0  ;;  %v2824_v50 = vpop.f32.mrf.mxu1  ;;  %2849 = vmatmul.mubr.msk.f32.gmra.mxu0 %vm1625_vm2, %v1608_v13 }
 0x2e5   : > { %v1609_v53 = vmul.f32 %v1547_v18, %v3447_v27  ;;  %v1427_v21 = vadd.f32 %v2799_v19, %v3492_v48  ;;  %v1562_v23 = vadd.f32 %v2824_v50, %v1417_v14 }
 0x2e6   : > { %v1421_v57 = vpop.f32.mrf.mxu0  ;;  %v1556_v58 = vpop.f32.mrf.mxu1 }
 0x2e7   : > { %v1557_v60 = vadd.f32 %v1556_v58, %v1412_v51  ;;  %2851 = vmatprep.mubr.msk.f32.mxu0 %vm1625_vm2, %v1609_v53  ;;  %v1422_v1 = vadd.f32 %v3492_v48, %v1421_v57  ;;  %v1612_v27 = vmul.f32 %v3451_v29, %v1562_v23 }
 0x2e8   : > { %v2802_v62 = vpop.f32.mrf.mxu0  ;;  %v2827_v63 = vpop.f32.mrf.mxu1  ;;  %2852 = vmatmul.mubr.msk.f32.gmra.mxu0 %vm1625_vm2, %v1610_v54 }
 0x2e9   : > { %v1611_v2 = vmul.f32 %v1557_v60, %v3455_v31  ;;  %v1437_v25 = vadd.f32 %v2802_v62, %v3492_v48  ;;  %v1572_v3 = vadd.f32 %v2827_v63, %v1427_v21 }
 0x2ea   : > { %v1431_v56 = vpop.f32.mrf.mxu0  ;;  %v1566_v4 = vpop.f32.mrf.mxu1 }
 0x2eb   : > { %v1567_v59 = vadd.f32 %v1566_v4, %v1422_v1  ;;  %2854 = vmatprep.mubr.msk.f32.mxu0 %vm1625_vm2, %v1611_v2  ;;  %v1432_v0 = vadd.f32 %v3492_v48, %v1431_v56  ;;  %v1614_v31 = vmul.f32 %v3459_v33, %v1572_v3 }
 0x2ec   : > { %v2805_v5 = vpop.f32.mrf.mxu0  ;;  %v2830_v61 = vpop.f32.mrf.mxu1  ;;  %2855 = vmatmul.mubr.msk.f32.gmra.mxu0 %vm1625_vm2, %v1612_v27 }
 0x2ed   : > { %v1613_v6 = vmul.f32 %v1567_v59, %v3463_v35  ;;  %v1447_v29 = vadd.f32 %v2805_v5, %v3492_v48  ;;  %v1582_v7 = vadd.f32 %v2830_v61, %v1437_v25 }
 0x2ee   : > { %v1441_v8 = vpop.f32.mrf.mxu0  ;;  %v1576_v9 = vpop.f32.mrf.mxu1 }
 0x2ef   : > { %v1577_v10 = vadd.f32 %v1576_v9, %v1432_v0  ;;  %2857 = vmatprep.mubr.msk.f32.mxu0 %vm1625_vm2, %v1613_v6  ;;  %v1442_v13 = vadd.f32 %v3492_v48, %v1441_v8  ;;  %v1616_v35 = vmul.f32 %v3467_v37, %v1582_v7 }
 0x2f0   : > { %v2808_v11 = vpop.f32.mrf.mxu0  ;;  %v2833_v12 = vpop.f32.mrf.mxu1  ;;  %2858 = vmatmul.mubr.msk.f32.gmra.mxu0 %vm1625_vm2, %v1614_v31 }
 0x2f1   : > { %v1615_v14 = vmul.f32 %v1577_v10, %v3471_v39  ;;  %v1457_v33 = vadd.f32 %v2808_v11, %v3492_v48  ;;  %v1592_v15 = vadd.f32 %v2833_v12, %v1447_v29 }
 0x2f2   : > { %v1451_v16 = vpop.f32.mrf.mxu0  ;;  %v1586_v17 = vpop.f32.mrf.mxu1 }
 0x2f3   : > { %v1587_v18 = vadd.f32 %v1586_v17, %v1442_v13  ;;  %2860 = vmatprep.mubr.msk.f32.mxu0 %vm1625_vm2, %v1615_v14  ;;  %v1452_v50 = vadd.f32 %v3492_v48, %v1451_v16  ;;  %v1618_v53 = vmul.f32 %v3475_v41, %v1592_v15 }
 0x2f4   : > { %v2836_v19 = vpop.f32.mrf.mxu1  ;;  %2861 = vmatmul.mubr.msk.f32.gmra.mxu0 %vm1625_vm2, %v1616_v35 }
 0x2f5   : > { %v1617_v51 = vmul.f32 %v1587_v18, %v3479_v43  ;;  %v1602_v39 = vadd.f32 %v2836_v19, %v1457_v33 }
 0x2f6   : > { %v1596_v54 = vpop.f32.mrf.mxu1 }
 0x2f7   : > { %v1597_v37 = vadd.f32 %v1596_v54, %v1452_v50  ;;  %2863 = vmatprep.mubr.msk.f32.mxu0 %vm1625_vm2, %v1617_v51  ;;  %v1620_v23 = vmul.f32 %v3483_v45, %v1602_v39 }
 0x2f8   : > { %2864 = vmatmul.mubr.msk.f32.gmra.mxu0 %vm1625_vm2, %v1618_v53 }
 0x2f9   : > { %v1619_v21 = vmul.f32 %v1597_v37, %v3487_v47 }
 0x2fb   : > { %2866 = vmatprep.mubr.msk.f32.mxu0 %vm1625_vm2, %v1619_v21 }
 0x2fc   : > { %2867 = vmatmul.mubr.msk.f32.gmra.mxu0 %vm1625_vm2, %v1620_v23 }
 0x3a0   : > { %v2847_v48 = vpop.f32.mrf.mxu0 }
 0x3a1   : > { %v1821_v57 = vmul.f32 1.442695, %v2847_v48 }
 0x3a2   : > { %v1740_v43 = vpop.f32.mrf.mxu0 }
 0x3a3   : > { %v1819_v58 = vmul.f32 1.442695, %v1740_v43 }
 0x3a4   : > { %v2850_v41 = vpop.f32.mrf.mxu0 }
 0x3a5   : > { %2968 = vpow2.f32 %v1819_v58  ;;  %v1825_v60 = vmul.f32 1.442695, %v2850_v41 }
 0x3a6   : > { %2970 = vpow2.f32 %v1821_v57  ;;  %v1750_v62 = vpop.f32.mrf.mxu0 }
 0x3a7   : > { %v1823_v63 = vmul.f32 1.442695, %v1750_v62 }
 0x3a8   : > { %v2853_v1 = vpop.f32.mrf.mxu0 }
 0x3a9   : > { %2972 = vpow2.f32 %v1823_v63  ;;  %v1829_v47 = vmul.f32 1.442695, %v2853_v1 }
 0x3aa   : > { %2974 = vpow2.f32 %v1825_v60  ;;  %v1760_v2 = vpop.f32.mrf.mxu0 }
 0x3ab   : > { %v1827_v45 = vmul.f32 1.442695, %v1760_v2 }
 0x3ac   : > { %v2856_v27 = vpop.f32.mrf.mxu0 }
 0x3ad   : > { %2976 = vpow2.f32 %v1827_v45  ;;  %v1833_v25 = vmul.f32 1.442695, %v2856_v27 }
 0x3ae   : > { %2978 = vpow2.f32 %v1829_v47  ;;  %v1770_v3 = vpop.f32.mrf.mxu0 }
 0x3af   : > { %v1831_v56 = vmul.f32 1.442695, %v1770_v3 }
 0x3b0   : > { %v2859_v4 = vpop.f32.mrf.mxu0 }
 0x3b1   : > { %2980 = vpow2.f32 %v1831_v56  ;;  %v1837_v5 = vmul.f32 1.442695, %v2859_v4 }
 0x3b2   : > { %v2969_v59 = vpop.eup %2968  ;;  %2982 = vpow2.f32 %v1833_v25  ;;  %v1780_v61 = vpop.f32.mrf.mxu0 }
 0x3b3   : > { %v2971_v0 = vpop.eup %2970  ;;  %v1835_v6 = vmul.f32 1.442695, %v1780_v61  ;;  %2871 = vmatprep.mubr.msk.f32.mxu1 %vm1852_vm5, %v2969_v59  ;;  %v836_v59 = vshrl.u32 %v609_v55, 7  ;;  %v3583_v61 = vld [vmem:[%s474_s14] ss:$0 sm:$0xff] }
 0x3b4   : > { %v2862_v31 = vpop.f32.mrf.mxu0  ;;  %2872 = vmatmul.mubr.msk.f32.vlgmr.msra.gmra.mxu1 %vm1852_vm5, %v2971_v0  ;;  %v3046_v0 = vmov 1.0  }
 0x3b5   : > { %2984 = vpow2.f32 %v1835_v6  ;;  %v1841_v7 = vmul.f32 1.442695, %v2862_v31  ;;  %vm843_vm6 = vcmp.eq.s32.totalorder %v836_v59, %v3583_v61 }
 0x3b6   : > { %v2973_v29 = vpop.eup %2972  ;;  %2986 = vpow2.f32 %v1837_v5  ;;  %v1790_v8 = vpop.f32.mrf.mxu0  ;;  %v3576_v5 = vadd.s32 8, %v836_v59  ;;  %2927 = vmatprep.mubr.msk.f32.mxu0 %vm843_vm6, %v3046_v0 }
 0x3b7   : > { %v2975_v9 = vpop.eup %2974  ;;  %v1839_v10 = vmul.f32 1.442695, %v1790_v8  ;;  %2874 = vmatprep.mubr.msk.f32.mxu1 %vm1852_vm5, %v2973_v29 }
 0x3b8   : > { %v2865_v11 = vpop.f32.mrf.mxu0  ;;  %2875 = vmatmul.mubr.msk.f32.gmra.mxu1 %vm1852_vm5, %v2975_v9  ;;  %vm844_vm7 = vcmp.eq.s32.totalorder %v3576_v5, %v3583_v61 }
 0x3b9   : > { %2988 = vpow2.f32 %v1839_v10  ;;  %v1845_v13 = vmul.f32 1.442695, %v2865_v11 }
 0x3ba   : > { %v2977_v12 = vpop.eup %2976  ;;  %2990 = vpow2.f32 %v1841_v7  ;;  %v1800_v14 = vpop.f32.mrf.mxu0 }
 0x3bb   : > { %v2979_v35 = vpop.eup %2978  ;;  %v1843_v33 = vmul.f32 1.442695, %v1800_v14  ;;  %2877 = vmatprep.mubr.msk.f32.mxu1 %vm1852_vm5, %v2977_v12 }
 0x3bc   : > { %v2868_v15 = vpop.f32.mrf.mxu0  ;;  %2878 = vmatmul.mubr.msk.f32.gmra.mxu1 %vm1852_vm5, %v2979_v35 }
 0x3bd   : > { %2992 = vpow2.f32 %v1843_v33  ;;  %v1849_v17 = vmul.f32 1.442695, %v2868_v15 }
 0x3be   : > { %v2981_v16 = vpop.eup %2980  ;;  %2994 = vpow2.f32 %v1845_v13  ;;  %v1810_v18 = vpop.f32.mrf.mxu0 }
 0x3bf   : > { %v2983_v19 = vpop.eup %2982  ;;  %v1847_v50 = vmul.f32 1.442695, %v1810_v18  ;;  %2880 = vmatprep.mubr.msk.f32.mxu1 %vm1852_vm5, %v2981_v16 }
 0x3c0   : > { %2881 = vmatmul.mubr.msk.f32.gmra.mxu1 %vm1852_vm5, %v2983_v19 }
 0x3c1   : > { %2996 = vpow2.f32 %v1847_v50 }
 0x3c2   : > { %v2985_v51 = vpop.eup %2984  ;;  %2998 = vpow2.f32 %v1849_v17 }
 0x3c3   : > { %v2987_v53 = vpop.eup %2986  ;;  %2883 = vmatprep.mubr.msk.f32.mxu1 %vm1852_vm5, %v2985_v51 }
 0x3c4   : > { %2884 = vmatmul.mubr.msk.f32.gmra.mxu1 %vm1852_vm5, %v2987_v53 }
 0x3c6   : > { %v2989_v39 = vpop.eup %2988 }
 0x3c7   : > { %v2991_v54 = vpop.eup %2990  ;;  %2886 = vmatprep.mubr.msk.f32.mxu1 %vm1852_vm5, %v2989_v39 }
 0x3c8   : > { %2887 = vmatmul.mubr.msk.f32.gmra.mxu1 %vm1852_vm5, %v2991_v54 }
 0x3ca   : > { %v2993_v37 = vpop.eup %2992 }
 0x3cb   : > { %v2995_v21 = vpop.eup %2994  ;;  %2889 = vmatprep.mubr.msk.f32.mxu1 %vm1852_vm5, %v2993_v37 }
 0x3cc   : > { %2890 = vmatmul.mubr.msk.f32.gmra.mxu1 %vm1852_vm5, %v2995_v21 }
 0x3ce   : > { %v2997_v23 = vpop.eup %2996 }
 0x3cf   : > { %v2999_v48 = vpop.eup %2998  ;;  %2892 = vmatprep.mubr.msk.f32.mxu1 %vm1852_vm5, %v2997_v23 }
 0x3d0   : > { %2893 = vmatmul.mubr.msk.f32.gmra.mxu1 %vm1852_vm5, %v2999_v48 }
 0x474   : > { %v3558_v57 = vpop.f32.mrf.mxu1 }
 0x476   : > { %v3560_v43 = vpop.f32.mrf.mxu1 }
 0x478   : > { %v3562_v58 = vpop.f32.mrf.mxu1 }
 0x479   : > { %v2049_v21 = vmul.f32 %v3562_v58, %v3441_v24 }
 0x47a   : > { %v3564_v41 = vpop.f32.mrf.mxu1 }
 0x47b   : > { %v2048_v48 = vmul.f32 %v3564_v41, %v3445_v26 }
 0x47c   : > { %v3566_v60 = vpop.f32.mrf.mxu1 }
 0x47d   : > { %v2051_v53 = vmul.f32 %v3566_v60, %v3449_v28 }
 0x47e   : > { %v3568_v62 = vpop.f32.mrf.mxu1 }
 0x47f   : > { %v2050_v54 = vmul.f32 %v3568_v62, %v3453_v30 }
 0x480   : > { %v3570_v63 = vpop.f32.mrf.mxu1 }
 0x482   : > { %v3572_v1 = vpop.f32.mrf.mxu1 }
 0x484   : > { %v2885_v47 = vpop.f32.mrf.mxu1 }
 0x486   : > { %v2007_v2 = vpop.f32.mrf.mxu1 }
 0x488   : > { %v2888_v45 = vpop.f32.mrf.mxu1 }
 0x48a   : > { %v2017_v27 = vpop.f32.mrf.mxu1 }
 0x48c   : > { %v2891_v25 = vpop.f32.mrf.mxu1 }
 0x48d   : > { %v2059_v8 = vmul.f32 %v2891_v25, %v3481_v44  ;;  %v2056_v44 = vmul.f32 %v2017_v27, %v3477_v42  ;;  %v2053_v42 = vmul.f32 %v3570_v63, %v3457_v32 }
 0x48e   : > { %v2027_v3 = vpop.f32.mrf.mxu1 }
 0x48f   : > { %v2058_v11 = vmul.f32 %v2027_v3, %v3485_v46  ;;  %v2055_v46 = vmul.f32 %v2885_v47, %v3465_v36  ;;  %v2052_v36 = vmul.f32 %v3572_v1, %v3461_v34 }
 0x490   : > { %v2894_v56 = vpop.f32.mrf.mxu1 }
 0x491   : > { %2108 = vrot.lane.b32.xlu0 %v2894_v56, %s3045_s21  ;;  %v2061_v55 = vmul.f32 %v2894_v56, %v3494_v49 }
 0x492   : > { %v2037_v4 = vpop.f32.mrf.mxu1 }
 0x493   : > { %2106 = vrot.lane.b32.xlu1 %v2037_v4, %s3045_s21  ;;  %v2060_v31 = vmul.f32 %v2037_v4, %v3497_v52  ;;  %v2057_v52 = vmul.f32 %v2888_v45, %v3473_v40  ;;  %v2054_v40 = vmul.f32 %v2007_v2, %v3469_v38 }
 0x495   : > { %2104 = vrot.lane.b32.xlu0 %v2891_v25, %s3045_s21 }
 0x497   : > { %2102 = vrot.lane.b32.xlu1 %v2027_v3, %s3045_s21 }
 0x499   : > { %2100 = vrot.lane.b32.xlu0 %v2888_v45, %s3045_s21 }
 0x49b   : > { %2098 = vrot.lane.b32.xlu1 %v2017_v27, %s3045_s21 }
 0x49d   : > { %2096 = vrot.lane.b32.xlu0 %v2885_v47, %s3045_s21  ;;  %v2142_v47 = vld [vmem:[#allocation5] sm:$0xff] }
 0x49f   : > { %2094 = vrot.lane.b32.xlu1 %v2007_v2, %s3045_s21 }
 0x4a1   : > { %2092 = vrot.lane.b32.xlu0 %v3570_v63, %s3045_s21 }
 0x4a3   : > { %2090 = vrot.lane.b32.xlu1 %v3572_v1, %s3045_s21 }
 0x4a5   : > { %2088 = vrot.lane.b32.xlu0 %v3566_v60, %s3045_s21 }
 0x4a7   : > { %2086 = vrot.lane.b32.xlu1 %v3568_v62, %s3045_s21  ;;  %v2047_v62 = vmul.f32 %v3558_v57, %v3437_v20  ;;  %v2143_v20 = vld [vmem:[#allocation5 + $0x8] sm:$0xff] }
 0x4a9   : > { %2084 = vrot.lane.b32.xlu0 %v3562_v58, %s3045_s21  ;;  %v2046_v58 = vmul.f32 %v3560_v43, %v3439_v22 }
 0x4ab   : > { %2082 = vrot.lane.b32.xlu1 %v3564_v41, %s3045_s21 }
 0x4ad   : > { %2080 = vrot.lane.b32.xlu0 %v3558_v57, %s3045_s21 }
 0x4af   : > { %2078 = vrot.lane.b32.xlu1 %v3560_v43, %s3045_s21 }
 0x503   : > { %v2109_v6 = vpop.permute.xlu0 %2108 }
 0x504   : > { %v2141_v29 = vsel %vm1625_vm2, %v2061_v55, %v2109_v6 }
 0x505   : > { %2895 = vmatprep.subr.mxu0 %v2141_v29  ;;  %v2107_v7 = vpop.permute.xlu1 %2106 }
 0x506   : > { %2896 = vmatpush3.msra.mxu0 %v2141_v29  ;;  %v2140_v9 = vsel %vm1625_vm2, %v2060_v31, %v2107_v7 }
 0x507   : > { %v2105_v10 = vpop.permute.xlu0 %2104  ;;  %2897 = vmatprep.subr.mxu0 %v2140_v9 }
 0x508   : > { %2898 = vmatpush3.msra.mxu0 %v2140_v9  ;;  %v2139_v12 = vsel %vm1625_vm2, %v2059_v8, %v2105_v10 }
 0x509   : > { %v2103_v49 = vpop.permute.xlu1 %2102  ;;  %2899 = vmatprep.subr.mxu0 %v2139_v12 }
 0x50a   : > { %2900 = vmatpush3.msra.mxu0 %v2139_v12  ;;  %v2138_v13 = vsel %vm1625_vm2, %v2058_v11, %v2103_v49 }
 0x50b   : > { %v2101_v14 = vpop.permute.xlu0 %2100  ;;  %2901 = vmatprep.subr.mxu0 %v2138_v13 }
 0x50c   : > { %2902 = vmatpush3.msra.mxu0 %v2138_v13  ;;  %v2137_v35 = vsel %vm1625_vm2, %v2057_v52, %v2101_v14 }
 0x50d   : > { %v2099_v33 = vpop.permute.xlu1 %2098  ;;  %2903 = vmatprep.subr.mxu0 %v2137_v35 }
 0x50e   : > { %2904 = vmatpush3.msra.mxu0 %v2137_v35  ;;  %v2136_v15 = vsel %vm1625_vm2, %v2056_v44, %v2099_v33 }
 0x50f   : > { %v2097_v16 = vpop.permute.xlu0 %2096  ;;  %2905 = vmatprep.subr.mxu0 %v2136_v15 }
 0x510   : > { %2906 = vmatpush3.msra.mxu0 %v2136_v15  ;;  %v2135_v17 = vsel %vm1625_vm2, %v2055_v46, %v2097_v16 }
 0x511   : > { %v2095_v18 = vpop.permute.xlu1 %2094  ;;  %2907 = vmatprep.subr.mxu0 %v2135_v17 }
 0x512   : > { %2908 = vmatpush3.msra.mxu0 %v2135_v17  ;;  %v2134_v19 = vsel %vm1625_vm2, %v2054_v40, %v2095_v18 }
 0x513   : > { %v2093_v50 = vpop.permute.xlu0 %2092  ;;  %2909 = vmatprep.subr.mxu0 %v2134_v19 }
 0x514   : > { %2910 = vmatpush3.msra.mxu0 %v2134_v19  ;;  %v2133_v51 = vsel %vm1625_vm2, %v2053_v42, %v2093_v50 }
 0x515   : > { %v2091_v38 = vpop.permute.xlu1 %2090  ;;  %2911 = vmatprep.subr.mxu0 %v2133_v51 }
 0x516   : > { %2912 = vmatpush3.msra.mxu0 %v2133_v51  ;;  %v2132_v39 = vsel %vm1625_vm2, %v2052_v36, %v2091_v38 }
 0x517   : > { %v2089_v32 = vpop.permute.xlu0 %2088  ;;  %2913 = vmatprep.subr.mxu0 %v2132_v39 }
 0x518   : > { %2914 = vmatpush3.msra.mxu0 %v2132_v39  ;;  %v2131_v37 = vsel %vm1625_vm2, %v2051_v53, %v2089_v32 }
 0x519   : > { %v2087_v34 = vpop.permute.xlu1 %2086  ;;  %2915 = vmatprep.subr.mxu0 %v2131_v37 }
 0x51a   : > { %2916 = vmatpush3.msra.mxu0 %v2131_v37  ;;  %v2130_v23 = vsel %vm1625_vm2, %v2050_v54, %v2087_v34 }
 0x51b   : > { %v2085_v28 = vpop.permute.xlu0 %2084  ;;  %2917 = vmatprep.subr.mxu0 %v2130_v23 }
 0x51c   : > { %2918 = vmatpush3.msra.mxu0 %v2130_v23  ;;  %v2129_v60 = vsel %vm1625_vm2, %v2049_v21, %v2085_v28 }
 0x51d   : > { %v2083_v30 = vpop.permute.xlu1 %2082  ;;  %2919 = vmatprep.subr.mxu0 %v2129_v60 }
 0x51e   : > { %2920 = vmatpush3.msra.mxu0 %v2129_v60  ;;  %v2128_v63 = vsel %vm1625_vm2, %v2048_v48, %v2083_v30 }
 0x51f   : > { %v2081_v24 = vpop.permute.xlu0 %2080  ;;  %2921 = vmatprep.subr.mxu0 %v2128_v63 }
 0x520   : > { %2922 = vmatpush3.msra.mxu0 %v2128_v63  ;;  %v2127_v1 = vsel %vm1625_vm2, %v2047_v62, %v2081_v24 }
 0x521   : > { %v2079_v26 = vpop.permute.xlu1 %2078  ;;  %2923 = vmatprep.subr.mxu0 %v2127_v1 }
 0x522   : > { %2924 = vmatpush3.msra.mxu0 %v2127_v1  ;;  %v2126_v41 = vsel %vm1625_vm2, %v2046_v58, %v2079_v26 }
 0x523   : > { %2925 = vmatprep.subr.mxu0 %v2126_v41 }
 0x524   : > { %2926 = vmatpush3.msra.mxu0 %v2126_v41 }
 0x525   : > { %2928 = vmatmul.mubr.msk.f32.vlgmr.msra.gmra.mxu0 %vm844_vm7, %v3046_v0 }
 0x5e5   : > { %v2929_v57 = vpop.f32.mrf.mxu0 }
 0x5e6   : > { %v2220_v22 = vadd.f32 %v2929_v57, %v2143_v20  ;;  %2227 = sbr.rel (%p2567_p6) target bundleno = 1857 (0x741), region = 80 }
 0x5e7   : > { %v2210_v43 = vpop.f32.mrf.mxu0 }
 0x5e8   : > { %2223 = vst.msk [vmem:[#allocation5 + $0x8] sm:$0xff] %vm2221_vm8, %v2220_v22  ;;  %v2219_v2 = vadd.f32 %v2210_v43, %v2142_v47 }
 0x5ea   : > { %2222 = vst.msk [vmem:[#allocation5] sm:$0xff] %vm2221_vm8, %v2219_v2 }
 0x5eb   : > { %v2247_v25 = vld [vmem:[%s3684_s9 + $0x18] sm:$0xff]  ;;  %v2246_v56 = vld [vmem:[%s3684_s9 + $0x10] sm:$0xff]  ;;  %v2245_v4 = vld [vmem:[%s3684_s9 + $0x8] sm:$0xff] }
 0x5ec   : > { %2930 = vmatprep.subr.mxu0 %v2247_v25  ;;  %v2244_v5 = vld [vmem:[%s3684_s9] sm:$0xff] }
 0x5ed   : > { %2931 = vmatpush3.msra.mxu0 %v2247_v25  ;;  %v2568_v7 = vld [vmem:[%s3685_s10] ss:$0 sm:$0xff] }
 0x5ee   : > { %2932 = vmatprep.subr.mxu0 %v2246_v56 }
 0x5ef   : > { %v2229_v27 = vld [vmem:[#allocation5 + $0x8] sm:$0xff]  ;;  %2933 = vmatpush3.msra.mxu0 %v2246_v56 }
 0x5f0   : > { %v2231_v59 = vadd.f32 1e-08, %v2229_v27  ;;  %2934 = vmatprep.subr.mxu0 %v2245_v4 }
 0x5f1   : > { %v2228_v45 = vld [vmem:[#allocation5] sm:$0xff]  ;;  %2935 = vmatpush3.msra.mxu0 %v2245_v4 }
 0x5f2   : > { %v2230_v3 = vadd.f32 1e-08, %v2228_v45  ;;  %2936 = vmatprep.subr.mxu0 %v2244_v5 }
 0x5f3   : > { %2937 = vmatpush3.msra.mxu0 %v2244_v5 }
 0x5f4   : > { %2234 = vrot.lane.b32.xlu0 %v2230_v3, %s3047_s16 }
 0x5f8   : > { %2236 = vrot.lane.b32.xlu0 %v2231_v59, %s3047_s16 }
 0x666   : > { %v2235_v61 = vpop.permute.xlu0 %2234 }
 0x667   : > { %3000 = vrcp.f32 %v2235_v61 }
 0x66a   : > { %v2237_v0 = vpop.permute.xlu0 %2236 }
 0x66b   : > { %3002 = vrcp.f32 %v2237_v0 }
 0x674   : > { %v3001_v55 = vpop.eup %3000 }
 0x675   : > { %v2241_v6 = vmul.f32 %v3001_v55, %v2228_v45 }
 0x677   : > { %2938 = vmatprep.mubr.msk.f32.mxu0 %vm1625_vm2, %v2241_v6 }
 0x678   : > { %v3003_v31 = vpop.eup %3002 }
 0x679   : > { %v2243_v29 = vmul.f32 %v3003_v31, %v2229_v27 }
 0x67b   : > { %2939 = vmatmul.mubr.msk.f32.vlgmr.msra.gmra.mxu0 %vm1625_vm2, %v2243_v29 }
 0x73b   : > { %v2940_v8 = vpop.f32.mrf.mxu0 }
 0x73c   : > { %v2333_v9 = vadd.f32 %v2940_v8, %v2568_v7 }
 0x73d   : > { %v2327_v10 = vpop.f32.mrf.mxu0 }
 0x73e   : > { %2337 = vst.msk [vmem:[#allocation6 + $0x8] sm:$0xff] %vm1625_vm2, %v2333_v9  ;;  %v2328_v11 = vadd.f32 %v2568_v7, %v2327_v10 }
 0x740   : > { %2336 = vst.msk [vmem:[#allocation6] sm:$0xff] %vm1625_vm2, %v2328_v11 }
 0x741 PF: > { %p2945_p7 = scmp.eq.s32.totalorder %s3127_s26, 2  ;;  %s3048_s18 = smov [#allocation6]  }
 0x742   : > { %s2344_s21 = sshll.u32 %s3048_s18, 4  ;;  %s2345_s21 = int_to_ptr.vmem [resolvable:$true] %s2344_s21 }
 0x743   : > { %s3004_s22 = scalar_lea.vmem %s2345_s21, 256  ;;  %p3011_p11 = scmp.lt.s32.totalorder %s2345_s21, %s2345_s21 }
 0x744   : > { %p3005_p8 = scmp.ne.s32.totalorder %s2345_s21, %s3004_s22  ;;  %p3012_p12 = scmp.lt.s32.totalorder %s3004_s22, %s3004_s22 }
 0x746   : > { %p3006_p9 = pnand %p3005_p8, %p2945_p7  ;;  %p3013_p13 = por %p3012_p12, %p3011_p11 }
 0x748   : > { %p3007_p10 = pneg %p3006_p9 }
 0x74a   : > { %p3014_p0 = pnand %p3013_p13, %p3007_p10 }
 0x74c   : > { %3017 = shalt.err (!%p3014_p0)
}
 0x74d   : > { %s3049_s23 = smov 128   ;;  %s3050_s28 = smov 8  }
 0x74e   : > { %2942 = dma.vmem_to_hbm [thread:$0]  (%p2945_p7), %s2345_s21, 256, %s3688_s13, [#allocation7], %s3049_s23, %s3049_s23, %s3050_s28  }
 0x74f   : > { %3033 = dma.done.wait (%p2945_p7), [#allocation7], 256  }
 0x750   : > { %3035 = vsyncadd (%p2945_p7), [#allocation7], 4294967040 }
 0x751 PF: > { %s24_s25 = sadd.s32 1, %s3038_s25  }
 0x752   : > { %p21_p1 = scmp.ge.s32.totalorder %s24_s25, 5  }
 0x754   :  { %23 = sbr.rel (!%p21_p1) target bundleno = 1 (0x1), region = 116 }
 0x759   :  { %2360 = vsyncpa [#allocation7], 1 }
 0x75a   :  { %2362 = vsyncpa [#allocation7 + $0x1], 1 }

</bundles_post_ra>
